<compile_context>
chip_gen: v7x
topology: tpu7x:2x2x1
jax: 0.10.0
libtpu: 0.0.40
codegen_flags: <defaults>
</compile_context>

<pallas_src>
import jax
import jax.numpy as jnp
from jax import lax
from jax.experimental import pallas as pl
from jax.experimental.pallas import tpu as pltpu


# ----------------------------------------------------------------------------
# Fused kernel: corrcoef + concat + RK4 time loop + lane-dense output store.
# One grid step == one trajectory sample.
# ----------------------------------------------------------------------------
def _fused_solver_kernel(dts_ref, x_ref, w1_ref, b1_ref, w2_ref, b2_ref, out_ref):
    n = x_ref.shape[1]          # n_traj
    d = x_ref.shape[2]          # n_dims == latents
    td = out_ref.shape[2]       # T * D  (lane-dense output width, 128 here)
    num_steps = dts_ref.shape[0]

    x = x_ref[0].astype(jnp.float32)                       # (N, D)

    # --- att0[i] = corrcoef(first_point[i].T) -------------------------------
    # Normalize columns first so corr = xn^T @ xn (no diag mask / iota needed;
    # the 1/(N-1) factors cancel).  Small eps guards zero-variance features.
    xc = x - jnp.mean(x, axis=0, keepdims=True)            # center over trajectories
    inv_std = lax.rsqrt(jnp.sum(xc * xc, axis=0, keepdims=True) + 1e-12)
    xn = xc * inv_std                                       # (N, D)
    att = jnp.dot(xn.T, xn, preferred_element_type=jnp.float32)   # (D, D)

    # xx = cat([first_point_i, att0_i], dim=0) — never materialized in HBM.
    y = jnp.concatenate([x, att], axis=0)                   # (N + D, D)
    m = n + d

    # ODE gradient: dy/dt = tanh(y @ W1 + b1) @ W2 + b2.
    # Weights stay resident in VMEM; bias broadcasts hoisted out of the loop.
    w1 = w1_ref[...]
    w2 = w2_ref[...]
    b1 = jnp.broadcast_to(b1_ref[...], (m, w1_ref.shape[1]))
    b2 = jnp.broadcast_to(b2_ref[...], (m, w2_ref.shape[1]))

    def f(z):
        h = jnp.tanh(jnp.dot(z, w1, preferred_element_type=jnp.float32) + b1)
        return jnp.dot(h, w2, preferred_element_type=jnp.float32) + b2

    # Lane-scatter helper: place the (N, D) chunk for time index t at lanes
    # [t*D, (t+1)*D) of the lane-dense (N, T*D) output slab.  Implemented as a
    # tiny 0/1-selector matmul on the otherwise idle MXU, which avoids
    # minor-dim concatenation / unaligned masked stores and keeps the final
    # HBM writeback a single dense (N, 128) block.
    lane_ids = lax.broadcasted_iota(jnp.int32, (d, td), 1)
    row_ids = lax.broadcasted_iota(jnp.int32, (d, td), 0)

    def place(chunk, t):
        sel = (lane_ids == row_ids + t * d).astype(jnp.float32)
        return jnp.dot(chunk, sel, preferred_element_type=jnp.float32)

    slab = place(y[:n], 0)      # t = 0 is the initial state (== first_point_i)

    # Fixed-step RK4 over the requested time points, fully unrolled
    # (T is static) so the LLO scheduler can overlap MXU / EUP / VPU work
    # across the four stages.  dt values are scalar reads from SMEM.
    for t in range(num_steps):
        dt = dts_ref[t]
        k1 = f(y)
        k2 = f(y + (0.5 * dt) * k1)
        k3 = f(y + (0.5 * dt) * k2)
        k4 = f(y + dt * k3)
        y = y + (dt / 6.0) * (k1 + 2.0 * k2 + 2.0 * k3 + k4)
        slab = slab + place(y[:n], t + 1)   # attention rows dropped in-kernel

    out_ref[0] = slab.astype(out_ref.dtype)


# ----------------------------------------------------------------------------
# Wrapper: one pallas_call for the whole forward pass.
# ----------------------------------------------------------------------------
@jax.jit
def diffeq_solver_attention_forward(first_point, time_steps_to_predict, params):
    w1, b1, w2, b2 = params
    s, n, d = first_point.shape             # n_traj_samples, n_traj, n_dims
    t = time_steps_to_predict.shape[0]
    dts = (time_steps_to_predict[1:] - time_steps_to_predict[:-1]).astype(jnp.float32)

    out_flat = pl.pallas_call(
        _fused_solver_kernel,
        out_shape=jax.ShapeDtypeStruct((s, n, t * d), jnp.float32),
        grid=(s,),
        in_specs=[
            pl.BlockSpec(memory_space=pltpu.MemorySpace.SMEM),   # dts (scalars)
            pl.BlockSpec((1, n, d), lambda i: (i, 0, 0)),        # first_point
            pl.BlockSpec(w1.shape, lambda i: (0, 0)),            # W1 (resident)
            pl.BlockSpec(b1.shape, lambda i: (0, 0)),            # b1
            pl.BlockSpec(w2.shape, lambda i: (0, 0)),            # W2
            pl.BlockSpec(b2.shape, lambda i: (0, 0)),            # b2
        ],
        out_specs=pl.BlockSpec((1, n, t * d), lambda i: (i, 0, 0)),
        compiler_params=pltpu.CompilerParams(
            dimension_semantics=("parallel",)),                  # samples -> v7x TCs
    )(dts, first_point, w1, b1, w2, b2)

    # (S, n_traj, T*D) -> (S, n_traj, T, D): contiguous reshape, no data movement.
    return out_flat.reshape(s, n, t, d)


# ----------------------------------------------------------------------------
# Pure-JAX reference (same fixed-step RK4 algorithm) for correctness checking.
# ----------------------------------------------------------------------------
def _reference_forward(first_point, time_steps, params):
    w1, b1, w2, b2 = params
    s, n, d = first_point.shape
    xc = first_point - jnp.mean(first_point, axis=1, keepdims=True)
    xn = xc / jnp.sqrt(jnp.sum(xc * xc, axis=1, keepdims=True) + 1e-12)
    att0 = jnp.einsum("snd,sne->sde", xn, xn, precision="highest")   # (S, D, D)
    xx = jnp.concatenate([first_point, att0], axis=1)                # (S, N+D, D)

    def f(y):
        h = jnp.tanh(jnp.einsum("smd,dh->smh", y, w1, precision="highest") + b1)
        return jnp.einsum("smh,hd->smd", h, w2, precision="highest") + b2

    dts = time_steps[1:] - time_steps[:-1]
    ys = [xx]
    y = xx
    for i in range(dts.shape[0]):
        dt = dts[i]
        k1 = f(y)
        k2 = f(y + 0.5 * dt * k1)
        k3 = f(y + 0.5 * dt * k2)
        k4 = f(y + dt * k3)
        y = y + (dt / 6.0) * (k1 + 2.0 * k2 + 2.0 * k3 + k4)
        ys.append(y)
    pred_y = jnp.stack(ys, axis=0)[:, :, :n, :]      # (T, S, N, D)
    return jnp.transpose(pred_y, (1, 2, 0, 3))       # (S, N, T, D)


if __name__ == "__main__":
    key = jax.random.PRNGKey(0)
    # n_traj_samples, n_traj, latents(=n_dims), hidden, time steps
    S, N, D, H, T = 2, 32, 16, 32, 8
    k1, k2, k3 = jax.random.split(key, 3)

    first_point = jax.random.normal(k1, (S, N, D), dtype=jnp.float32)
    time_steps = jnp.linspace(0.0, 1.0, T, dtype=jnp.float32)

    # deterministic synthetic ode_func parameters
    w1 = 0.1 * jax.random.normal(k2, (D, H), dtype=jnp.float32)
    b1 = jnp.zeros((1, H), dtype=jnp.float32)
    w2 = 0.1 * jax.random.normal(k3, (H, D), dtype=jnp.float32)
    b2 = jnp.zeros((1, D), dtype=jnp.float32)
    params = (w1, b1, w2, b2)

    out = diffeq_solver_attention_forward(first_point, time_steps, params)
    jax.block_until_ready(out)

    assert out.shape == (S, N, T, D), out.shape
    # mirrors the torch module's assert: trajectory at t[0] equals first_point
    assert float(jnp.max(jnp.abs(out[:, :, 0, :] - first_point))) < 1e-3
    # cross-check against the pure-JAX reference (same RK4 algorithm)
    ref = _reference_forward(first_point, time_steps, params)
    assert bool(jnp.allclose(out, ref, rtol=2e-2, atol=2e-2))

    print("KERNEL_OK")
</pallas_src>

<mosaic_0001>
module attributes {stable_mosaic.version = 11 : i64} {
  func.func @_fused_solver_kernel(%arg0: i32, %arg1: memref<7xf32, #tpu.memory_space<smem>>, %arg2: memref<1x32x16xf32, #tpu.memory_space<vmem>>, %arg3: memref<16x32xf32, #tpu.memory_space<vmem>>, %arg4: memref<1x32xf32, #tpu.memory_space<vmem>>, %arg5: memref<32x16xf32, #tpu.memory_space<vmem>>, %arg6: memref<1x16xf32, #tpu.memory_space<vmem>>, %arg7: memref<1x32x128xf32, #tpu.memory_space<vmem>>) attributes {dimension_semantics = [#tpu.dimension_semantics<parallel>], iteration_bounds = array<i64: 2>, scalar_prefetch = 0 : i64, scratch_operands = 0 : i64, tpu.core_type = #tpu.core_type<tc>, window_params = [{transform_indices = @transform_0, window_bounds = array<i64: 7>}, {transform_indices = @transform_1, window_bounds = array<i64: 1, 32, 16>}, {pipeline_mode = #tpu.pipeline_mode<synchronous>, transform_indices = @transform_2, window_bounds = array<i64: 16, 32>}, {pipeline_mode = #tpu.pipeline_mode<synchronous>, transform_indices = @transform_3, window_bounds = array<i64: 1, 32>}, {pipeline_mode = #tpu.pipeline_mode<synchronous>, transform_indices = @transform_4, window_bounds = array<i64: 32, 16>}, {pipeline_mode = #tpu.pipeline_mode<synchronous>, transform_indices = @transform_5, window_bounds = array<i64: 1, 16>}, {transform_indices = @transform_6, window_bounds = array<i64: 1, 32, 128>}]} {
    %c0 = arith.constant 0 : index
    %c0_0 = arith.constant 0 : index
    %c0_1 = arith.constant 0 : index
    %0 = vector.load %arg2[%c0, %c0_0, %c0_1] : memref<1x32x16xf32, #tpu.memory_space<vmem>>, vector<1x32x16xf32>
    %1 = vector.shape_cast %0 : vector<1x32x16xf32> to vector<32x16xf32>
    %cst = arith.constant dense<0.000000e+00> : vector<16xf32>
    %2 = vector.multi_reduction <add>, %1, %cst [0] : vector<32x16xf32> to vector<16xf32>
    %3 = vector.shape_cast %2 : vector<16xf32> to vector<1x16xf32>
    %cst_2 = arith.constant 3.200000e+01 : f32
    %4 = vector.broadcast %cst_2 : f32 to vector<1x16xf32>
    %5 = arith.divf %3, %4 : vector<1x16xf32>
    %6 = vector.broadcast %5 : vector<1x16xf32> to vector<32x16xf32>
    %7 = arith.subf %1, %6 : vector<32x16xf32>
    %8 = arith.mulf %7, %7 : vector<32x16xf32>
    %cst_3 = arith.constant dense<0.000000e+00> : vector<16xf32>
    %9 = vector.multi_reduction <add>, %8, %cst_3 [0] : vector<32x16xf32> to vector<16xf32>
    %10 = vector.shape_cast %9 : vector<16xf32> to vector<1x16xf32>
    %cst_4 = arith.constant 9.99999996E-13 : f32
    %11 = vector.broadcast %cst_4 : f32 to vector<1x16xf32>
    %12 = arith.addf %10, %11 : vector<1x16xf32>
    %13 = math.rsqrt %12 : vector<1x16xf32>
    %14 = vector.broadcast %13 : vector<1x16xf32> to vector<32x16xf32>
    %15 = arith.mulf %7, %14 : vector<32x16xf32>
    %16 = tpu.transpose %15, [1, 0] : vector<32x16xf32> -> vector<16x32xf32>
    %cst_5 = arith.constant dense<0.000000e+00> : vector<16x16xf32>
    %17 = tpu.matmul %16, %15, %cst_5 {dimension_numbers = #tpu.dot_dimension_numbers<[1], [0], [0], [1], [0, 0, 1, 1], [], []>} : vector<16x32xf32>, vector<32x16xf32>, vector<16x16xf32> -> vector<16x16xf32>
    %18 = tpu.concatenate %1, %17 in 0 : vector<32x16xf32>, vector<16x16xf32> -> vector<48x16xf32>
    %c0_6 = arith.constant 0 : index
    %c0_7 = arith.constant 0 : index
    %19 = vector.load %arg3[%c0_6, %c0_7] : memref<16x32xf32, #tpu.memory_space<vmem>>, vector<16x32xf32>
    %c0_8 = arith.constant 0 : index
    %c0_9 = arith.constant 0 : index
    %20 = vector.load %arg5[%c0_8, %c0_9] : memref<32x16xf32, #tpu.memory_space<vmem>>, vector<32x16xf32>
    %c0_10 = arith.constant 0 : index
    %c0_11 = arith.constant 0 : index
    %21 = vector.load %arg4[%c0_10, %c0_11] : memref<1x32xf32, #tpu.memory_space<vmem>>, vector<1x32xf32>
    %22 = vector.shape_cast %21 : vector<1x32xf32> to vector<1x32xf32>
    %23 = vector.broadcast %22 : vector<1x32xf32> to vector<48x32xf32>
    %c0_12 = arith.constant 0 : index
    %c0_13 = arith.constant 0 : index
    %24 = vector.load %arg6[%c0_12, %c0_13] : memref<1x16xf32, #tpu.memory_space<vmem>>, vector<1x16xf32>
    %25 = vector.shape_cast %24 : vector<1x16xf32> to vector<1x16xf32>
    %26 = vector.broadcast %25 : vector<1x16xf32> to vector<48x16xf32>
    %27 = tpu.iota {dimensions = array<i32: 1>} : vector<16x128xi32>
    %28 = tpu.iota {dimensions = array<i32: 0>} : vector<16x128xi32>
    %29 = vector.extract_strided_slice %18 {offsets = [0, 0], sizes = [32, 16], strides = [1, 1]} : vector<48x16xf32> to vector<32x16xf32>
    %c0_i32 = arith.constant 0 : i32
    %30 = vector.broadcast %c0_i32 : i32 to vector<16x128xi32>
    %31 = arith.addi %28, %30 : vector<16x128xi32>
    %32 = arith.cmpi eq, %27, %31 : vector<16x128xi32>
    %33 = arith.extui %32 : vector<16x128xi1> to vector<16x128xi32>
    %34 = arith.sitofp %33 : vector<16x128xi32> to vector<16x128xf32>
    %cst_14 = arith.constant dense<0.000000e+00> : vector<32x128xf32>
    %35 = tpu.matmul %29, %34, %cst_14 {dimension_numbers = #tpu.dot_dimension_numbers<[1], [0], [0], [1], [0, 0, 1, 1], [], []>} : vector<32x16xf32>, vector<16x128xf32>, vector<32x128xf32> -> vector<32x128xf32>
    %c0_15 = arith.constant 0 : index
    %36 = memref.load %arg1[%c0_15] : memref<7xf32, #tpu.memory_space<smem>>
    %cst_16 = arith.constant dense<0.000000e+00> : vector<48x32xf32>
    %37 = tpu.matmul %18, %19, %cst_16 {dimension_numbers = #tpu.dot_dimension_numbers<[1], [0], [0], [1], [0, 0, 1, 1], [], []>} : vector<48x16xf32>, vector<16x32xf32>, vector<48x32xf32> -> vector<48x32xf32>
    %38 = arith.addf %37, %23 : vector<48x32xf32>
    %39 = math.tanh %38 : vector<48x32xf32>
    %cst_17 = arith.constant dense<0.000000e+00> : vector<48x16xf32>
    %40 = tpu.matmul %39, %20, %cst_17 {dimension_numbers = #tpu.dot_dimension_numbers<[1], [0], [0], [1], [0, 0, 1, 1], [], []>} : vector<48x32xf32>, vector<32x16xf32>, vector<48x16xf32> -> vector<48x16xf32>
    %41 = arith.addf %40, %26 : vector<48x16xf32>
    %cst_18 = arith.constant 5.000000e-01 : f32
    %42 = arith.mulf %cst_18, %36 : f32
    %43 = vector.broadcast %42 : f32 to vector<48x16xf32>
    %44 = arith.mulf %43, %41 : vector<48x16xf32>
    %45 = arith.addf %18, %44 : vector<48x16xf32>
    %cst_19 = arith.constant dense<0.000000e+00> : vector<48x32xf32>
    %46 = tpu.matmul %45, %19, %cst_19 {dimension_numbers = #tpu.dot_dimension_numbers<[1], [0], [0], [1], [0, 0, 1, 1], [], []>} : vector<48x16xf32>, vector<16x32xf32>, vector<48x32xf32> -> vector<48x32xf32>
    %47 = arith.addf %46, %23 : vector<48x32xf32>
    %48 = math.tanh %47 : vector<48x32xf32>
    %cst_20 = arith.constant dense<0.000000e+00> : vector<48x16xf32>
    %49 = tpu.matmul %48, %20, %cst_20 {dimension_numbers = #tpu.dot_dimension_numbers<[1], [0], [0], [1], [0, 0, 1, 1], [], []>} : vector<48x32xf32>, vector<32x16xf32>, vector<48x16xf32> -> vector<48x16xf32>
    %50 = arith.addf %49, %26 : vector<48x16xf32>
    %cst_21 = arith.constant 5.000000e-01 : f32
    %51 = arith.mulf %cst_21, %36 : f32
    %52 = vector.broadcast %51 : f32 to vector<48x16xf32>
    %53 = arith.mulf %52, %50 : vector<48x16xf32>
    %54 = arith.addf %18, %53 : vector<48x16xf32>
    %cst_22 = arith.constant dense<0.000000e+00> : vector<48x32xf32>
    %55 = tpu.matmul %54, %19, %cst_22 {dimension_numbers = #tpu.dot_dimension_numbers<[1], [0], [0], [1], [0, 0, 1, 1], [], []>} : vector<48x16xf32>, vector<16x32xf32>, vector<48x32xf32> -> vector<48x32xf32>
    %56 = arith.addf %55, %23 : vector<48x32xf32>
    %57 = math.tanh %56 : vector<48x32xf32>
    %cst_23 = arith.constant dense<0.000000e+00> : vector<48x16xf32>
    %58 = tpu.matmul %57, %20, %cst_23 {dimension_numbers = #tpu.dot_dimension_numbers<[1], [0], [0], [1], [0, 0, 1, 1], [], []>} : vector<48x32xf32>, vector<32x16xf32>, vector<48x16xf32> -> vector<48x16xf32>
    %59 = arith.addf %58, %26 : vector<48x16xf32>
    %60 = vector.broadcast %36 : f32 to vector<48x16xf32>
    %61 = arith.mulf %60, %59 : vector<48x16xf32>
    %62 = arith.addf %18, %61 : vector<48x16xf32>
    %cst_24 = arith.constant dense<0.000000e+00> : vector<48x32xf32>
    %63 = tpu.matmul %62, %19, %cst_24 {dimension_numbers = #tpu.dot_dimension_numbers<[1], [0], [0], [1], [0, 0, 1, 1], [], []>} : vector<48x16xf32>, vector<16x32xf32>, vector<48x32xf32> -> vector<48x32xf32>
    %64 = arith.addf %63, %23 : vector<48x32xf32>
    %65 = math.tanh %64 : vector<48x32xf32>
    %cst_25 = arith.constant dense<0.000000e+00> : vector<48x16xf32>
    %66 = tpu.matmul %65, %20, %cst_25 {dimension_numbers = #tpu.dot_dimension_numbers<[1], [0], [0], [1], [0, 0, 1, 1], [], []>} : vector<48x32xf32>, vector<32x16xf32>, vector<48x16xf32> -> vector<48x16xf32>
    %67 = arith.addf %66, %26 : vector<48x16xf32>
    %cst_26 = arith.constant 6.000000e+00 : f32
    %68 = arith.divf %36, %cst_26 : f32
    %cst_27 = arith.constant 2.000000e+00 : f32
    %69 = vector.broadcast %cst_27 : f32 to vector<48x16xf32>
    %70 = arith.mulf %69, %50 : vector<48x16xf32>
    %71 = arith.addf %41, %70 : vector<48x16xf32>
    %cst_28 = arith.constant 2.000000e+00 : f32
    %72 = vector.broadcast %cst_28 : f32 to vector<48x16xf32>
    %73 = arith.mulf %72, %59 : vector<48x16xf32>
    %74 = arith.addf %71, %73 : vector<48x16xf32>
    %75 = arith.addf %74, %67 : vector<48x16xf32>
    %76 = vector.broadcast %68 : f32 to vector<48x16xf32>
    %77 = arith.mulf %76, %75 : vector<48x16xf32>
    %78 = arith.addf %18, %77 : vector<48x16xf32>
    %79 = vector.extract_strided_slice %78 {offsets = [0, 0], sizes = [32, 16], strides = [1, 1]} : vector<48x16xf32> to vector<32x16xf32>
    %c16_i32 = arith.constant 16 : i32
    %80 = vector.broadcast %c16_i32 : i32 to vector<16x128xi32>
    %81 = arith.addi %28, %80 : vector<16x128xi32>
    %82 = arith.cmpi eq, %27, %81 : vector<16x128xi32>
    %83 = arith.extui %82 : vector<16x128xi1> to vector<16x128xi32>
    %84 = arith.sitofp %83 : vector<16x128xi32> to vector<16x128xf32>
    %cst_29 = arith.constant dense<0.000000e+00> : vector<32x128xf32>
    %85 = tpu.matmul %79, %84, %cst_29 {dimension_numbers = #tpu.dot_dimension_numbers<[1], [0], [0], [1], [0, 0, 1, 1], [], []>} : vector<32x16xf32>, vector<16x128xf32>, vector<32x128xf32> -> vector<32x128xf32>
    %86 = arith.addf %35, %85 : vector<32x128xf32>
    %c1 = arith.constant 1 : index
    %87 = memref.load %arg1[%c1] : memref<7xf32, #tpu.memory_space<smem>>
    %cst_30 = arith.constant dense<0.000000e+00> : vector<48x32xf32>
    %88 = tpu.matmul %78, %19, %cst_30 {dimension_numbers = #tpu.dot_dimension_numbers<[1], [0], [0], [1], [0, 0, 1, 1], [], []>} : vector<48x16xf32>, vector<16x32xf32>, vector<48x32xf32> -> vector<48x32xf32>
    %89 = arith.addf %88, %23 : vector<48x32xf32>
    %90 = math.tanh %89 : vector<48x32xf32>
    %cst_31 = arith.constant dense<0.000000e+00> : vector<48x16xf32>
    %91 = tpu.matmul %90, %20, %cst_31 {dimension_numbers = #tpu.dot_dimension_numbers<[1], [0], [0], [1], [0, 0, 1, 1], [], []>} : vector<48x32xf32>, vector<32x16xf32>, vector<48x16xf32> -> vector<48x16xf32>
    %92 = arith.addf %91, %26 : vector<48x16xf32>
    %cst_32 = arith.constant 5.000000e-01 : f32
    %93 = arith.mulf %cst_32, %87 : f32
    %94 = vector.broadcast %93 : f32 to vector<48x16xf32>
    %95 = arith.mulf %94, %92 : vector<48x16xf32>
    %96 = arith.addf %78, %95 : vector<48x16xf32>
    %cst_33 = arith.constant dense<0.000000e+00> : vector<48x32xf32>
    %97 = tpu.matmul %96, %19, %cst_33 {dimension_numbers = #tpu.dot_dimension_numbers<[1], [0], [0], [1], [0, 0, 1, 1], [], []>} : vector<48x16xf32>, vector<16x32xf32>, vector<48x32xf32> -> vector<48x32xf32>
    %98 = arith.addf %97, %23 : vector<48x32xf32>
    %99 = math.tanh %98 : vector<48x32xf32>
    %cst_34 = arith.constant dense<0.000000e+00> : vector<48x16xf32>
    %100 = tpu.matmul %99, %20, %cst_34 {dimension_numbers = #tpu.dot_dimension_numbers<[1], [0], [0], [1], [0, 0, 1, 1], [], []>} : vector<48x32xf32>, vector<32x16xf32>, vector<48x16xf32> -> vector<48x16xf32>
    %101 = arith.addf %100, %26 : vector<48x16xf32>
    %cst_35 = arith.constant 5.000000e-01 : f32
    %102 = arith.mulf %cst_35, %87 : f32
    %103 = vector.broadcast %102 : f32 to vector<48x16xf32>
    %104 = arith.mulf %103, %101 : vector<48x16xf32>
    %105 = arith.addf %78, %104 : vector<48x16xf32>
    %cst_36 = arith.constant dense<0.000000e+00> : vector<48x32xf32>
    %106 = tpu.matmul %105, %19, %cst_36 {dimension_numbers = #tpu.dot_dimension_numbers<[1], [0], [0], [1], [0, 0, 1, 1], [], []>} : vector<48x16xf32>, vector<16x32xf32>, vector<48x32xf32> -> vector<48x32xf32>
    %107 = arith.addf %106, %23 : vector<48x32xf32>
    %108 = math.tanh %107 : vector<48x32xf32>
    %cst_37 = arith.constant dense<0.000000e+00> : vector<48x16xf32>
    %109 = tpu.matmul %108, %20, %cst_37 {dimension_numbers = #tpu.dot_dimension_numbers<[1], [0], [0], [1], [0, 0, 1, 1], [], []>} : vector<48x32xf32>, vector<32x16xf32>, vector<48x16xf32> -> vector<48x16xf32>
    %110 = arith.addf %109, %26 : vector<48x16xf32>
    %111 = vector.broadcast %87 : f32 to vector<48x16xf32>
    %112 = arith.mulf %111, %110 : vector<48x16xf32>
    %113 = arith.addf %78, %112 : vector<48x16xf32>
    %cst_38 = arith.constant dense<0.000000e+00> : vector<48x32xf32>
    %114 = tpu.matmul %113, %19, %cst_38 {dimension_numbers = #tpu.dot_dimension_numbers<[1], [0], [0], [1], [0, 0, 1, 1], [], []>} : vector<48x16xf32>, vector<16x32xf32>, vector<48x32xf32> -> vector<48x32xf32>
    %115 = arith.addf %114, %23 : vector<48x32xf32>
    %116 = math.tanh %115 : vector<48x32xf32>
    %cst_39 = arith.constant dense<0.000000e+00> : vector<48x16xf32>
    %117 = tpu.matmul %116, %20, %cst_39 {dimension_numbers = #tpu.dot_dimension_numbers<[1], [0], [0], [1], [0, 0, 1, 1], [], []>} : vector<48x32xf32>, vector<32x16xf32>, vector<48x16xf32> -> vector<48x16xf32>
    %118 = arith.addf %117, %26 : vector<48x16xf32>
    %cst_40 = arith.constant 6.000000e+00 : f32
    %119 = arith.divf %87, %cst_40 : f32
    %cst_41 = arith.constant 2.000000e+00 : f32
    %120 = vector.broadcast %cst_41 : f32 to vector<48x16xf32>
    %121 = arith.mulf %120, %101 : vector<48x16xf32>
    %122 = arith.addf %92, %121 : vector<48x16xf32>
    %cst_42 = arith.constant 2.000000e+00 : f32
    %123 = vector.broadcast %cst_42 : f32 to vector<48x16xf32>
    %124 = arith.mulf %123, %110 : vector<48x16xf32>
    %125 = arith.addf %122, %124 : vector<48x16xf32>
    %126 = arith.addf %125, %118 : vector<48x16xf32>
    %127 = vector.broadcast %119 : f32 to vector<48x16xf32>
    %128 = arith.mulf %127, %126 : vector<48x16xf32>
    %129 = arith.addf %78, %128 : vector<48x16xf32>
    %130 = vector.extract_strided_slice %129 {offsets = [0, 0], sizes = [32, 16], strides = [1, 1]} : vector<48x16xf32> to vector<32x16xf32>
    %c32_i32 = arith.constant 32 : i32
    %131 = vector.broadcast %c32_i32 : i32 to vector<16x128xi32>
    %132 = arith.addi %28, %131 : vector<16x128xi32>
    %133 = arith.cmpi eq, %27, %132 : vector<16x128xi32>
    %134 = arith.extui %133 : vector<16x128xi1> to vector<16x128xi32>
    %135 = arith.sitofp %134 : vector<16x128xi32> to vector<16x128xf32>
    %cst_43 = arith.constant dense<0.000000e+00> : vector<32x128xf32>
    %136 = tpu.matmul %130, %135, %cst_43 {dimension_numbers = #tpu.dot_dimension_numbers<[1], [0], [0], [1], [0, 0, 1, 1], [], []>} : vector<32x16xf32>, vector<16x128xf32>, vector<32x128xf32> -> vector<32x128xf32>
    %137 = arith.addf %86, %136 : vector<32x128xf32>
    %c2 = arith.constant 2 : index
    %138 = memref.load %arg1[%c2] : memref<7xf32, #tpu.memory_space<smem>>
    %cst_44 = arith.constant dense<0.000000e+00> : vector<48x32xf32>
    %139 = tpu.matmul %129, %19, %cst_44 {dimension_numbers = #tpu.dot_dimension_numbers<[1], [0], [0], [1], [0, 0, 1, 1], [], []>} : vector<48x16xf32>, vector<16x32xf32>, vector<48x32xf32> -> vector<48x32xf32>
    %140 = arith.addf %139, %23 : vector<48x32xf32>
    %141 = math.tanh %140 : vector<48x32xf32>
    %cst_45 = arith.constant dense<0.000000e+00> : vector<48x16xf32>
    %142 = tpu.matmul %141, %20, %cst_45 {dimension_numbers = #tpu.dot_dimension_numbers<[1], [0], [0], [1], [0, 0, 1, 1], [], []>} : vector<48x32xf32>, vector<32x16xf32>, vector<48x16xf32> -> vector<48x16xf32>
    %143 = arith.addf %142, %26 : vector<48x16xf32>
    %cst_46 = arith.constant 5.000000e-01 : f32
    %144 = arith.mulf %cst_46, %138 : f32
    %145 = vector.broadcast %144 : f32 to vector<48x16xf32>
    %146 = arith.mulf %145, %143 : vector<48x16xf32>
    %147 = arith.addf %129, %146 : vector<48x16xf32>
    %cst_47 = arith.constant dense<0.000000e+00> : vector<48x32xf32>
    %148 = tpu.matmul %147, %19, %cst_47 {dimension_numbers = #tpu.dot_dimension_numbers<[1], [0], [0], [1], [0, 0, 1, 1], [], []>} : vector<48x16xf32>, vector<16x32xf32>, vector<48x32xf32> -> vector<48x32xf32>
    %149 = arith.addf %148, %23 : vector<48x32xf32>
    %150 = math.tanh %149 : vector<48x32xf32>
    %cst_48 = arith.constant dense<0.000000e+00> : vector<48x16xf32>
    %151 = tpu.matmul %150, %20, %cst_48 {dimension_numbers = #tpu.dot_dimension_numbers<[1], [0], [0], [1], [0, 0, 1, 1], [], []>} : vector<48x32xf32>, vector<32x16xf32>, vector<48x16xf32> -> vector<48x16xf32>
    %152 = arith.addf %151, %26 : vector<48x16xf32>
    %cst_49 = arith.constant 5.000000e-01 : f32
    %153 = arith.mulf %cst_49, %138 : f32
    %154 = vector.broadcast %153 : f32 to vector<48x16xf32>
    %155 = arith.mulf %154, %152 : vector<48x16xf32>
    %156 = arith.addf %129, %155 : vector<48x16xf32>
    %cst_50 = arith.constant dense<0.000000e+00> : vector<48x32xf32>
    %157 = tpu.matmul %156, %19, %cst_50 {dimension_numbers = #tpu.dot_dimension_numbers<[1], [0], [0], [1], [0, 0, 1, 1], [], []>} : vector<48x16xf32>, vector<16x32xf32>, vector<48x32xf32> -> vector<48x32xf32>
    %158 = arith.addf %157, %23 : vector<48x32xf32>
    %159 = math.tanh %158 : vector<48x32xf32>
    %cst_51 = arith.constant dense<0.000000e+00> : vector<48x16xf32>
    %160 = tpu.matmul %159, %20, %cst_51 {dimension_numbers = #tpu.dot_dimension_numbers<[1], [0], [0], [1], [0, 0, 1, 1], [], []>} : vector<48x32xf32>, vector<32x16xf32>, vector<48x16xf32> -> vector<48x16xf32>
    %161 = arith.addf %160, %26 : vector<48x16xf32>
    %162 = vector.broadcast %138 : f32 to vector<48x16xf32>
    %163 = arith.mulf %162, %161 : vector<48x16xf32>
    %164 = arith.addf %129, %163 : vector<48x16xf32>
    %cst_52 = arith.constant dense<0.000000e+00> : vector<48x32xf32>
    %165 = tpu.matmul %164, %19, %cst_52 {dimension_numbers = #tpu.dot_dimension_numbers<[1], [0], [0], [1], [0, 0, 1, 1], [], []>} : vector<48x16xf32>, vector<16x32xf32>, vector<48x32xf32> -> vector<48x32xf32>
    %166 = arith.addf %165, %23 : vector<48x32xf32>
    %167 = math.tanh %166 : vector<48x32xf32>
    %cst_53 = arith.constant dense<0.000000e+00> : vector<48x16xf32>
    %168 = tpu.matmul %167, %20, %cst_53 {dimension_numbers = #tpu.dot_dimension_numbers<[1], [0], [0], [1], [0, 0, 1, 1], [], []>} : vector<48x32xf32>, vector<32x16xf32>, vector<48x16xf32> -> vector<48x16xf32>
    %169 = arith.addf %168, %26 : vector<48x16xf32>
    %cst_54 = arith.constant 6.000000e+00 : f32
    %170 = arith.divf %138, %cst_54 : f32
    %cst_55 = arith.constant 2.000000e+00 : f32
    %171 = vector.broadcast %cst_55 : f32 to vector<48x16xf32>
    %172 = arith.mulf %171, %152 : vector<48x16xf32>
    %173 = arith.addf %143, %172 : vector<48x16xf32>
    %cst_56 = arith.constant 2.000000e+00 : f32
    %174 = vector.broadcast %cst_56 : f32 to vector<48x16xf32>
    %175 = arith.mulf %174, %161 : vector<48x16xf32>
    %176 = arith.addf %173, %175 : vector<48x16xf32>
    %177 = arith.addf %176, %169 : vector<48x16xf32>
    %178 = vector.broadcast %170 : f32 to vector<48x16xf32>
    %179 = arith.mulf %178, %177 : vector<48x16xf32>
    %180 = arith.addf %129, %179 : vector<48x16xf32>
    %181 = vector.extract_strided_slice %180 {offsets = [0, 0], sizes = [32, 16], strides = [1, 1]} : vector<48x16xf32> to vector<32x16xf32>
    %c48_i32 = arith.constant 48 : i32
    %182 = vector.broadcast %c48_i32 : i32 to vector<16x128xi32>
    %183 = arith.addi %28, %182 : vector<16x128xi32>
    %184 = arith.cmpi eq, %27, %183 : vector<16x128xi32>
    %185 = arith.extui %184 : vector<16x128xi1> to vector<16x128xi32>
    %186 = arith.sitofp %185 : vector<16x128xi32> to vector<16x128xf32>
    %cst_57 = arith.constant dense<0.000000e+00> : vector<32x128xf32>
    %187 = tpu.matmul %181, %186, %cst_57 {dimension_numbers = #tpu.dot_dimension_numbers<[1], [0], [0], [1], [0, 0, 1, 1], [], []>} : vector<32x16xf32>, vector<16x128xf32>, vector<32x128xf32> -> vector<32x128xf32>
    %188 = arith.addf %137, %187 : vector<32x128xf32>
    %c3 = arith.constant 3 : index
    %189 = memref.load %arg1[%c3] : memref<7xf32, #tpu.memory_space<smem>>
    %cst_58 = arith.constant dense<0.000000e+00> : vector<48x32xf32>
    %190 = tpu.matmul %180, %19, %cst_58 {dimension_numbers = #tpu.dot_dimension_numbers<[1], [0], [0], [1], [0, 0, 1, 1], [], []>} : vector<48x16xf32>, vector<16x32xf32>, vector<48x32xf32> -> vector<48x32xf32>
    %191 = arith.addf %190, %23 : vector<48x32xf32>
    %192 = math.tanh %191 : vector<48x32xf32>
    %cst_59 = arith.constant dense<0.000000e+00> : vector<48x16xf32>
    %193 = tpu.matmul %192, %20, %cst_59 {dimension_numbers = #tpu.dot_dimension_numbers<[1], [0], [0], [1], [0, 0, 1, 1], [], []>} : vector<48x32xf32>, vector<32x16xf32>, vector<48x16xf32> -> vector<48x16xf32>
    %194 = arith.addf %193, %26 : vector<48x16xf32>
    %cst_60 = arith.constant 5.000000e-01 : f32
    %195 = arith.mulf %cst_60, %189 : f32
    %196 = vector.broadcast %195 : f32 to vector<48x16xf32>
    %197 = arith.mulf %196, %194 : vector<48x16xf32>
    %198 = arith.addf %180, %197 : vector<48x16xf32>
    %cst_61 = arith.constant dense<0.000000e+00> : vector<48x32xf32>
    %199 = tpu.matmul %198, %19, %cst_61 {dimension_numbers = #tpu.dot_dimension_numbers<[1], [0], [0], [1], [0, 0, 1, 1], [], []>} : vector<48x16xf32>, vector<16x32xf32>, vector<48x32xf32> -> vector<48x32xf32>
    %200 = arith.addf %199, %23 : vector<48x32xf32>
    %201 = math.tanh %200 : vector<48x32xf32>
    %cst_62 = arith.constant dense<0.000000e+00> : vector<48x16xf32>
    %202 = tpu.matmul %201, %20, %cst_62 {dimension_numbers = #tpu.dot_dimension_numbers<[1], [0], [0], [1], [0, 0, 1, 1], [], []>} : vector<48x32xf32>, vector<32x16xf32>, vector<48x16xf32> -> vector<48x16xf32>
    %203 = arith.addf %202, %26 : vector<48x16xf32>
    %cst_63 = arith.constant 5.000000e-01 : f32
    %204 = arith.mulf %cst_63, %189 : f32
    %205 = vector.broadcast %204 : f32 to vector<48x16xf32>
    %206 = arith.mulf %205, %203 : vector<48x16xf32>
    %207 = arith.addf %180, %206 : vector<48x16xf32>
    %cst_64 = arith.constant dense<0.000000e+00> : vector<48x32xf32>
    %208 = tpu.matmul %207, %19, %cst_64 {dimension_numbers = #tpu.dot_dimension_numbers<[1], [0], [0], [1], [0, 0, 1, 1], [], []>} : vector<48x16xf32>, vector<16x32xf32>, vector<48x32xf32> -> vector<48x32xf32>
    %209 = arith.addf %208, %23 : vector<48x32xf32>
    %210 = math.tanh %209 : vector<48x32xf32>
    %cst_65 = arith.constant dense<0.000000e+00> : vector<48x16xf32>
    %211 = tpu.matmul %210, %20, %cst_65 {dimension_numbers = #tpu.dot_dimension_numbers<[1], [0], [0], [1], [0, 0, 1, 1], [], []>} : vector<48x32xf32>, vector<32x16xf32>, vector<48x16xf32> -> vector<48x16xf32>
    %212 = arith.addf %211, %26 : vector<48x16xf32>
    %213 = vector.broadcast %189 : f32 to vector<48x16xf32>
    %214 = arith.mulf %213, %212 : vector<48x16xf32>
    %215 = arith.addf %180, %214 : vector<48x16xf32>
    %cst_66 = arith.constant dense<0.000000e+00> : vector<48x32xf32>
    %216 = tpu.matmul %215, %19, %cst_66 {dimension_numbers = #tpu.dot_dimension_numbers<[1], [0], [0], [1], [0, 0, 1, 1], [], []>} : vector<48x16xf32>, vector<16x32xf32>, vector<48x32xf32> -> vector<48x32xf32>
    %217 = arith.addf %216, %23 : vector<48x32xf32>
    %218 = math.tanh %217 : vector<48x32xf32>
    %cst_67 = arith.constant dense<0.000000e+00> : vector<48x16xf32>
    %219 = tpu.matmul %218, %20, %cst_67 {dimension_numbers = #tpu.dot_dimension_numbers<[1], [0], [0], [1], [0, 0, 1, 1], [], []>} : vector<48x32xf32>, vector<32x16xf32>, vector<48x16xf32> -> vector<48x16xf32>
    %220 = arith.addf %219, %26 : vector<48x16xf32>
    %cst_68 = arith.constant 6.000000e+00 : f32
    %221 = arith.divf %189, %cst_68 : f32
    %cst_69 = arith.constant 2.000000e+00 : f32
    %222 = vector.broadcast %cst_69 : f32 to vector<48x16xf32>
    %223 = arith.mulf %222, %203 : vector<48x16xf32>
    %224 = arith.addf %194, %223 : vector<48x16xf32>
    %cst_70 = arith.constant 2.000000e+00 : f32
    %225 = vector.broadcast %cst_70 : f32 to vector<48x16xf32>
    %226 = arith.mulf %225, %212 : vector<48x16xf32>
    %227 = arith.addf %224, %226 : vector<48x16xf32>
    %228 = arith.addf %227, %220 : vector<48x16xf32>
    %229 = vector.broadcast %221 : f32 to vector<48x16xf32>
    %230 = arith.mulf %229, %228 : vector<48x16xf32>
    %231 = arith.addf %180, %230 : vector<48x16xf32>
    %232 = vector.extract_strided_slice %231 {offsets = [0, 0], sizes = [32, 16], strides = [1, 1]} : vector<48x16xf32> to vector<32x16xf32>
    %c64_i32 = arith.constant 64 : i32
    %233 = vector.broadcast %c64_i32 : i32 to vector<16x128xi32>
    %234 = arith.addi %28, %233 : vector<16x128xi32>
    %235 = arith.cmpi eq, %27, %234 : vector<16x128xi32>
    %236 = arith.extui %235 : vector<16x128xi1> to vector<16x128xi32>
    %237 = arith.sitofp %236 : vector<16x128xi32> to vector<16x128xf32>
    %cst_71 = arith.constant dense<0.000000e+00> : vector<32x128xf32>
    %238 = tpu.matmul %232, %237, %cst_71 {dimension_numbers = #tpu.dot_dimension_numbers<[1], [0], [0], [1], [0, 0, 1, 1], [], []>} : vector<32x16xf32>, vector<16x128xf32>, vector<32x128xf32> -> vector<32x128xf32>
    %239 = arith.addf %188, %238 : vector<32x128xf32>
    %c4 = arith.constant 4 : index
    %240 = memref.load %arg1[%c4] : memref<7xf32, #tpu.memory_space<smem>>
    %cst_72 = arith.constant dense<0.000000e+00> : vector<48x32xf32>
    %241 = tpu.matmul %231, %19, %cst_72 {dimension_numbers = #tpu.dot_dimension_numbers<[1], [0], [0], [1], [0, 0, 1, 1], [], []>} : vector<48x16xf32>, vector<16x32xf32>, vector<48x32xf32> -> vector<48x32xf32>
    %242 = arith.addf %241, %23 : vector<48x32xf32>
    %243 = math.tanh %242 : vector<48x32xf32>
    %cst_73 = arith.constant dense<0.000000e+00> : vector<48x16xf32>
    %244 = tpu.matmul %243, %20, %cst_73 {dimension_numbers = #tpu.dot_dimension_numbers<[1], [0], [0], [1], [0, 0, 1, 1], [], []>} : vector<48x32xf32>, vector<32x16xf32>, vector<48x16xf32> -> vector<48x16xf32>
    %245 = arith.addf %244, %26 : vector<48x16xf32>
    %cst_74 = arith.constant 5.000000e-01 : f32
    %246 = arith.mulf %cst_74, %240 : f32
    %247 = vector.broadcast %246 : f32 to vector<48x16xf32>
    %248 = arith.mulf %247, %245 : vector<48x16xf32>
    %249 = arith.addf %231, %248 : vector<48x16xf32>
    %cst_75 = arith.constant dense<0.000000e+00> : vector<48x32xf32>
    %250 = tpu.matmul %249, %19, %cst_75 {dimension_numbers = #tpu.dot_dimension_numbers<[1], [0], [0], [1], [0, 0, 1, 1], [], []>} : vector<48x16xf32>, vector<16x32xf32>, vector<48x32xf32> -> vector<48x32xf32>
    %251 = arith.addf %250, %23 : vector<48x32xf32>
    %252 = math.tanh %251 : vector<48x32xf32>
    %cst_76 = arith.constant dense<0.000000e+00> : vector<48x16xf32>
    %253 = tpu.matmul %252, %20, %cst_76 {dimension_numbers = #tpu.dot_dimension_numbers<[1], [0], [0], [1], [0, 0, 1, 1], [], []>} : vector<48x32xf32>, vector<32x16xf32>, vector<48x16xf32> -> vector<48x16xf32>
    %254 = arith.addf %253, %26 : vector<48x16xf32>
    %cst_77 = arith.constant 5.000000e-01 : f32
    %255 = arith.mulf %cst_77, %240 : f32
    %256 = vector.broadcast %255 : f32 to vector<48x16xf32>
    %257 = arith.mulf %256, %254 : vector<48x16xf32>
    %258 = arith.addf %231, %257 : vector<48x16xf32>
    %cst_78 = arith.constant dense<0.000000e+00> : vector<48x32xf32>
    %259 = tpu.matmul %258, %19, %cst_78 {dimension_numbers = #tpu.dot_dimension_numbers<[1], [0], [0], [1], [0, 0, 1, 1], [], []>} : vector<48x16xf32>, vector<16x32xf32>, vector<48x32xf32> -> vector<48x32xf32>
    %260 = arith.addf %259, %23 : vector<48x32xf32>
    %261 = math.tanh %260 : vector<48x32xf32>
    %cst_79 = arith.constant dense<0.000000e+00> : vector<48x16xf32>
    %262 = tpu.matmul %261, %20, %cst_79 {dimension_numbers = #tpu.dot_dimension_numbers<[1], [0], [0], [1], [0, 0, 1, 1], [], []>} : vector<48x32xf32>, vector<32x16xf32>, vector<48x16xf32> -> vector<48x16xf32>
    %263 = arith.addf %262, %26 : vector<48x16xf32>
    %264 = vector.broadcast %240 : f32 to vector<48x16xf32>
    %265 = arith.mulf %264, %263 : vector<48x16xf32>
    %266 = arith.addf %231, %265 : vector<48x16xf32>
    %cst_80 = arith.constant dense<0.000000e+00> : vector<48x32xf32>
    %267 = tpu.matmul %266, %19, %cst_80 {dimension_numbers = #tpu.dot_dimension_numbers<[1], [0], [0], [1], [0, 0, 1, 1], [], []>} : vector<48x16xf32>, vector<16x32xf32>, vector<48x32xf32> -> vector<48x32xf32>
    %268 = arith.addf %267, %23 : vector<48x32xf32>
    %269 = math.tanh %268 : vector<48x32xf32>
    %cst_81 = arith.constant dense<0.000000e+00> : vector<48x16xf32>
    %270 = tpu.matmul %269, %20, %cst_81 {dimension_numbers = #tpu.dot_dimension_numbers<[1], [0], [0], [1], [0, 0, 1, 1], [], []>} : vector<48x32xf32>, vector<32x16xf32>, vector<48x16xf32> -> vector<48x16xf32>
    %271 = arith.addf %270, %26 : vector<48x16xf32>
    %cst_82 = arith.constant 6.000000e+00 : f32
    %272 = arith.divf %240, %cst_82 : f32
    %cst_83 = arith.constant 2.000000e+00 : f32
    %273 = vector.broadcast %cst_83 : f32 to vector<48x16xf32>
    %274 = arith.mulf %273, %254 : vector<48x16xf32>
    %275 = arith.addf %245, %274 : vector<48x16xf32>
    %cst_84 = arith.constant 2.000000e+00 : f32
    %276 = vector.broadcast %cst_84 : f32 to vector<48x16xf32>
    %277 = arith.mulf %276, %263 : vector<48x16xf32>
    %278 = arith.addf %275, %277 : vector<48x16xf32>
    %279 = arith.addf %278, %271 : vector<48x16xf32>
    %280 = vector.broadcast %272 : f32 to vector<48x16xf32>
    %281 = arith.mulf %280, %279 : vector<48x16xf32>
    %282 = arith.addf %231, %281 : vector<48x16xf32>
    %283 = vector.extract_strided_slice %282 {offsets = [0, 0], sizes = [32, 16], strides = [1, 1]} : vector<48x16xf32> to vector<32x16xf32>
    %c80_i32 = arith.constant 80 : i32
    %284 = vector.broadcast %c80_i32 : i32 to vector<16x128xi32>
    %285 = arith.addi %28, %284 : vector<16x128xi32>
    %286 = arith.cmpi eq, %27, %285 : vector<16x128xi32>
    %287 = arith.extui %286 : vector<16x128xi1> to vector<16x128xi32>
    %288 = arith.sitofp %287 : vector<16x128xi32> to vector<16x128xf32>
    %cst_85 = arith.constant dense<0.000000e+00> : vector<32x128xf32>
    %289 = tpu.matmul %283, %288, %cst_85 {dimension_numbers = #tpu.dot_dimension_numbers<[1], [0], [0], [1], [0, 0, 1, 1], [], []>} : vector<32x16xf32>, vector<16x128xf32>, vector<32x128xf32> -> vector<32x128xf32>
    %290 = arith.addf %239, %289 : vector<32x128xf32>
    %c5 = arith.constant 5 : index
    %291 = memref.load %arg1[%c5] : memref<7xf32, #tpu.memory_space<smem>>
    %cst_86 = arith.constant dense<0.000000e+00> : vector<48x32xf32>
    %292 = tpu.matmul %282, %19, %cst_86 {dimension_numbers = #tpu.dot_dimension_numbers<[1], [0], [0], [1], [0, 0, 1, 1], [], []>} : vector<48x16xf32>, vector<16x32xf32>, vector<48x32xf32> -> vector<48x32xf32>
    %293 = arith.addf %292, %23 : vector<48x32xf32>
    %294 = math.tanh %293 : vector<48x32xf32>
    %cst_87 = arith.constant dense<0.000000e+00> : vector<48x16xf32>
    %295 = tpu.matmul %294, %20, %cst_87 {dimension_numbers = #tpu.dot_dimension_numbers<[1], [0], [0], [1], [0, 0, 1, 1], [], []>} : vector<48x32xf32>, vector<32x16xf32>, vector<48x16xf32> -> vector<48x16xf32>
    %296 = arith.addf %295, %26 : vector<48x16xf32>
    %cst_88 = arith.constant 5.000000e-01 : f32
    %297 = arith.mulf %cst_88, %291 : f32
    %298 = vector.broadcast %297 : f32 to vector<48x16xf32>
    %299 = arith.mulf %298, %296 : vector<48x16xf32>
    %300 = arith.addf %282, %299 : vector<48x16xf32>
    %cst_89 = arith.constant dense<0.000000e+00> : vector<48x32xf32>
    %301 = tpu.matmul %300, %19, %cst_89 {dimension_numbers = #tpu.dot_dimension_numbers<[1], [0], [0], [1], [0, 0, 1, 1], [], []>} : vector<48x16xf32>, vector<16x32xf32>, vector<48x32xf32> -> vector<48x32xf32>
    %302 = arith.addf %301, %23 : vector<48x32xf32>
    %303 = math.tanh %302 : vector<48x32xf32>
    %cst_90 = arith.constant dense<0.000000e+00> : vector<48x16xf32>
    %304 = tpu.matmul %303, %20, %cst_90 {dimension_numbers = #tpu.dot_dimension_numbers<[1], [0], [0], [1], [0, 0, 1, 1], [], []>} : vector<48x32xf32>, vector<32x16xf32>, vector<48x16xf32> -> vector<48x16xf32>
    %305 = arith.addf %304, %26 : vector<48x16xf32>
    %cst_91 = arith.constant 5.000000e-01 : f32
    %306 = arith.mulf %cst_91, %291 : f32
    %307 = vector.broadcast %306 : f32 to vector<48x16xf32>
    %308 = arith.mulf %307, %305 : vector<48x16xf32>
    %309 = arith.addf %282, %308 : vector<48x16xf32>
    %cst_92 = arith.constant dense<0.000000e+00> : vector<48x32xf32>
    %310 = tpu.matmul %309, %19, %cst_92 {dimension_numbers = #tpu.dot_dimension_numbers<[1], [0], [0], [1], [0, 0, 1, 1], [], []>} : vector<48x16xf32>, vector<16x32xf32>, vector<48x32xf32> -> vector<48x32xf32>
    %311 = arith.addf %310, %23 : vector<48x32xf32>
    %312 = math.tanh %311 : vector<48x32xf32>
    %cst_93 = arith.constant dense<0.000000e+00> : vector<48x16xf32>
    %313 = tpu.matmul %312, %20, %cst_93 {dimension_numbers = #tpu.dot_dimension_numbers<[1], [0], [0], [1], [0, 0, 1, 1], [], []>} : vector<48x32xf32>, vector<32x16xf32>, vector<48x16xf32> -> vector<48x16xf32>
    %314 = arith.addf %313, %26 : vector<48x16xf32>
    %315 = vector.broadcast %291 : f32 to vector<48x16xf32>
    %316 = arith.mulf %315, %314 : vector<48x16xf32>
    %317 = arith.addf %282, %316 : vector<48x16xf32>
    %cst_94 = arith.constant dense<0.000000e+00> : vector<48x32xf32>
    %318 = tpu.matmul %317, %19, %cst_94 {dimension_numbers = #tpu.dot_dimension_numbers<[1], [0], [0], [1], [0, 0, 1, 1], [], []>} : vector<48x16xf32>, vector<16x32xf32>, vector<48x32xf32> -> vector<48x32xf32>
    %319 = arith.addf %318, %23 : vector<48x32xf32>
    %320 = math.tanh %319 : vector<48x32xf32>
    %cst_95 = arith.constant dense<0.000000e+00> : vector<48x16xf32>
    %321 = tpu.matmul %320, %20, %cst_95 {dimension_numbers = #tpu.dot_dimension_numbers<[1], [0], [0], [1], [0, 0, 1, 1], [], []>} : vector<48x32xf32>, vector<32x16xf32>, vector<48x16xf32> -> vector<48x16xf32>
    %322 = arith.addf %321, %26 : vector<48x16xf32>
    %cst_96 = arith.constant 6.000000e+00 : f32
    %323 = arith.divf %291, %cst_96 : f32
    %cst_97 = arith.constant 2.000000e+00 : f32
    %324 = vector.broadcast %cst_97 : f32 to vector<48x16xf32>
    %325 = arith.mulf %324, %305 : vector<48x16xf32>
    %326 = arith.addf %296, %325 : vector<48x16xf32>
    %cst_98 = arith.constant 2.000000e+00 : f32
    %327 = vector.broadcast %cst_98 : f32 to vector<48x16xf32>
    %328 = arith.mulf %327, %314 : vector<48x16xf32>
    %329 = arith.addf %326, %328 : vector<48x16xf32>
    %330 = arith.addf %329, %322 : vector<48x16xf32>
    %331 = vector.broadcast %323 : f32 to vector<48x16xf32>
    %332 = arith.mulf %331, %330 : vector<48x16xf32>
    %333 = arith.addf %282, %332 : vector<48x16xf32>
    %334 = vector.extract_strided_slice %333 {offsets = [0, 0], sizes = [32, 16], strides = [1, 1]} : vector<48x16xf32> to vector<32x16xf32>
    %c96_i32 = arith.constant 96 : i32
    %335 = vector.broadcast %c96_i32 : i32 to vector<16x128xi32>
    %336 = arith.addi %28, %335 : vector<16x128xi32>
    %337 = arith.cmpi eq, %27, %336 : vector<16x128xi32>
    %338 = arith.extui %337 : vector<16x128xi1> to vector<16x128xi32>
    %339 = arith.sitofp %338 : vector<16x128xi32> to vector<16x128xf32>
    %cst_99 = arith.constant dense<0.000000e+00> : vector<32x128xf32>
    %340 = tpu.matmul %334, %339, %cst_99 {dimension_numbers = #tpu.dot_dimension_numbers<[1], [0], [0], [1], [0, 0, 1, 1], [], []>} : vector<32x16xf32>, vector<16x128xf32>, vector<32x128xf32> -> vector<32x128xf32>
    %341 = arith.addf %290, %340 : vector<32x128xf32>
    %c6 = arith.constant 6 : index
    %342 = memref.load %arg1[%c6] : memref<7xf32, #tpu.memory_space<smem>>
    %cst_100 = arith.constant dense<0.000000e+00> : vector<48x32xf32>
    %343 = tpu.matmul %333, %19, %cst_100 {dimension_numbers = #tpu.dot_dimension_numbers<[1], [0], [0], [1], [0, 0, 1, 1], [], []>} : vector<48x16xf32>, vector<16x32xf32>, vector<48x32xf32> -> vector<48x32xf32>
    %344 = arith.addf %343, %23 : vector<48x32xf32>
    %345 = math.tanh %344 : vector<48x32xf32>
    %cst_101 = arith.constant dense<0.000000e+00> : vector<48x16xf32>
    %346 = tpu.matmul %345, %20, %cst_101 {dimension_numbers = #tpu.dot_dimension_numbers<[1], [0], [0], [1], [0, 0, 1, 1], [], []>} : vector<48x32xf32>, vector<32x16xf32>, vector<48x16xf32> -> vector<48x16xf32>
    %347 = arith.addf %346, %26 : vector<48x16xf32>
    %cst_102 = arith.constant 5.000000e-01 : f32
    %348 = arith.mulf %cst_102, %342 : f32
    %349 = vector.broadcast %348 : f32 to vector<48x16xf32>
    %350 = arith.mulf %349, %347 : vector<48x16xf32>
    %351 = arith.addf %333, %350 : vector<48x16xf32>
    %cst_103 = arith.constant dense<0.000000e+00> : vector<48x32xf32>
    %352 = tpu.matmul %351, %19, %cst_103 {dimension_numbers = #tpu.dot_dimension_numbers<[1], [0], [0], [1], [0, 0, 1, 1], [], []>} : vector<48x16xf32>, vector<16x32xf32>, vector<48x32xf32> -> vector<48x32xf32>
    %353 = arith.addf %352, %23 : vector<48x32xf32>
    %354 = math.tanh %353 : vector<48x32xf32>
    %cst_104 = arith.constant dense<0.000000e+00> : vector<48x16xf32>
    %355 = tpu.matmul %354, %20, %cst_104 {dimension_numbers = #tpu.dot_dimension_numbers<[1], [0], [0], [1], [0, 0, 1, 1], [], []>} : vector<48x32xf32>, vector<32x16xf32>, vector<48x16xf32> -> vector<48x16xf32>
    %356 = arith.addf %355, %26 : vector<48x16xf32>
    %cst_105 = arith.constant 5.000000e-01 : f32
    %357 = arith.mulf %cst_105, %342 : f32
    %358 = vector.broadcast %357 : f32 to vector<48x16xf32>
    %359 = arith.mulf %358, %356 : vector<48x16xf32>
    %360 = arith.addf %333, %359 : vector<48x16xf32>
    %cst_106 = arith.constant dense<0.000000e+00> : vector<48x32xf32>
    %361 = tpu.matmul %360, %19, %cst_106 {dimension_numbers = #tpu.dot_dimension_numbers<[1], [0], [0], [1], [0, 0, 1, 1], [], []>} : vector<48x16xf32>, vector<16x32xf32>, vector<48x32xf32> -> vector<48x32xf32>
    %362 = arith.addf %361, %23 : vector<48x32xf32>
    %363 = math.tanh %362 : vector<48x32xf32>
    %cst_107 = arith.constant dense<0.000000e+00> : vector<48x16xf32>
    %364 = tpu.matmul %363, %20, %cst_107 {dimension_numbers = #tpu.dot_dimension_numbers<[1], [0], [0], [1], [0, 0, 1, 1], [], []>} : vector<48x32xf32>, vector<32x16xf32>, vector<48x16xf32> -> vector<48x16xf32>
    %365 = arith.addf %364, %26 : vector<48x16xf32>
    %366 = vector.broadcast %342 : f32 to vector<48x16xf32>
    %367 = arith.mulf %366, %365 : vector<48x16xf32>
    %368 = arith.addf %333, %367 : vector<48x16xf32>
    %cst_108 = arith.constant dense<0.000000e+00> : vector<48x32xf32>
    %369 = tpu.matmul %368, %19, %cst_108 {dimension_numbers = #tpu.dot_dimension_numbers<[1], [0], [0], [1], [0, 0, 1, 1], [], []>} : vector<48x16xf32>, vector<16x32xf32>, vector<48x32xf32> -> vector<48x32xf32>
    %370 = arith.addf %369, %23 : vector<48x32xf32>
    %371 = math.tanh %370 : vector<48x32xf32>
    %cst_109 = arith.constant dense<0.000000e+00> : vector<48x16xf32>
    %372 = tpu.matmul %371, %20, %cst_109 {dimension_numbers = #tpu.dot_dimension_numbers<[1], [0], [0], [1], [0, 0, 1, 1], [], []>} : vector<48x32xf32>, vector<32x16xf32>, vector<48x16xf32> -> vector<48x16xf32>
    %373 = arith.addf %372, %26 : vector<48x16xf32>
    %cst_110 = arith.constant 6.000000e+00 : f32
    %374 = arith.divf %342, %cst_110 : f32
    %cst_111 = arith.constant 2.000000e+00 : f32
    %375 = vector.broadcast %cst_111 : f32 to vector<48x16xf32>
    %376 = arith.mulf %375, %356 : vector<48x16xf32>
    %377 = arith.addf %347, %376 : vector<48x16xf32>
    %cst_112 = arith.constant 2.000000e+00 : f32
    %378 = vector.broadcast %cst_112 : f32 to vector<48x16xf32>
    %379 = arith.mulf %378, %365 : vector<48x16xf32>
    %380 = arith.addf %377, %379 : vector<48x16xf32>
    %381 = arith.addf %380, %373 : vector<48x16xf32>
    %382 = vector.broadcast %374 : f32 to vector<48x16xf32>
    %383 = arith.mulf %382, %381 : vector<48x16xf32>
    %384 = arith.addf %333, %383 : vector<48x16xf32>
    %385 = vector.extract_strided_slice %384 {offsets = [0, 0], sizes = [32, 16], strides = [1, 1]} : vector<48x16xf32> to vector<32x16xf32>
    %c112_i32 = arith.constant 112 : i32
    %386 = vector.broadcast %c112_i32 : i32 to vector<16x128xi32>
    %387 = arith.addi %28, %386 : vector<16x128xi32>
    %388 = arith.cmpi eq, %27, %387 : vector<16x128xi32>
    %389 = arith.extui %388 : vector<16x128xi1> to vector<16x128xi32>
    %390 = arith.sitofp %389 : vector<16x128xi32> to vector<16x128xf32>
    %cst_113 = arith.constant dense<0.000000e+00> : vector<32x128xf32>
    %391 = tpu.matmul %385, %390, %cst_113 {dimension_numbers = #tpu.dot_dimension_numbers<[1], [0], [0], [1], [0, 0, 1, 1], [], []>} : vector<32x16xf32>, vector<16x128xf32>, vector<32x128xf32> -> vector<32x128xf32>
    %392 = arith.addf %341, %391 : vector<32x128xf32>
    %c0_114 = arith.constant 0 : index
    %c0_115 = arith.constant 0 : index
    %c0_116 = arith.constant 0 : index
    %393 = vector.load %arg7[%c0_114, %c0_115, %c0_116] : memref<1x32x128xf32, #tpu.memory_space<vmem>>, vector<1x32x128xf32>
    %394 = vector.shape_cast %393 : vector<1x32x128xf32> to vector<32x128xf32>
    %395 = vector.shape_cast %392 : vector<32x128xf32> to vector<1x32x128xf32>
    tpu.vector_store %arg7[%c0_114, %c0_115, %c0_116], %395 {strides = array<i32>} : memref<1x32x128xf32, #tpu.memory_space<vmem>>, vector<1x32x128xf32>,
    return
  }
  func.func @transform_0(%arg0: i32) -> i32 {
    %c0_i32 = arith.constant 0 : i32
    %c0_i32_0 = arith.constant 0 : i32
    return %c0_i32 : i32
  }
  func.func @transform_1(%arg0: i32) -> (i32, i32, i32) {
    %c0_i32 = arith.constant 0 : i32
    %c0_i32_0 = arith.constant 0 : i32
    %c0_i32_1 = arith.constant 0 : i32
    return %arg0, %c0_i32, %c0_i32_0 : i32, i32, i32
  }
  func.func @transform_2(%arg0: i32) -> (i32, i32) {
    %c0_i32 = arith.constant 0 : i32
    %c0_i32_0 = arith.constant 0 : i32
    %c0_i32_1 = arith.constant 0 : i32
    return %c0_i32, %c0_i32_0 : i32, i32
  }
  func.func @transform_3(%arg0: i32) -> (i32, i32) {
    %c0_i32 = arith.constant 0 : i32
    %c0_i32_0 = arith.constant 0 : i32
    %c0_i32_1 = arith.constant 0 : i32
    return %c0_i32, %c0_i32_0 : i32, i32
  }
  func.func @transform_4(%arg0: i32) -> (i32, i32) {
    %c0_i32 = arith.constant 0 : i32
    %c0_i32_0 = arith.constant 0 : i32
    %c0_i32_1 = arith.constant 0 : i32
    return %c0_i32, %c0_i32_0 : i32, i32
  }
  func.func @transform_5(%arg0: i32) -> (i32, i32) {
    %c0_i32 = arith.constant 0 : i32
    %c0_i32_0 = arith.constant 0 : i32
    %c0_i32_1 = arith.constant 0 : i32
    return %c0_i32, %c0_i32_0 : i32, i32
  }
  func.func @transform_6(%arg0: i32) -> (i32, i32, i32) {
    %c0_i32 = arith.constant 0 : i32
    %c0_i32_0 = arith.constant 0 : i32
    %c0_i32_1 = arith.constant 0 : i32
    return %arg0, %c0_i32, %c0_i32_0 : i32, i32, i32
  }
}

</mosaic_0001>

<bundles_post_ra>
// kernel: diffeq_solver_attention_forward.1
= control target key start
LH: loop header
LB: loop body
LE: loop exit
PB: predicated region body
PF: predicated region fallthrough
CT: control target
= control target key end

     0   :  { %11 = vsyncpa [#allocation3], 0  ;;  %s11132_s21 = smov 0   ;;  %s13062_s0 = inlined_call_operand.vmem [shape: f32[7], index: 0, kind: input, shape index: {}]   ;;  %s13063_s1 = inlined_call_operand.vmem [shape: f32[2,32,16], index: 1, kind: input, shape index: {}]   ;;  %s13064_s2 = inlined_call_operand.vmem [shape: f32[16,32], index: 2, kind: input, shape index: {}]   ;;  %s13065_s3 = inlined_call_operand.vmem [shape: f32[1,32], index: 3, kind: input, shape index: {}]   ;;  %s13066_s4 = inlined_call_operand.vmem [shape: f32[32,16], index: 4, kind: input, shape index: {}]   ;;  %s13067_s5 = inlined_call_operand.vmem [shape: f32[1,16], index: 5, kind: input, shape index: {}]   ;;  %s13068_s6 = inlined_call_operand.vmem [shape: f32[2,32,128], index: 6, kind: output, shape index: {}]  }
   0x1 LB: > { %s8383_s22 = sadd.s32 4294967295, %s11093_s21   ;;  %p8385_p0 = scmp.ge.s32.totalorder %s11093_s21, 1  ;;  %s11093_s21 = sphi %s11132_s21, %s17_s21  }
   0x2   : > { %p179_p1 = scmp.lt.s32.totalorder %s11093_s21, 3  ;;  %s192_s25 = sshll.u32 %s13062_s0, 4  ;;  %s193_s25 = int_to_ptr.vmem [resolvable:$true] %s192_s25 }
   0x3   : > { %p10709_p3 = scmp.eq.s32.totalorder %s8383_s22, 0  ;;  %s11068_s27 = scalar_lea.vmem %s193_s25, 16 }
   0x4   : > { %p11143_p2 = pnand %p8385_p0, %p179_p1  ;;  %p11069_p6 = scmp.ne.s32.totalorder %s193_s25, %s11068_s27 }
   0x5   : > { %p11076_p10 = scmp.lt.s32.totalorder %s193_s25, %s193_s25  ;;  %p11077_p11 = scmp.lt.s32.totalorder %s11068_s27, %s11068_s27 }
   0x6   : > { %p10705_p4 = pneg %p11143_p2 }
   0x7   : > { %p11078_p12 = por %p11077_p11, %p11076_p10 }
   0x8   : > { %p10706_p5 = pnand %p10709_p3, %p10705_p4 }
   0xa   : > { %p11070_p7 = pneg %p10706_p5 }
   0xc   : > { %p11071_p8 = pnand %p11070_p7, %p11069_p6 }
   0xe   : > { %p11072_p9 = pneg %p11071_p8 }
  0x10   : > { %p11079_p13 = pnand %p11078_p12, %p11072_p9 }
  0x12   : > { %11082 = shalt.err (!%p11079_p13)
}
  0x13   : > { %s11095_s28 = smov [#allocation2]   ;;  %225 = sbr.rel (%p11143_p2) target bundleno = 12987 (0x32bb), region = 44 }
  0x14   : > { %10708 = dma.vmem_to_smem (!%p10706_p5), %s193_s25, 16, %s11095_s28, [#allocation3]  }
  0x1a   : > { %11088 = dma.done.wait (%p10709_p3), [#allocation3], 16  }
  0x1b   : > { %11090 = vsyncadd (%p10709_p3), [#allocation3], 4294967280 }
  0x1c   : > { %231 = sfence }
  0x1d   : > { %v427_v0 = vld [vmem:[%s13064_s2] sm:$0xff]  ;;  %v428_v1 = vld [vmem:[%s13064_s2 + $0x8] sm:$0xff]  ;;  %p256_p0 = scmp.lt.s32.totalorder %s8383_s22, 1  ;;  %vm270_vm0 = vcmask 130048   ;;  %vm345_vm1 = vcmask 261120   ;;  %v431_v54 = vld [vmem:[%s13066_s4 + $0x10] sm:$0xff] }
  0x1e   : > { %v11160_v2 = vpack.c.bf16 %v428_v1, %v427_v0  ;;  %v429_v50 = vld [vmem:[%s13066_s4] sm:$0xff]  ;;  %v430_v51 = vld [vmem:[%s13066_s4 + $0x8] sm:$0xff]  ;;  %v432_v55 = vld [vmem:[%s13066_s4 + $0x18] sm:$0xff]  ;;  %s11255_s25 = sld [smem:[#allocation2]]  ;;  %s11546_s30 = sld [smem:[#allocation2 + $0x1]] }
  0x1f   : > { %s13071_s22 = smov (!%p256_p0, %s8383_s22), 1  ;;  %v11213_v52 = vpack.c.bf16 %v430_v51, %v429_v50  ;;  %v11223_v56 = vpack.c.bf16 %v432_v55, %v431_v54  ;;  %v11233_v58 = vld [vmem:[%s13065_s3] ss:$0 sm:$0xff]  ;;  %s11813_s14 = sld [smem:[#allocation2 + $0x2]] }
  0x20   : > { %10306 = vmatprep.subr.bf16.mxu1 %v11160_v2  ;;  %s8806_s9 = sshll.u32 %s13071_s22, 5  ;;  %s12072_s17 = sld [smem:[#allocation2 + $0x3]] }
  0x21   : > { %10308 = vmatpush3.bf16.msra.mxu1 %v11160_v2  ;;  %s260_s12 = scalar_lea.vmem %s13063_s1, %s8806_s9  ;;  %s265_s24 = scalar_lea.vmem %s13068_s6, %s8806_s9 }
  0x22   : > { %10318 = vmatprep.subr.bf16.mxu1 %v11160_v2  ;;  %v11173_v3 = vld [vmem:[%s260_s12] sm:$0xff]  ;;  %v11175_v4 = vld [vmem:[%s260_s12 + $0x8] sm:$0xff]  ;;  %v11177_v5 = vld [vmem:[%s260_s12 + $0x10] sm:$0xff] }
  0x23   : > { %9381 = vmatprep.mubr.msk.f32.mxu1 %vm270_vm0, %v11173_v3  ;;  %v11181_v6 = vld [vmem:[%s260_s12 + $0x18] sm:$0xff]  ;;  %v271_v7 = vsel %vm270_vm0, %v11173_v3, 0.0  ;;  %v272_v8 = vsel %vm270_vm0, %v11175_v4, 0.0  ;;  %v274_v9 = vsel %vm270_vm0, %v11177_v5, 0.0 }
  0x24   : > { %9382 = vmatmul.mubr.msk.f32.vlgmr.msra.gmra.mrb[0].mxu1 %vm270_vm0, %v11175_v4  ;;  %v273_v10 = vadd.f32 %v272_v8, %v271_v7  ;;  %v276_v11 = vsel %vm270_vm0, %v11181_v6, 0.0  ;;  %s691_s26 = smul.f32 0.5, %s11255_s25 }
  0x25   : > { %9384 = vmatprep.mubr.msk.f32.mxu1 %vm270_vm0, %v11177_v5  ;;  %10320 = vmatpush3.bf16.msra.mxu1 %v11160_v2  ;;  %s1428_s29 = smul.f32 0.16666667, %s11255_s25 }
  0x26   : > { %v275_v12 = vadd.f32 %v274_v9, %v273_v10  ;;  %10330 = vmatprep.subr.bf16.mxu1 %v11160_v2  ;;  %s1883_s7 = smul.f32 0.5, %s11546_s30 }
  0x27   : > { %s2620_s13 = smul.f32 0.16666667, %s11546_s30 }
  0x28   : > { %9385 = vmatmul.mubr.msk.f32.gmra.mrb[2].mxu1 %vm270_vm0, %v11181_v6  ;;  %v277_v13 = vadd.f32 %v276_v11, %v275_v12  ;;  %s2994_s15 = smul.f32 0.5, %s11813_s14 }
  0x29   : > { %s3731_s16 = smul.f32 0.16666667, %s11813_s14 }
  0x2a   : > { %v278_v14 = vrot.slane %v277_v13, 4  ;;  %s4105_s18 = smul.f32 0.5, %s12072_s17 }
  0x2c   : > { %v279_v15 = vadd.f32 %v278_v14, %v277_v13  ;;  %v11261_v14 = vld [vmem:[%s13067_s5] ss:$0 sm:$0xff] }
  0x2e   : > { %v280_v16 = vrot.slane %v279_v15, 2 }
  0x30   : > { %v281_v17 = vadd.f32 %v280_v16, %v279_v15  ;;  %v11263_v16 = vstv %s691_s26  ;;  %s12343_s26 = sld [smem:[#allocation2 + $0x4]] }
  0x32   : > { %v282_v18 = vrot.slane %v281_v17, 1 }
  0x34   : > { %v283_v19 = vadd.f32 %v282_v18, %v281_v17 }
  0x36   : > { %v285_v20 = vmul.f32 0.03125, %v283_v19  ;;  %s5216_s27 = smul.f32 0.5, %s12343_s26 }
  0x37   : > { %s5953_s28 = smul.f32 0.16666667, %s12343_s26 }
  0x38   : > { %v286_v21 = vsub.f32 %v11173_v3, %v285_v20  ;;  %v287_v22 = vsub.f32 %v11175_v4, %v285_v20  ;;  %v288_v23 = vsub.f32 %v11177_v5, %v285_v20  ;;  %v289_v24 = vsub.f32 %v11181_v6, %v285_v20 }
  0x3a   : > { %v290_v25 = vmul.f32 %v286_v21, %v286_v21  ;;  %v291_v26 = vmul.f32 %v287_v22, %v287_v22  ;;  %v292_v27 = vmul.f32 %v288_v23, %v288_v23  ;;  %v293_v28 = vmul.f32 %v289_v24, %v289_v24 }
  0x3c   : > { %v294_v29 = vsel %vm270_vm0, %v290_v25, 0.0  ;;  %v295_v30 = vsel %vm270_vm0, %v291_v26, 0.0  ;;  %v297_v31 = vsel %vm270_vm0, %v292_v27, 0.0  ;;  %v299_v33 = vsel %vm270_vm0, %v293_v28, 0.0 }
  0x3d   : > { %v296_v32 = vadd.f32 %v295_v30, %v294_v29 }
  0x3f   : > { %v298_v34 = vadd.f32 %v297_v31, %v296_v32 }
  0x41   : > { %v300_v35 = vadd.f32 %v299_v33, %v298_v34 }
  0x43   : > { %v301_v36 = vrot.slane %v300_v35, 4 }
  0x45   : > { %v302_v37 = vadd.f32 %v301_v36, %v300_v35 }
  0x47   : > { %v303_v38 = vrot.slane %v302_v37, 2 }
  0x49   : > { %v304_v39 = vadd.f32 %v303_v38, %v302_v37 }
  0x4b   : > { %v305_v40 = vrot.slane %v304_v39, 1 }
  0x4d   : > { %v306_v41 = vadd.f32 %v305_v40, %v304_v39 }
  0x4f   : > { %v307_v42 = vadd.f32 1e-12, %v306_v41 }
  0x51   : > { %10722 = vrsqrt.f32 %v307_v42 }
  0x5b   : > { %v10723_v43 = vpop.eup %10722 }
  0x5c   : > { %v309_v44 = vmul.f32 %v10723_v43, %v286_v21  ;;  %v310_v45 = vmul.f32 %v10723_v43, %v287_v22  ;;  %v311_v46 = vmul.f32 %v10723_v43, %v288_v23  ;;  %v312_v47 = vmul.f32 %v10723_v43, %v289_v24 }
  0x5e   : > { %313 = vxpose.xlu0.b32.start [1/4] (short) (narrow) %v309_v44, 16  ;;  %v10301_v48 = vpack.c.bf16 %v312_v47, %v311_v46  ;;  %v10297_v49 = vpack.c.bf16 %v310_v45, %v309_v44 }
  0x60   : > { %10298 = vmatprep.subr.bf16.mxu0 %v10297_v49 }
  0x61   : > { %10300 = vmatpush3.bf16.msra.mxu0 %v10297_v49 }
  0x62   : > { %314 = vxpose.xlu0.b32.cont [2/4] (short) (narrow) %v310_v45, 16  ;;  %10302 = vmatprep.subr.bf16.mxu0 %v10301_v48 }
  0x65   : > { %10304 = vmatpush3.bf16.msra.mxu0 %v10301_v48 }
  0x66   : > { %315 = vxpose.xlu0.b32.cont [3/4] (short) (narrow) %v311_v46, 16  ;;  %10310 = vmatprep.subr.bf16.mxu0 %v11213_v52 }
  0x6a   : > { %316 = vxpose.xlu0.b32.end [4/4] (short) (narrow) %v312_v47, 16 }
  0xde   : > { %v329_v53 = vpop.trf.xlu0 }
  0xdf   : > { %9374 = vmatprep.mubr.msk.f32.mxu0 %vm345_vm1, %v329_v53 }
  0xe2   : > { %v330_v57 = vpop.trf.xlu0 }
  0xe3   : > { %9375 = vmatmul.mubr.msk.f32.vlgmr.msra.gmra.mrb[0].mxu0 %vm345_vm1, %v330_v57 }
  0xe4   : > { %10312 = vmatpush3.bf16.msra.mxu0 %v11213_v52 }
  0xe5   : > { %10314 = vmatprep.subr.bf16.mxu0 %v11223_v56 }
  0xe8   : > { %10316 = vmatpush3.bf16.msra.mxu0 %v11223_v56 }
  0xe9   : > { %10322 = vmatprep.subr.bf16.mxu0 %v11213_v52 }
  0xf7   : > { %v9383_v59 = vpop.f32.mrb[0].mxu1 }
  0xf8   : > { %v549_v60 = vadd.f32 %v9383_v59, %v11233_v58  ;;  %v543_v61 = vpop.f32.mrb[1].mxu1 }
  0xf9   : > { %v544_v62 = vadd.f32 %v11233_v58, %v543_v61 }
  0xfa   : > { %10724 = vtanh.f32 %v549_v60 }
  0xfb   : > { %10726 = vtanh.f32 %v544_v62  ;;  %v9386_v63 = vpop.f32.mrb[2].mxu1 }
  0xfc   : > { %v559_v0 = vadd.f32 %v9386_v63, %v11233_v58  ;;  %v553_v1 = vpop.f32.mrb[3].mxu1 }
  0xfd   : > { %v554_v7 = vadd.f32 %v11233_v58, %v553_v1 }
  0xfe   : > { %10728 = vtanh.f32 %v559_v0 }
  0xff   : > { %10730 = vtanh.f32 %v554_v7 }
 0x104   : > { %v10725_v8 = vpop.eup %10724 }
 0x105   : > { %v10727_v9 = vpop.eup %10726 }
 0x106   : > { %9398 = vmatprep.mubr.msk.f32.mxu0 %vm345_vm1, %v10727_v9 }
 0x107   : > { %9399 = vmatmul.mubr.msk.f32.vlgmr.msra.gmra.mrb[2].mxu0 %vm345_vm1, %v10725_v8 }
 0x108   : > { %v10729_v10 = vpop.eup %10728  ;;  %10324 = vmatpush3.bf16.msra.mxu0 %v11213_v52 }
 0x109   : > { %v10731_v11 = vpop.eup %10730  ;;  %10326 = vmatprep.subr.bf16.mxu0 %v11223_v56 }
 0x10a   : > { %9401 = vmatprep.mubr.msk.f32.mxu0 %vm345_vm1, %v10731_v11 }
 0x10b   : > { %9402 = vmatmul.mubr.msk.f32.gmra.mrb[4].mxu0 %vm345_vm1, %v10729_v10 }
 0x10c   : > { %10328 = vmatpush3.bf16.msra.mxu0 %v11223_v56 }
 0x10d   : > { %10334 = vmatprep.subr.bf16.mxu0 %v11213_v52 }
 0x1b6   : > { %v11247_v12 = vpop.f32.mrb[0].mxu0 }
 0x1b7   : > { %v11249_v13 = vpop.f32.mrb[1].mxu0 }
 0x1b8   : > { %9387 = vmatprep.mubr.msk.f32.mxu1 %vm270_vm0, %v11249_v13 }
 0x1b9   : > { %9388 = vmatmul.mubr.msk.f32.gmra.mrb[4].mxu1 %vm270_vm0, %v11247_v12 }
 0x1da   : > { %v9400_v15 = vpop.f32.mrb[2].mxu0 }
 0x1db   : > { %v11266_v17 = vadd.f32 %v9400_v15, %v11261_v14  ;;  %v662_v18 = vpop.f32.mrb[3].mxu0 }
 0x1dc   : > { %v11269_v19 = vadd.f32 %v11261_v14, %v662_v18 }
 0x1dd   : > { %v694_v20 = vmul.f32 %v11263_v16, %v11266_v17 }
 0x1de   : > { %v693_v21 = vmul.f32 %v11263_v16, %v11269_v19  ;;  %v9403_v22 = vpop.f32.mrb[4].mxu0 }
 0x1df   : > { %v700_v23 = vadd.f32 %v694_v20, %v11175_v4  ;;  %v11277_v24 = vadd.f32 %v9403_v22, %v11261_v14  ;;  %v672_v25 = vpop.f32.mrb[5].mxu0 }
 0x1e0   : > { %v699_v26 = vadd.f32 %v693_v21, %v11173_v3  ;;  %v11281_v27 = vadd.f32 %v11261_v14, %v672_v25 }
 0x1e1   : > { %v696_v28 = vmul.f32 %v11263_v16, %v11277_v24 }
 0x1e2   : > { %v695_v29 = vmul.f32 %v11263_v16, %v11281_v27  ;;  %9411 = vmatprep.mubr.msk.f32.mxu1 %vm270_vm0, %v699_v26 }
 0x1e3   : > { %v702_v30 = vadd.f32 %v696_v28, %v11181_v6  ;;  %9412 = vmatmul.mubr.msk.f32.vlgmr.msra.gmra.mrb[6].mxu1 %vm270_vm0, %v700_v23 }
 0x1e4   : > { %v701_v31 = vadd.f32 %v695_v29, %v11177_v5  ;;  %10332 = vmatpush3.bf16.msra.mxu1 %v11160_v2 }
 0x1e5   : > { %10342 = vmatprep.subr.bf16.mxu1 %v11160_v2 }
 0x1e6   : > { %9414 = vmatprep.mubr.msk.f32.mxu1 %vm270_vm0, %v701_v31 }
 0x1e7   : > { %9415 = vmatmul.mubr.msk.f32.gmra.mrb[8].mxu1 %vm270_vm0, %v702_v30 }
 0x28c   : > { %v9389_v32 = vpop.f32.mrb[4].mxu1 }
 0x28d   : > { %v569_v33 = vadd.f32 %v9389_v32, %v11233_v58  ;;  %v563_v34 = vpop.f32.mrb[5].mxu1 }
 0x28e   : > { %v564_v35 = vadd.f32 %v11233_v58, %v563_v34 }
 0x290   : > { %10732 = vtanh.f32 %v564_v35 }
 0x291   : > { %10734 = vtanh.f32 %v569_v33 }
 0x29a   : > { %v10733_v36 = vpop.eup %10732 }
 0x29b   : > { %v10735_v37 = vpop.eup %10734  ;;  %9404 = vmatprep.mubr.msk.f32.mxu0 %vm345_vm1, %v10733_v36 }
 0x29c   : > { %9405 = vmatmul.mubr.msk.f32.gmra.mrb[6].mxu0 %vm345_vm1, %v10735_v37 }
 0x2b6   : > { %v9413_v38 = vpop.f32.mrb[6].mxu1 }
 0x2b7   : > { %v795_v39 = vadd.f32 %v9413_v38, %v11233_v58  ;;  %v789_v40 = vpop.f32.mrb[7].mxu1 }
 0x2b8   : > { %v790_v41 = vadd.f32 %v11233_v58, %v789_v40 }
 0x2b9   : > { %10736 = vtanh.f32 %v795_v39 }
 0x2ba   : > { %10738 = vtanh.f32 %v790_v41  ;;  %v9416_v42 = vpop.f32.mrb[8].mxu1 }
 0x2bb   : > { %v805_v43 = vadd.f32 %v9416_v42, %v11233_v58  ;;  %v799_v44 = vpop.f32.mrb[9].mxu1 }
 0x2bc   : > { %v800_v45 = vadd.f32 %v11233_v58, %v799_v44 }
 0x2bd   : > { %10740 = vtanh.f32 %v805_v43 }
 0x2be   : > { %10742 = vtanh.f32 %v800_v45 }
 0x2c3   : > { %v10737_v46 = vpop.eup %10736 }
 0x2c4   : > { %v10739_v47 = vpop.eup %10738 }
 0x2c5   : > { %9428 = vmatprep.mubr.msk.f32.mxu0 %vm345_vm1, %v10739_v47 }
 0x2c6   : > { %9429 = vmatmul.mubr.msk.f32.vlgmr.msra.gmra.mrb[8].mxu0 %vm345_vm1, %v10737_v46 }
 0x2c7   : > { %v10741_v48 = vpop.eup %10740  ;;  %10336 = vmatpush3.bf16.msra.mxu0 %v11213_v52 }
 0x2c8   : > { %v10743_v49 = vpop.eup %10742  ;;  %10338 = vmatprep.subr.bf16.mxu0 %v11223_v56 }
 0x2c9   : > { %9431 = vmatprep.mubr.msk.f32.mxu0 %vm345_vm1, %v10743_v49 }
 0x2ca   : > { %9432 = vmatmul.mubr.msk.f32.gmra.mrb[10].mxu0 %vm345_vm1, %v10741_v48 }
 0x2cb   : > { %10340 = vmatpush3.bf16.msra.mxu0 %v11223_v56 }
 0x2cc   : > { %10346 = vmatprep.subr.bf16.mxu0 %v11213_v52 }
 0x36f   : > { %v9406_v50 = vpop.f32.mrb[6].mxu0 }
 0x370   : > { %v11312_v51 = vadd.f32 %v9406_v50, %v11261_v14  ;;  %v682_v53 = vpop.f32.mrb[7].mxu0 }
 0x371   : > { %v11315_v54 = vadd.f32 %v11261_v14, %v682_v53 }
 0x372   : > { %v698_v55 = vmul.f32 %v11263_v16, %v11312_v51 }
 0x373   : > { %v697_v57 = vmul.f32 %v11263_v16, %v11315_v54 }
 0x374   : > { %v704_v60 = vadd.f32 %v11247_v12, %v698_v55 }
 0x375   : > { %v703_v59 = vadd.f32 %v697_v57, %v11249_v13 }
 0x377   : > { %9417 = vmatprep.mubr.msk.f32.mxu1 %vm270_vm0, %v703_v59 }
 0x378   : > { %9418 = vmatmul.mubr.msk.f32.gmra.mrb[10].mxu1 %vm270_vm0, %v704_v60  ;;  %v11383_v60 = vstv %s11255_s25  ;;  %s4842_s25 = smul.f32 0.16666667, %s12072_s17 }
 0x399   : > { %v9430_v61 = vpop.f32.mrb[8].mxu0 }
 0x39a   : > { %v11326_v62 = vadd.f32 %v9430_v61, %v11261_v14  ;;  %v908_v63 = vpop.f32.mrb[9].mxu0 }
 0x39b   : > { %v909_v0 = vadd.f32 %v11261_v14, %v908_v63 }
 0x39c   : > { %v938_v1 = vmul.f32 %v11326_v62, %v11263_v16  ;;  %v1430_v55 = vmul.f32 2.0, %v11326_v62 }
 0x39d   : > { %v937_v7 = vmul.f32 %v909_v0, %v11263_v16  ;;  %v9433_v8 = vpop.f32.mrb[10].mxu0  ;;  %v1429_v57 = vmul.f32 2.0, %v909_v0 }
 0x39e   : > { %v944_v9 = vadd.f32 %v938_v1, %v11175_v4  ;;  %v11334_v10 = vadd.f32 %v9433_v8, %v11261_v14  ;;  %v918_v11 = vpop.f32.mrb[11].mxu0 }
 0x39f   : > { %v943_v15 = vadd.f32 %v937_v7, %v11173_v3  ;;  %v11338_v18 = vadd.f32 %v11261_v14, %v918_v11  ;;  %v1435_v11 = vadd.f32 %v1429_v57, %v11269_v19 }
 0x3a0   : > { %v940_v20 = vmul.f32 %v11334_v10, %v11263_v16  ;;  %v1432_v7 = vmul.f32 2.0, %v11334_v10 }
 0x3a1   : > { %v939_v21 = vmul.f32 %v11338_v18, %v11263_v16  ;;  %9441 = vmatprep.mubr.msk.f32.mxu1 %vm270_vm0, %v943_v15  ;;  %v1431_v62 = vmul.f32 2.0, %v11338_v18 }
 0x3a2   : > { %v946_v22 = vadd.f32 %v940_v20, %v11181_v6  ;;  %9442 = vmatmul.mubr.msk.f32.vlgmr.msra.gmra.mrb[12].mxu1 %vm270_vm0, %v944_v9  ;;  %v1438_v19 = vadd.f32 %v1432_v7, %v11277_v24 }
 0x3a3   : > { %v945_v23 = vadd.f32 %v939_v21, %v11177_v5  ;;  %10344 = vmatpush3.bf16.msra.mxu1 %v11160_v2 }
 0x3a5   : > { %9444 = vmatprep.mubr.msk.f32.mxu1 %vm270_vm0, %v945_v23 }
 0x3a6   : > { %9445 = vmatmul.mubr.msk.f32.gmra.mrb[14].mxu1 %vm270_vm0, %v946_v22 }
 0x44b   : > { %v9419_v25 = vpop.f32.mrb[10].mxu1 }
 0x44c   : > { %v815_v26 = vadd.f32 %v9419_v25, %v11233_v58  ;;  %v809_v28 = vpop.f32.mrb[11].mxu1 }
 0x44d   : > { %v810_v29 = vadd.f32 %v11233_v58, %v809_v28 }
 0x44f   : > { %10744 = vtanh.f32 %v810_v29  ;;  %v1437_v29 = vadd.f32 %v1431_v62, %v11281_v27 }
 0x450   : > { %10746 = vtanh.f32 %v815_v26 }
 0x459   : > { %v10745_v30 = vpop.eup %10744 }
 0x45a   : > { %v10747_v31 = vpop.eup %10746  ;;  %9434 = vmatprep.mubr.msk.f32.mxu0 %vm345_vm1, %v10745_v30 }
 0x45b   : > { %9435 = vmatmul.mubr.msk.f32.gmra.mrb[12].mxu0 %vm345_vm1, %v10747_v31 }
 0x475   : > { %v9443_v32 = vpop.f32.mrb[12].mxu1 }
 0x476   : > { %v1039_v33 = vadd.f32 %v9443_v32, %v11233_v58  ;;  %v1033_v34 = vpop.f32.mrb[13].mxu1 }
 0x477   : > { %v1034_v35 = vadd.f32 %v11233_v58, %v1033_v34 }
 0x478   : > { %10748 = vtanh.f32 %v1039_v33 }
 0x479   : > { %10750 = vtanh.f32 %v1034_v35  ;;  %v9446_v36 = vpop.f32.mrb[14].mxu1 }
 0x47a   : > { %v1049_v37 = vadd.f32 %v9446_v36, %v11233_v58  ;;  %v1043_v38 = vpop.f32.mrb[15].mxu1 }
 0x47b   : > { %v1044_v39 = vadd.f32 %v11233_v58, %v1043_v38 }
 0x47c   : > { %10752 = vtanh.f32 %v1049_v37 }
 0x47d   : > { %10754 = vtanh.f32 %v1044_v39 }
 0x482   : > { %v10749_v40 = vpop.eup %10748 }
 0x483   : > { %v10751_v41 = vpop.eup %10750 }
 0x484   : > { %9458 = vmatprep.mubr.msk.f32.mxu0 %vm345_vm1, %v10751_v41 }
 0x485   : > { %9459 = vmatmul.mubr.msk.f32.vlgmr.msra.gmra.mrb[14].mxu0 %vm345_vm1, %v10749_v40 }
 0x486   : > { %v10753_v42 = vpop.eup %10752  ;;  %10348 = vmatpush3.bf16.msra.mxu0 %v11213_v52 }
 0x487   : > { %v10755_v43 = vpop.eup %10754  ;;  %10350 = vmatprep.subr.bf16.mxu0 %v11223_v56 }
 0x488   : > { %9461 = vmatprep.mubr.msk.f32.mxu0 %vm345_vm1, %v10755_v43 }
 0x489   : > { %9462 = vmatmul.mubr.msk.f32.gmra.mrb[16].mxu0 %vm345_vm1, %v10753_v42 }
 0x48a   : > { %10352 = vmatpush3.bf16.msra.mxu0 %v11223_v56 }
 0x48b   : > { %10362 = vmatprep.subr.bf16.mxu0 %v11160_v2 }
 0x52e   : > { %v9436_v44 = vpop.f32.mrb[12].mxu0 }
 0x52f   : > { %v11368_v45 = vadd.f32 %v9436_v44, %v11261_v14  ;;  %v928_v46 = vpop.f32.mrb[13].mxu0 }
 0x530   : > { %v11371_v47 = vadd.f32 %v11261_v14, %v928_v46 }
 0x531   : > { %v942_v48 = vmul.f32 %v11368_v45, %v11263_v16 }
 0x532   : > { %v941_v49 = vmul.f32 %v11371_v47, %v11263_v16  ;;  %v1436_v16 = vadd.f32 %v1430_v55, %v11266_v17 }
 0x533   : > { %v948_v50 = vadd.f32 %v11247_v12, %v942_v48 }
 0x534   : > { %v947_v53 = vadd.f32 %v941_v49, %v11249_v13 }
 0x536   : > { %9447 = vmatprep.mubr.msk.f32.mxu1 %vm270_vm0, %v947_v53 }
 0x537   : > { %9448 = vmatmul.mubr.msk.f32.gmra.mrb[16].mxu1 %vm270_vm0, %v948_v50 }
 0x558   : > { %v9460_v59 = vpop.f32.mrb[14].mxu0 }
 0x559   : > { %v1158_v61 = vadd.f32 %v9460_v59, %v11261_v14  ;;  %v1152_v63 = vpop.f32.mrb[15].mxu0  ;;  %v447_v59 = vlaneseq }
 0x55a   : > { %v1153_v1 = vadd.f32 %v11261_v14, %v1152_v63 }
 0x55b   : > { %v1183_v8 = vmul.f32 %v11383_v60, %v1158_v61  ;;  %v1442_v9 = vmul.f32 2.0, %v1158_v61  ;;  %v11429_v61 = vshrl.u32 %v447_v59, 7 }
 0x55c   : > { %v1182_v0 = vmul.f32 %v11383_v60, %v1153_v1  ;;  %v1441_v15 = vmul.f32 2.0, %v1153_v1  ;;  %v9463_v20 = vpop.f32.mrb[16].mxu0  ;;  %v11434_v1 = vand.u32 127, %v447_v59 }
 0x55d   : > { %v1189_v21 = vadd.f32 %v1183_v8, %v11175_v4  ;;  %v1168_v22 = vadd.f32 %v9463_v20, %v11261_v14  ;;  %v1162_v23 = vpop.f32.mrb[17].mxu0  ;;  %v11395_v25 = vadd.f32 %v1442_v9, %v1436_v16  ;;  %v11432_v63 = vadd.s32 8, %v11429_v61 }
 0x55e   : > { %v1188_v17 = vadd.f32 %v1182_v0, %v11173_v3  ;;  %v1163_v10 = vadd.f32 %v11261_v14, %v1162_v23  ;;  %v11399_v26 = vadd.f32 %v1441_v15, %v1435_v11  ;;  %v1472_v16 = vadd.s32 16, %v11429_v61 }
 0x55f   : > { %v1185_v18 = vmul.f32 %v11383_v60, %v1168_v22  ;;  %v1444_v28 = vmul.f32 2.0, %v1168_v22  ;;  %v1473_v7 = vadd.s32 16, %v11432_v63  ;;  %v11096_v8 = vmov 1.0|1.0  }
 0x560   : > { %v1184_v30 = vmul.f32 %v11383_v60, %v1163_v10  ;;  %v1443_v31 = vmul.f32 2.0, %v1163_v10  ;;  %9471 = vmatprep.mubr.msk.f32.mxu1 %vm270_vm0, %v1188_v17  ;;  %vm1474_vm2 = vcmp.eq.s32.totalorder %v11434_v1, %v1472_v16  ;;  %v1434_v9 = vmul.f32 2.0, %v11368_v45 }
 0x561   : > { %v1191_v32 = vadd.f32 %v1185_v18, %v11181_v6  ;;  %9472 = vmatmul.mubr.msk.f32.vlgmr.msra.gmra.mrb[18].mxu1 %vm270_vm0, %v1189_v21  ;;  %v11408_v33 = vadd.f32 %v1444_v28, %v1438_v19  ;;  %vm1475_vm3 = vcmp.eq.s32.totalorder %v11434_v1, %v1473_v7  ;;  %v1433_v11 = vmul.f32 2.0, %v11371_v47 }
 0x562   : > { %v1190_v34 = vadd.f32 %v1184_v30, %v11177_v5  ;;  %v11411_v35 = vadd.f32 %v1443_v31, %v1437_v29  ;;  %vm10353_vm4 = vmpackc.low %vm1475_vm3, %vm1474_vm2  ;;  %v1440_v21 = vadd.f32 %v1434_v9, %v11312_v51  ;;  %v1459_v30 = vstv %s1428_s29 }
 0x563   : > { %10354 = vmatprep.subr.msk.bf16.mxu1 %vm10353_vm4, %v11096_v8  ;;  %v1439_v17 = vadd.f32 %v1433_v11, %v11315_v54  ;;  %vm452_vm5 = vcmp.eq.s32.totalorder %v11434_v1, %v11429_v61  ;;  %vm453_vm6 = vcmp.eq.s32.totalorder %v11434_v1, %v11432_v63 }
 0x564   : > { %9474 = vmatprep.mubr.msk.f32.mxu1 %vm270_vm0, %v1190_v34  ;;  %10356 = vmatpush3.bf16.msk.msra.mxu1 %vm10353_vm4, %v11096_v8  ;;  %vm10357_vm7 = vmpackc.low %vm453_vm6, %vm452_vm5 }
 0x565   : > { %9475 = vmatmul.mubr.msk.f32.gmra.mrb[20].mxu1 %vm270_vm0, %v1191_v32  ;;  %10358 = vmatprep.subr.msk.bf16.mxu1 %vm10357_vm7, %v11096_v8 }
 0x60a   : > { %v9449_v24 = vpop.f32.mrb[16].mxu1 }
 0x60b   : > { %v1059_v27 = vadd.f32 %v9449_v24, %v11233_v58  ;;  %v1053_v36 = vpop.f32.mrb[17].mxu1 }
 0x60c   : > { %v1054_v37 = vadd.f32 %v11233_v58, %v1053_v36 }
 0x60e   : > { %10756 = vtanh.f32 %v1054_v37 }
 0x60f   : > { %10758 = vtanh.f32 %v1059_v27 }
 0x618   : > { %v10757_v38 = vpop.eup %10756 }
 0x619   : > { %v10759_v39 = vpop.eup %10758  ;;  %9464 = vmatprep.mubr.msk.f32.mxu0 %vm345_vm1, %v10757_v38 }
 0x61a   : > { %9465 = vmatmul.mubr.msk.f32.gmra.mrb[18].mxu0 %vm345_vm1, %v10759_v39 }
 0x634   : > { %v9473_v40 = vpop.f32.mrb[18].mxu1 }
 0x635   : > { %v1284_v41 = vadd.f32 %v9473_v40, %v11233_v58  ;;  %v1278_v42 = vpop.f32.mrb[19].mxu1 }
 0x636   : > { %v1279_v43 = vadd.f32 %v11233_v58, %v1278_v42 }
 0x637   : > { %10760 = vtanh.f32 %v1284_v41 }
 0x638   : > { %10762 = vtanh.f32 %v1279_v43  ;;  %v9476_v44 = vpop.f32.mrb[20].mxu1 }
 0x639   : > { %v1294_v46 = vadd.f32 %v9476_v44, %v11233_v58  ;;  %v1288_v48 = vpop.f32.mrb[21].mxu1 }
 0x63a   : > { %v1289_v49 = vadd.f32 %v11233_v58, %v1288_v48 }
 0x63b   : > { %10764 = vtanh.f32 %v1294_v46 }
 0x63c   : > { %10766 = vtanh.f32 %v1289_v49 }
 0x641   : > { %v10761_v50 = vpop.eup %10760 }
 0x642   : > { %v10763_v53 = vpop.eup %10762 }
 0x643   : > { %9488 = vmatprep.mubr.msk.f32.mxu0 %vm345_vm1, %v10763_v53 }
 0x644   : > { %9489 = vmatmul.mubr.msk.f32.vlgmr.msra.gmra.mrb[20].mxu0 %vm345_vm1, %v10761_v50 }
 0x645   : > { %v10765_v55 = vpop.eup %10764  ;;  %10364 = vmatpush3.bf16.msra.mxu0 %v11160_v2 }
 0x646   : > { %v10767_v57 = vpop.eup %10766  ;;  %10374 = vmatprep.subr.bf16.mxu0 %v11160_v2 }
 0x647   : > { %9491 = vmatprep.mubr.msk.f32.mxu0 %vm345_vm1, %v10767_v57 }
 0x648   : > { %9492 = vmatmul.mubr.msk.f32.gmra.mrb[22].mxu0 %vm345_vm1, %v10765_v55 }
 0x6ed   : > { %v9466_v62 = vpop.f32.mrb[18].mxu0 }
 0x6ee   : > { %v1178_v0 = vadd.f32 %v9466_v62, %v11261_v14  ;;  %v1172_v15 = vpop.f32.mrb[19].mxu0 }
 0x6ef   : > { %v1173_v20 = vadd.f32 %v11261_v14, %v1172_v15 }
 0x6f0   : > { %v1187_v22 = vmul.f32 %v11383_v60, %v1178_v0  ;;  %v1446_v23 = vmul.f32 2.0, %v1178_v0 }
 0x6f1   : > { %v1186_v10 = vmul.f32 %v11383_v60, %v1173_v20  ;;  %v1445_v19 = vmul.f32 2.0, %v1173_v20 }
 0x6f2   : > { %v1193_v45 = vadd.f32 %v11247_v12, %v1187_v22  ;;  %v11451_v47 = vadd.f32 %v1446_v23, %v1440_v21 }
 0x6f3   : > { %v1192_v18 = vadd.f32 %v1186_v10, %v11249_v13  ;;  %v11454_v28 = vadd.f32 %v1445_v19, %v1439_v17 }
 0x6f5   : > { %9477 = vmatprep.mubr.msk.f32.mxu1 %vm270_vm0, %v1192_v18 }
 0x6f6   : > { %9478 = vmatmul.mubr.msk.f32.gmra.mrb[22].mxu1 %vm270_vm0, %v1193_v45 }
 0x717   : > { %v9490_v51 = vpop.f32.mrb[20].mxu0 }
 0x718   : > { %v1403_v29 = vadd.f32 %v9490_v51, %v11261_v14  ;;  %v1397_v54 = vpop.f32.mrb[21].mxu0 }
 0x719   : > { %v1398_v60 = vadd.f32 %v11261_v14, %v1397_v54 }
 0x71a   : > { %v1454_v31 = vadd.f32 %v11395_v25, %v1403_v29 }
 0x71b   : > { %v1453_v32 = vadd.f32 %v11399_v26, %v1398_v60  ;;  %v9493_v34 = vpop.f32.mrb[22].mxu0 }
 0x71c   : > { %v1461_v24 = vmul.f32 %v1459_v30, %v1454_v31  ;;  %v1413_v27 = vadd.f32 %v9493_v34, %v11261_v14  ;;  %v1407_v36 = vpop.f32.mrb[23].mxu0 }
 0x71d   : > { %v1460_v37 = vmul.f32 %v1459_v30, %v1453_v32  ;;  %v1408_v38 = vadd.f32 %v11261_v14, %v1407_v36 }
 0x71e   : > { %v1456_v39 = vadd.f32 %v11408_v33, %v1413_v27  ;;  %v11471_v42 = vadd.f32 %v1461_v24, %v11175_v4 }
 0x71f   : > { %v11467_v40 = vadd.f32 %v1460_v37, %v11173_v3  ;;  %v1455_v41 = vadd.f32 %v11411_v35, %v1408_v38 }
 0x720   : > { %v1463_v25 = vmul.f32 %v1459_v30, %v1456_v39 }
 0x721   : > { %v1462_v26 = vmul.f32 %v1459_v30, %v1455_v41  ;;  %9501 = vmatprep.mubr.msk.f32.mxu1 %vm270_vm0, %v11467_v40 }
 0x722   : > { %9502 = vmatmul.mubr.msk.f32.vlgmr.msra.gmra.mrb[24].mxu1 %vm270_vm0, %v11471_v42  ;;  %v11481_v33 = vadd.f32 %v1463_v25, %v11181_v6 }
 0x723   : > { %v11478_v43 = vadd.f32 %v1462_v26, %v11177_v5  ;;  %10360 = vmatpush3.bf16.msk.msra.mxu1 %vm10357_vm7, %v11096_v8 }
 0x724   : > { %10366 = vmatprep.subr.bf16.mxu1 %v11213_v52 }
 0x725   : > { %9504 = vmatprep.mubr.msk.f32.mxu1 %vm270_vm0, %v11478_v43 }
 0x726   : > { %9505 = vmatmul.mubr.msk.f32.gmra.mrb[26].mxu1 %vm270_vm0, %v11481_v33 }
 0x727   : > { %9511 = vmatprep.mubr.msk.f32.mxu1 %vm270_vm0, %v11173_v3 }
 0x72a   : > { %9512 = vmatmul.mubr.msk.f32.vlgmr.msra.gmra.mrb[24].mxu1 %vm270_vm0, %v11175_v4 }
 0x72b   : > { %10368 = vmatpush3.bf16.msra.mxu1 %v11213_v52  ;;  %9514 = vmatprep.mubr.msk.f32.mxu1 %vm270_vm0, %v11177_v5 }
 0x72c   : > { %10370 = vmatprep.subr.bf16.mxu1 %v11223_v56 }
 0x72e   : > { %9515 = vmatmul.mubr.msk.f32.gmra.mrb[26].mxu1 %vm270_vm0, %v11181_v6 }
 0x72f   : > { %10372 = vmatpush3.bf16.msra.mxu1 %v11223_v56 }
 0x730   : > { %10378 = vmatprep.subr.bf16.mxu1 %v11213_v52 }
 0x7c9   : > { %v9479_v35 = vpop.f32.mrb[22].mxu1 }
 0x7ca   : > { %v1304_v44 = vadd.f32 %v9479_v35, %v11233_v58  ;;  %v1298_v46 = vpop.f32.mrb[23].mxu1 }
 0x7cb   : > { %v1299_v48 = vadd.f32 %v11233_v58, %v1298_v46 }
 0x7cd   : > { %10768 = vtanh.f32 %v1299_v48 }
 0x7ce   : > { %10770 = vtanh.f32 %v1304_v44 }
 0x7d7   : > { %v10769_v49 = vpop.eup %10768 }
 0x7d8   : > { %v10771_v50 = vpop.eup %10770  ;;  %9494 = vmatprep.mubr.msk.f32.mxu0 %vm345_vm1, %v10769_v49 }
 0x7d9   : > { %9495 = vmatmul.mubr.msk.f32.gmra.mrb[24].mxu0 %vm345_vm1, %v10771_v50 }
 0x7da   : > { %9521 = vmatprep.mubr.msk.f32.mxu0 %vm270_vm0, %v11467_v40 }
 0x7dd   : > { %9522 = vmatmul.mubr.msk.f32.vlgmr.msra.gmra.mrb[26].mxu0 %vm270_vm0, %v11471_v42 }
 0x7de   : > { %9524 = vmatprep.mubr.msk.f32.mxu0 %vm270_vm0, %v11478_v43  ;;  %10376 = vmatpush3.bf16.msra.mxu0 %v11160_v2 }
 0x7df   : > { %10386 = vmatprep.subr.bf16.mxu0 %v11160_v2 }
 0x7e1   : > { %9525 = vmatmul.mubr.msk.f32.gmra.mrb[28].mxu0 %vm270_vm0, %v11481_v33 }
 0x8ac   : > { %v9496_v3 = vpop.f32.mrb[24].mxu0 }
 0x8ad   : > { %v1423_v53 = vadd.f32 %v9496_v3, %v11261_v14  ;;  %v1417_v55 = vpop.f32.mrb[25].mxu0 }
 0x8ae   : > { %v1418_v4 = vadd.f32 %v11261_v14, %v1417_v55 }
 0x8af   : > { %v1458_v57 = vadd.f32 %v11451_v47, %v1423_v53 }
 0x8b0   : > { %v1457_v59 = vadd.f32 %v11454_v28, %v1418_v4  ;;  %v9523_v5 = vpop.f32.mrb[26].mxu0  ;;  %v11551_v28 = vstv %s1883_s7  ;;  %s12609_s7 = sld [smem:[#allocation2 + $0x5]] }
 0x8b1   : > { %v1465_v16 = vmul.f32 %v1459_v30, %v1458_v57  ;;  %v1741_v7 = vadd.f32 %v9523_v5, %v11233_v58  ;;  %v1735_v9 = vpop.f32.mrb[27].mxu0 }
 0x8b2   : > { %v1464_v6 = vmul.f32 %v1459_v30, %v1457_v59  ;;  %v1736_v11 = vadd.f32 %v11233_v58, %v1735_v9 }
 0x8b3   : > { %v11527_v62 = vadd.f32 %v11247_v12, %v1465_v16 }
 0x8b4   : > { %v11530_v0 = vadd.f32 %v1464_v6, %v11249_v13  ;;  %10772 = vtanh.f32 %v1736_v11  ;;  %v9526_v15 = vpop.f32.mrb[28].mxu0 }
 0x8b5   : > { %10774 = vtanh.f32 %v1741_v7  ;;  %v1751_v20 = vadd.f32 %v9526_v15, %v11233_v58  ;;  %v1745_v21 = vpop.f32.mrb[29].mxu0 }
 0x8b6   : > { %v1746_v22 = vadd.f32 %v11233_v58, %v1745_v21  ;;  %9527 = vmatprep.mubr.msk.f32.mxu0 %vm270_vm0, %v11530_v0  ;;  %s6327_s8 = smul.f32 0.5, %s12609_s7 }
 0x8b7   : > { %9528 = vmatmul.mubr.msk.f32.gmra.mrb[30].mxu0 %vm270_vm0, %v11527_v62  ;;  %s7064_s12 = smul.f32 0.16666667, %s12609_s7 }
 0x8b8   : > { %10776 = vtanh.f32 %v1746_v22 }
 0x8b9   : > { %10778 = vtanh.f32 %v1751_v20 }
 0x8be   : > { %v10773_v12 = vpop.eup %10772 }
 0x8bf   : > { %v10775_v23 = vpop.eup %10774  ;;  %9538 = vmatprep.mubr.msk.f32.mxu1 %vm345_vm1, %v10773_v12 }
 0x8c0   : > { %9539 = vmatmul.mubr.msk.f32.vlgmr.msra.gmra.mrb[28].mxu1 %vm345_vm1, %v10775_v23 }
 0x8c1   : > { %10380 = vmatpush3.bf16.msra.mxu1 %v11213_v52 }
 0x8c2   : > { %v10777_v13 = vpop.eup %10776  ;;  %10382 = vmatprep.subr.bf16.mxu1 %v11223_v56 }
 0x8c3   : > { %v10779_v17 = vpop.eup %10778  ;;  %9541 = vmatprep.mubr.msk.f32.mxu1 %vm345_vm1, %v10777_v13 }
 0x8c4   : > { %9542 = vmatmul.mubr.msk.f32.gmra.mrb[30].mxu1 %vm345_vm1, %v10779_v17 }
 0x8c5   : > { %10384 = vmatpush3.bf16.msra.mxu1 %v11223_v56 }
 0x8c6   : > { %10390 = vmatprep.subr.bf16.mxu1 %v11213_v52 }
 0x98a   : > { %v9529_v10 = vpop.f32.mrb[30].mxu0 }
 0x98b   : > { %v1761_v19 = vadd.f32 %v9529_v10, %v11233_v58  ;;  %v1755_v45 = vpop.f32.mrb[31].mxu0 }
 0x98c   : > { %v1756_v47 = vadd.f32 %v11233_v58, %v1755_v45 }
 0x98e   : > { %10780 = vtanh.f32 %v1756_v47 }
 0x98f   : > { %10782 = vtanh.f32 %v1761_v19 }
 0x993   : > { %v9540_v18 = vpop.f32.mrb[28].mxu1 }
 0x994   : > { %v11554_v51 = vadd.f32 %v9540_v18, %v11261_v14  ;;  %v1854_v29 = vpop.f32.mrb[29].mxu1 }
 0x995   : > { %v11557_v54 = vadd.f32 %v11261_v14, %v1854_v29 }
 0x996   : > { %v1886_v30 = vmul.f32 %v11551_v28, %v11554_v51 }
 0x997   : > { %v1885_v60 = vmul.f32 %v11551_v28, %v11557_v54  ;;  %v9543_v31 = vpop.f32.mrb[30].mxu1 }
 0x998   : > { %v10781_v32 = vpop.eup %10780  ;;  %v11564_v34 = vadd.f32 %v9543_v31, %v11261_v14  ;;  %v1864_v24 = vpop.f32.mrb[31].mxu1  ;;  %v1892_v38 = vadd.f32 %v1886_v30, %v11471_v42 }
 0x999   : > { %v10783_v27 = vpop.eup %10782  ;;  %v1891_v36 = vadd.f32 %v1885_v60, %v11467_v40  ;;  %v11568_v37 = vadd.f32 %v11261_v14, %v1864_v24  ;;  %9544 = vmatprep.mubr.msk.f32.mxu1 %vm345_vm1, %v10781_v32 }
 0x99a   : > { %v1888_v39 = vmul.f32 %v11551_v28, %v11564_v34  ;;  %9545 = vmatmul.mubr.msk.f32.gmra.mrb[32].mxu1 %vm345_vm1, %v10783_v27 }
 0x99b   : > { %v1887_v41 = vmul.f32 %v11551_v28, %v11568_v37  ;;  %9551 = vmatprep.mubr.msk.f32.mxu0 %vm270_vm0, %v1891_v36 }
 0x99c   : > { %9552 = vmatmul.mubr.msk.f32.vlgmr.msra.gmra.mrb[32].mxu0 %vm270_vm0, %v1892_v38  ;;  %v1894_v26 = vadd.f32 %v1888_v39, %v11481_v33 }
 0x99d   : > { %v1893_v25 = vadd.f32 %v1887_v41, %v11478_v43  ;;  %10388 = vmatpush3.bf16.msra.mxu0 %v11160_v2 }
 0x99e   : > { %10398 = vmatprep.subr.bf16.mxu0 %v11160_v2 }
 0x99f   : > { %9554 = vmatprep.mubr.msk.f32.mxu0 %vm270_vm0, %v1893_v25 }
 0x9a0   : > { %9555 = vmatmul.mubr.msk.f32.gmra.mrb[34].mxu0 %vm270_vm0, %v1894_v26 }
 0xa6d   : > { %v9546_v35 = vpop.f32.mrb[32].mxu1 }
 0xa6e   : > { %v11586_v44 = vadd.f32 %v9546_v35, %v11261_v14  ;;  %v1874_v46 = vpop.f32.mrb[33].mxu1 }
 0xa6f   : > { %v11589_v48 = vadd.f32 %v11261_v14, %v1874_v46  ;;  %v9553_v49 = vpop.f32.mrb[32].mxu0 }
 0xa70   : > { %v1890_v50 = vmul.f32 %v11551_v28, %v11586_v44  ;;  %v1987_v3 = vadd.f32 %v9553_v49, %v11233_v58  ;;  %v1981_v53 = vpop.f32.mrb[33].mxu0 }
 0xa71   : > { %v1889_v55 = vmul.f32 %v11551_v28, %v11589_v48  ;;  %v1982_v4 = vadd.f32 %v11233_v58, %v1981_v53 }
 0xa72   : > { %v1896_v5 = vadd.f32 %v1890_v50, %v11527_v62 }
 0xa73   : > { %v1895_v57 = vadd.f32 %v1889_v55, %v11530_v0  ;;  %10784 = vtanh.f32 %v1982_v4  ;;  %v9556_v59 = vpop.f32.mrb[34].mxu0 }
 0xa74   : > { %10786 = vtanh.f32 %v1987_v3  ;;  %v1997_v16 = vadd.f32 %v9556_v59, %v11233_v58  ;;  %v1991_v7 = vpop.f32.mrb[35].mxu0 }
 0xa75   : > { %v1992_v9 = vadd.f32 %v11233_v58, %v1991_v7  ;;  %9557 = vmatprep.mubr.msk.f32.mxu0 %vm270_vm0, %v1895_v57 }
 0xa76   : > { %9558 = vmatmul.mubr.msk.f32.gmra.mrb[36].mxu0 %vm270_vm0, %v1896_v5 }
 0xa77   : > { %10788 = vtanh.f32 %v1992_v9 }
 0xa78   : > { %10790 = vtanh.f32 %v1997_v16 }
 0xa7d   : > { %v10785_v6 = vpop.eup %10784 }
 0xa7e   : > { %v10787_v11 = vpop.eup %10786  ;;  %9568 = vmatprep.mubr.msk.f32.mxu1 %vm345_vm1, %v10785_v6 }
 0xa7f   : > { %9569 = vmatmul.mubr.msk.f32.vlgmr.msra.gmra.mrb[34].mxu1 %vm345_vm1, %v10787_v11 }
 0xa80   : > { %10392 = vmatpush3.bf16.msra.mxu1 %v11213_v52 }
 0xa81   : > { %v10789_v15 = vpop.eup %10788  ;;  %10394 = vmatprep.subr.bf16.mxu1 %v11223_v56 }
 0xa82   : > { %v10791_v20 = vpop.eup %10790  ;;  %9571 = vmatprep.mubr.msk.f32.mxu1 %vm345_vm1, %v10789_v15 }
 0xa83   : > { %9572 = vmatmul.mubr.msk.f32.gmra.mrb[36].mxu1 %vm345_vm1, %v10791_v20 }
 0xa84   : > { %10396 = vmatpush3.bf16.msra.mxu1 %v11223_v56 }
 0xa85   : > { %10402 = vmatprep.subr.bf16.mxu1 %v11213_v52 }
 0xb49   : > { %v9559_v21 = vpop.f32.mrb[36].mxu0 }
 0xb4a   : > { %v2007_v22 = vadd.f32 %v9559_v21, %v11233_v58  ;;  %v2001_v12 = vpop.f32.mrb[37].mxu0 }
 0xb4b   : > { %v2002_v23 = vadd.f32 %v11233_v58, %v2001_v12 }
 0xb4d   : > { %10792 = vtanh.f32 %v2002_v23 }
 0xb4e   : > { %10794 = vtanh.f32 %v2007_v22 }
 0xb52   : > { %v9570_v13 = vpop.f32.mrb[34].mxu1 }
 0xb53   : > { %v11614_v17 = vadd.f32 %v9570_v13, %v11261_v14  ;;  %v2100_v10 = vpop.f32.mrb[35].mxu1 }
 0xb54   : > { %v2101_v19 = vadd.f32 %v11261_v14, %v2100_v10 }
 0xb55   : > { %v2130_v45 = vmul.f32 %v11614_v17, %v11551_v28  ;;  %v2622_v23 = vmul.f32 2.0, %v11614_v17 }
 0xb56   : > { %v2129_v47 = vmul.f32 %v2101_v19, %v11551_v28  ;;  %v9573_v18 = vpop.f32.mrb[36].mxu1  ;;  %v2621_v13 = vmul.f32 2.0, %v2101_v19 }
 0xb57   : > { %v10793_v29 = vpop.eup %10792  ;;  %v11621_v30 = vadd.f32 %v9573_v18, %v11261_v14  ;;  %v2110_v60 = vpop.f32.mrb[37].mxu1  ;;  %v2136_v27 = vadd.f32 %v2130_v45, %v11471_v42  ;;  %v2373_v45 = vstv %s11546_s30 }
 0xb58   : > { %v10795_v31 = vpop.eup %10794  ;;  %v2135_v32 = vadd.f32 %v2129_v47, %v11467_v40  ;;  %v11625_v24 = vadd.f32 %v11261_v14, %v2110_v60  ;;  %9574 = vmatprep.mubr.msk.f32.mxu1 %vm345_vm1, %v10793_v29  ;;  %v2628_v60 = vadd.f32 %v2622_v23, %v11554_v51 }
 0xb59   : > { %v2132_v36 = vmul.f32 %v11621_v30, %v11551_v28  ;;  %9575 = vmatmul.mubr.msk.f32.gmra.mrb[38].mxu1 %vm345_vm1, %v10795_v31  ;;  %v2624_v31 = vmul.f32 2.0, %v11621_v30 }
 0xb5a   : > { %v2131_v38 = vmul.f32 %v11625_v24, %v11551_v28  ;;  %9581 = vmatprep.mubr.msk.f32.mxu0 %vm270_vm0, %v2135_v32 }
 0xb5b   : > { %9582 = vmatmul.mubr.msk.f32.vlgmr.msra.gmra.mrb[38].mxu0 %vm270_vm0, %v2136_v27  ;;  %v2138_v41 = vadd.f32 %v2132_v36, %v11481_v33  ;;  %v2623_v36 = vmul.f32 2.0, %v11625_v24 }
 0xb5c   : > { %v2137_v39 = vadd.f32 %v2131_v38, %v11478_v43  ;;  %10400 = vmatpush3.bf16.msra.mxu0 %v11160_v2 }
 0xb5d   : > { %10414 = vmatprep.subr.bf16.mxu0 %v11160_v2 }
 0xb5e   : > { %9584 = vmatprep.mubr.msk.f32.mxu0 %vm270_vm0, %v2137_v39 }
 0xb5f   : > { %9585 = vmatmul.mubr.msk.f32.gmra.mrb[40].mxu0 %vm270_vm0, %v2138_v41 }
 0xc2c   : > { %v9576_v25 = vpop.f32.mrb[38].mxu1 }
 0xc2d   : > { %v11643_v26 = vadd.f32 %v9576_v25, %v11261_v14  ;;  %v2120_v35 = vpop.f32.mrb[39].mxu1 }
 0xc2e   : > { %v11646_v46 = vadd.f32 %v11261_v14, %v2120_v35  ;;  %v9583_v49 = vpop.f32.mrb[38].mxu0 }
 0xc2f   : > { %v2134_v50 = vmul.f32 %v11643_v26, %v11551_v28  ;;  %v2231_v3 = vadd.f32 %v9583_v49, %v11233_v58  ;;  %v2225_v53 = vpop.f32.mrb[39].mxu0 }
 0xc30   : > { %v2133_v55 = vmul.f32 %v11646_v46, %v11551_v28  ;;  %v2226_v4 = vadd.f32 %v11233_v58, %v2225_v53 }
 0xc31   : > { %v2140_v5 = vadd.f32 %v2134_v50, %v11527_v62 }
 0xc32   : > { %v2139_v57 = vadd.f32 %v2133_v55, %v11530_v0  ;;  %10796 = vtanh.f32 %v2226_v4  ;;  %v9586_v59 = vpop.f32.mrb[40].mxu0  ;;  %v2629_v55 = vadd.f32 %v2623_v36, %v11568_v37  ;;  %v2626_v37 = vmul.f32 2.0, %v11643_v26  ;;  %v11714_v26 = vld [vmem:[%s13065_s3] ss:$0 sm:$0xff] }
 0xc33   : > { %10798 = vtanh.f32 %v2231_v3  ;;  %v2241_v16 = vadd.f32 %v9586_v59, %v11233_v58  ;;  %v2235_v7 = vpop.f32.mrb[41].mxu0 }
 0xc34   : > { %v2236_v9 = vadd.f32 %v11233_v58, %v2235_v7  ;;  %9587 = vmatprep.mubr.msk.f32.mxu0 %vm270_vm0, %v2139_v57  ;;  %v2625_v7 = vmul.f32 2.0, %v11646_v46 }
 0xc35   : > { %9588 = vmatmul.mubr.msk.f32.gmra.mrb[42].mxu0 %vm270_vm0, %v2140_v5 }
 0xc36   : > { %10800 = vtanh.f32 %v2236_v9  ;;  %v2631_v23 = vadd.f32 %v2625_v7, %v11589_v48 }
 0xc37   : > { %10802 = vtanh.f32 %v2241_v16 }
 0xc3c   : > { %v10797_v28 = vpop.eup %10796 }
 0xc3d   : > { %v10799_v6 = vpop.eup %10798  ;;  %9598 = vmatprep.mubr.msk.f32.mxu1 %vm345_vm1, %v10797_v28 }
 0xc3e   : > { %9599 = vmatmul.mubr.msk.f32.vlgmr.msra.gmra.mrb[40].mxu1 %vm345_vm1, %v10799_v6 }
 0xc3f   : > { %10404 = vmatpush3.bf16.msra.mxu1 %v11213_v52 }
 0xc40   : > { %v10801_v11 = vpop.eup %10800  ;;  %10406 = vmatprep.subr.bf16.mxu1 %v11223_v56 }
 0xc41   : > { %v10803_v15 = vpop.eup %10802  ;;  %9601 = vmatprep.mubr.msk.f32.mxu1 %vm345_vm1, %v10801_v11  ;;  %v11707_v11 = vld [vmem:[%s13067_s5] ss:$0 sm:$0xff] }
 0xc42   : > { %9602 = vmatmul.mubr.msk.f32.gmra.mrb[42].mxu1 %vm345_vm1, %v10803_v15 }
 0xc43   : > { %10408 = vmatpush3.bf16.msra.mxu1 %v11223_v56 }
 0xd08   : > { %v9589_v20 = vpop.f32.mrb[42].mxu0 }
 0xd09   : > { %v2251_v21 = vadd.f32 %v9589_v20, %v11233_v58  ;;  %v2245_v22 = vpop.f32.mrb[43].mxu0 }
 0xd0a   : > { %v2246_v12 = vadd.f32 %v11233_v58, %v2245_v22  ;;  %v2627_v58 = vadd.f32 %v2621_v13, %v11557_v54  ;;  %v2630_v54 = vadd.f32 %v2624_v31, %v11564_v34 }
 0xd0c   : > { %10804 = vtanh.f32 %v2246_v12 }
 0xd0d   : > { %10806 = vtanh.f32 %v2251_v21  ;;  %v2632_v21 = vadd.f32 %v2626_v37, %v11586_v44 }
 0xd11   : > { %v9600_v10 = vpop.f32.mrb[40].mxu1 }
 0xd12   : > { %v2350_v47 = vadd.f32 %v9600_v10, %v11261_v14  ;;  %v2344_v18 = vpop.f32.mrb[41].mxu1 }
 0xd13   : > { %v2345_v29 = vadd.f32 %v11261_v14, %v2344_v18 }
 0xd14   : > { %v2375_v32 = vmul.f32 %v2373_v45, %v2350_v47  ;;  %v2634_v27 = vmul.f32 2.0, %v2350_v47 }
 0xd15   : > { %v2374_v38 = vmul.f32 %v2373_v45, %v2345_v29  ;;  %v2633_v17 = vmul.f32 2.0, %v2345_v29  ;;  %v9603_v19 = vpop.f32.mrb[42].mxu1 }
 0xd16   : > { %v10805_v39 = vpop.eup %10804  ;;  %v2360_v41 = vadd.f32 %v9603_v19, %v11261_v14  ;;  %v2354_v25 = vpop.f32.mrb[43].mxu1  ;;  %v11678_v35 = vadd.f32 %v2634_v27, %v2628_v60  ;;  %v2381_v24 = vadd.f32 %v2375_v32, %v11471_v42  ;;  %v2665_v19 = vadd.s32 32, %v11432_v63 }
 0xd17   : > { %v10807_v49 = vpop.eup %10806  ;;  %v2380_v51 = vadd.f32 %v2374_v38, %v11467_v40  ;;  %v2355_v30 = vadd.f32 %v11261_v14, %v2354_v25  ;;  %9604 = vmatprep.mubr.msk.f32.mxu1 %vm345_vm1, %v10805_v39  ;;  %v11683_v50 = vadd.f32 %v2633_v17, %v2627_v58  ;;  %v2664_v17 = vadd.s32 32, %v11429_v61 }
 0xd18   : > { %v2377_v3 = vmul.f32 %v2373_v45, %v2360_v41  ;;  %v2636_v53 = vmul.f32 2.0, %v2360_v41  ;;  %9605 = vmatmul.mubr.msk.f32.gmra.mrb[44].mxu1 %vm345_vm1, %v10807_v49  ;;  %vm2667_vm9 = vcmp.eq.s32.totalorder %v11434_v1, %v2665_v19  ;;  %v11818_v19 = vstv %s2994_s15 }
 0xd19   : > { %v2376_v4 = vmul.f32 %v2373_v45, %v2355_v30  ;;  %v2635_v57 = vmul.f32 2.0, %v2355_v30  ;;  %9611 = vmatprep.mubr.msk.f32.mxu0 %vm270_vm0, %v2380_v51  ;;  %vm2666_vm8 = vcmp.eq.s32.totalorder %v11434_v1, %v2664_v17 }
 0xd1a   : > { %9612 = vmatmul.mubr.msk.f32.vlgmr.msra.gmra.mrb[44].mxu0 %vm270_vm0, %v2381_v24  ;;  %v11691_v59 = vadd.f32 %v2636_v53, %v2630_v54  ;;  %v2383_v16 = vadd.f32 %v2377_v3, %v11481_v33  ;;  %vm10409_vm10 = vmpackc.low %vm2667_vm9, %vm2666_vm8  ;;  %v2651_v24 = vstv %s2620_s13  ;;  %s12875_s13 = sld [smem:[#allocation2 + $0x6]] }
 0xd1b   : > { %v2382_v5 = vadd.f32 %v2376_v4, %v11478_v43  ;;  %10416 = vmatpush3.bf16.msra.mxu0 %v11160_v2  ;;  %v11695_v34 = vadd.f32 %v2635_v57, %v2629_v55  ;;  %10410 = vmatprep.subr.msk.bf16.mxu1 %vm10409_vm10, %v11096_v8 }
 0xd1c   : > { %10418 = vmatprep.subr.bf16.mxu0 %v11213_v52 }
 0xd1d   : > { %9614 = vmatprep.mubr.msk.f32.mxu0 %vm270_vm0, %v2382_v5 }
 0xd1e   : > { %9615 = vmatmul.mubr.msk.f32.gmra.mrb[46].mxu0 %vm270_vm0, %v2383_v16 }
 0xdeb   : > { %v9606_v9 = vpop.f32.mrb[44].mxu1 }
 0xdec   : > { %v2370_v28 = vadd.f32 %v9606_v9, %v11261_v14  ;;  %v2364_v6 = vpop.f32.mrb[45].mxu1 }
 0xded   : > { %v2365_v15 = vadd.f32 %v11707_v11, %v2364_v6  ;;  %v9613_v20 = vpop.f32.mrb[44].mxu0 }
 0xdee   : > { %v2379_v22 = vmul.f32 %v2373_v45, %v2370_v28  ;;  %v2638_v12 = vmul.f32 2.0, %v2370_v28  ;;  %v2476_v14 = vadd.f32 %v11714_v26, %v9613_v20  ;;  %v2470_v46 = vpop.f32.mrb[45].mxu0 }
 0xdef   : > { %v2378_v13 = vmul.f32 %v2373_v45, %v2365_v15  ;;  %v2637_v10 = vmul.f32 2.0, %v2365_v15  ;;  %v2471_v47 = vadd.f32 %v11714_v26, %v2470_v46 }
 0xdf0   : > { %v11719_v18 = vadd.f32 %v2638_v12, %v2632_v21  ;;  %v2385_v31 = vadd.f32 %v2379_v22, %v11527_v62 }
 0xdf1   : > { %v2384_v44 = vadd.f32 %v2378_v13, %v11530_v0  ;;  %10808 = vtanh.f32 %v2471_v47  ;;  %v9616_v29 = vpop.f32.mrb[46].mxu0  ;;  %v11722_v60 = vadd.f32 %v2637_v10, %v2631_v23 }
 0xdf2   : > { %10810 = vtanh.f32 %v2476_v14  ;;  %v2486_v32 = vadd.f32 %v11714_v26, %v9616_v29  ;;  %v2480_v27 = vpop.f32.mrb[47].mxu0 }
 0xdf3   : > { %v2481_v48 = vadd.f32 %v11714_v26, %v2480_v27  ;;  %9617 = vmatprep.mubr.msk.f32.mxu0 %vm270_vm0, %v2384_v44 }
 0xdf4   : > { %9618 = vmatmul.mubr.msk.f32.gmra.mrb[48].mxu0 %vm270_vm0, %v2385_v31 }
 0xdf5   : > { %10812 = vtanh.f32 %v2481_v48 }
 0xdf6   : > { %10814 = vtanh.f32 %v2486_v32 }
 0xdfb   : > { %v10809_v45 = vpop.eup %10808 }
 0xdfc   : > { %v10811_v58 = vpop.eup %10810  ;;  %9628 = vmatprep.mubr.msk.f32.mxu1 %vm345_vm1, %v10809_v45 }
 0xdfd   : > { %9629 = vmatmul.mubr.msk.f32.vlgmr.msra.gmra.mrb[46].mxu1 %vm345_vm1, %v10811_v58 }
 0xdfe   : > { %10412 = vmatpush3.bf16.msk.msra.mxu1 %vm10409_vm10, %v11096_v8 }
 0xdff   : > { %v10813_v36 = vpop.eup %10812  ;;  %10426 = vmatprep.subr.bf16.mxu1 %v11160_v2 }
 0xe00   : > { %v10815_v38 = vpop.eup %10814  ;;  %9631 = vmatprep.mubr.msk.f32.mxu1 %vm345_vm1, %v10813_v36 }
 0xe01   : > { %9632 = vmatmul.mubr.msk.f32.gmra.mrb[48].mxu1 %vm345_vm1, %v10815_v38 }
 0xec7   : > { %v9619_v39 = vpop.f32.mrb[48].mxu0 }
 0xec8   : > { %v2496_v41 = vadd.f32 %v11714_v26, %v9619_v39  ;;  %v2490_v25 = vpop.f32.mrb[49].mxu0 }
 0xec9   : > { %v2491_v49 = vadd.f32 %v11714_v26, %v2490_v25 }
 0xecb   : > { %10816 = vtanh.f32 %v2491_v49 }
 0xecc   : > { %10818 = vtanh.f32 %v2496_v41 }
 0xed0   : > { %v9630_v51 = vpop.f32.mrb[46].mxu1 }
 0xed1   : > { %v2595_v30 = vadd.f32 %v11707_v11, %v9630_v51  ;;  %v2589_v54 = vpop.f32.mrb[47].mxu1 }
 0xed2   : > { %v2590_v3 = vadd.f32 %v11707_v11, %v2589_v54 }
 0xed3   : > { %v2646_v53 = vadd.f32 %v11678_v35, %v2595_v30 }
 0xed4   : > { %v2645_v55 = vadd.f32 %v11683_v50, %v2590_v3  ;;  %v9633_v4 = vpop.f32.mrb[48].mxu1 }
 0xed5   : > { %v10817_v57 = vpop.eup %10816  ;;  %v2653_v5 = vmul.f32 %v2651_v24, %v2646_v53  ;;  %v2605_v16 = vadd.f32 %v11707_v11, %v9633_v4  ;;  %v2599_v37 = vpop.f32.mrb[49].mxu1 }
 0xed6   : > { %v10819_v7 = vpop.eup %10818  ;;  %v2652_v9 = vmul.f32 %v2651_v24, %v2645_v55  ;;  %v2600_v28 = vadd.f32 %v11707_v11, %v2599_v37  ;;  %9634 = vmatprep.mubr.msk.f32.mxu1 %vm345_vm1, %v10817_v57 }
 0xed7   : > { %v2648_v6 = vadd.f32 %v11691_v59, %v2605_v16  ;;  %9635 = vmatmul.mubr.msk.f32.gmra.mrb[50].mxu1 %vm345_vm1, %v10819_v7  ;;  %v11757_v15 = vadd.f32 %v2653_v5, %v11471_v42 }
 0xed8   : > { %v11753_v35 = vadd.f32 %v2652_v9, %v11467_v40  ;;  %v2647_v50 = vadd.f32 %v11695_v34, %v2600_v28 }
 0xed9   : > { %v2655_v20 = vmul.f32 %v2651_v24, %v2648_v6 }
 0xeda   : > { %v2654_v21 = vmul.f32 %v2651_v24, %v2647_v50  ;;  %9641 = vmatprep.mubr.msk.f32.mxu1 %vm270_vm0, %v11753_v35  ;;  %9651 = vmatprep.mubr.msk.f32.mxu0 %vm270_vm0, %v11753_v35 }
 0xedb   : > { %9642 = vmatmul.mubr.msk.f32.vlgmr.msra.gmra.mrb[24].mxu1 %vm270_vm0, %v11757_v15  ;;  %9652 = vmatmul.mubr.msk.f32.vlgmr.msra.gmra.mrb[50].mxu0 %vm270_vm0, %v11757_v15  ;;  %v11773_v42 = vadd.f32 %v2655_v20, %v11481_v33 }
 0xedc   : > { %v11768_v40 = vadd.f32 %v2654_v21, %v11478_v43  ;;  %10420 = vmatpush3.bf16.msra.mxu0 %v11213_v52  ;;  %10428 = vmatpush3.bf16.msra.mxu1 %v11160_v2 }
 0xedd   : > { %10422 = vmatprep.subr.bf16.mxu0 %v11223_v56  ;;  %10438 = vmatprep.subr.bf16.mxu1 %v11160_v2 }
 0xede   : > { %9644 = vmatprep.mubr.msk.f32.mxu1 %vm270_vm0, %v11768_v40  ;;  %9654 = vmatprep.mubr.msk.f32.mxu0 %vm270_vm0, %v11768_v40 }
 0xedf   : > { %9645 = vmatmul.mubr.msk.f32.gmra.mrb[26].mxu1 %vm270_vm0, %v11773_v42  ;;  %9655 = vmatmul.mubr.msk.f32.gmra.mrb[52].mxu0 %vm270_vm0, %v11773_v42 }
 0xee0   : > { %10424 = vmatpush3.bf16.msra.mxu0 %v11223_v56 }
 0xee1   : > { %10430 = vmatprep.subr.bf16.mxu0 %v11213_v52 }
 0xfaa   : > { %v9636_v43 = vpop.f32.mrb[50].mxu1 }
 0xfab   : > { %v2615_v33 = vadd.f32 %v11707_v11, %v9636_v43  ;;  %v2609_v59 = vpop.f32.mrb[51].mxu1 }
 0xfac   : > { %v2610_v34 = vadd.f32 %v11707_v11, %v2609_v59 }
 0xfad   : > { %v2650_v22 = vadd.f32 %v11719_v18, %v2615_v33 }
 0xfae   : > { %v2649_v12 = vadd.f32 %v11722_v60, %v2610_v34  ;;  %v9653_v14 = vpop.f32.mrb[50].mxu0 }
 0xfaf   : > { %v2657_v46 = vmul.f32 %v2651_v24, %v2650_v22  ;;  %v2852_v23 = vadd.f32 %v11714_v26, %v9653_v14  ;;  %v2846_v13 = vpop.f32.mrb[51].mxu0 }
 0xfb0   : > { %v2656_v10 = vmul.f32 %v2651_v24, %v2649_v12  ;;  %v2847_v47 = vadd.f32 %v11714_v26, %v2846_v13 }
 0xfb1   : > { %v11797_v31 = vadd.f32 %v2657_v46, %v11527_v62 }
 0xfb2   : > { %v11794_v44 = vadd.f32 %v2656_v10, %v11530_v0  ;;  %10820 = vtanh.f32 %v2847_v47  ;;  %v9656_v29 = vpop.f32.mrb[52].mxu0 }
 0xfb3   : > { %10822 = vtanh.f32 %v2852_v23  ;;  %v2862_v18 = vadd.f32 %v11714_v26, %v9656_v29  ;;  %v2856_v60 = vpop.f32.mrb[53].mxu0 }
 0xfb4   : > { %v2857_v32 = vadd.f32 %v11714_v26, %v2856_v60  ;;  %9657 = vmatprep.mubr.msk.f32.mxu0 %vm270_vm0, %v11794_v44 }
 0xfb5   : > { %9658 = vmatmul.mubr.msk.f32.gmra.mrb[54].mxu0 %vm270_vm0, %v11797_v31 }
 0xfb6   : > { %10824 = vtanh.f32 %v2857_v32 }
 0xfb7   : > { %10826 = vtanh.f32 %v2862_v18 }
 0xfbc   : > { %v10821_v0 = vpop.eup %10820 }
 0xfbd   : > { %v10823_v27 = vpop.eup %10822  ;;  %9668 = vmatprep.mubr.msk.f32.mxu0 %vm345_vm1, %v10821_v0 }
 0xfbe   : > { %9669 = vmatmul.mubr.msk.f32.vlgmr.msra.gmra.mrb[56].mxu0 %vm345_vm1, %v10823_v27 }
 0xfbf   : > { %10432 = vmatpush3.bf16.msra.mxu0 %v11213_v52 }
 0xfc0   : > { %v10825_v62 = vpop.eup %10824  ;;  %10434 = vmatprep.subr.bf16.mxu0 %v11223_v56 }
 0xfc1   : > { %v10827_v48 = vpop.eup %10826  ;;  %9671 = vmatprep.mubr.msk.f32.mxu0 %vm345_vm1, %v10825_v62 }
 0xfc2   : > { %9672 = vmatmul.mubr.msk.f32.gmra.mrb[58].mxu0 %vm345_vm1, %v10827_v48 }
 0xfc3   : > { %10436 = vmatpush3.bf16.msra.mxu0 %v11223_v56 }
 0xfc4   : > { %10442 = vmatprep.subr.bf16.mxu0 %v11213_v52 }
0x1088   : > { %v9659_v45 = vpop.f32.mrb[54].mxu0 }
0x1089   : > { %v2872_v58 = vadd.f32 %v11714_v26, %v9659_v45  ;;  %v2866_v36 = vpop.f32.mrb[55].mxu0 }
0x108a   : > { %v2867_v38 = vadd.f32 %v11714_v26, %v2866_v36 }
0x108c   : > { %10828 = vtanh.f32 %v2867_v38 }
0x108d   : > { %10830 = vtanh.f32 %v2872_v58 }
0x1091   : > { %v9670_v17 = vpop.f32.mrb[56].mxu0 }
0x1092   : > { %v11821_v39 = vadd.f32 %v11707_v11, %v9670_v17  ;;  %v2965_v41 = vpop.f32.mrb[57].mxu0 }
0x1093   : > { %v11824_v25 = vadd.f32 %v11707_v11, %v2965_v41 }
0x1094   : > { %v2997_v49 = vmul.f32 %v11818_v19, %v11821_v39 }
0x1095   : > { %v2996_v51 = vmul.f32 %v11818_v19, %v11824_v25  ;;  %v9673_v30 = vpop.f32.mrb[58].mxu0 }
0x1096   : > { %v10829_v54 = vpop.eup %10828  ;;  %v11831_v24 = vadd.f32 %v11707_v11, %v9673_v30  ;;  %v2975_v3 = vpop.f32.mrb[59].mxu0  ;;  %v3003_v57 = vadd.f32 %v2997_v49, %v11757_v15 }
0x1097   : > { %v10831_v53 = vpop.eup %10830  ;;  %v3002_v55 = vadd.f32 %v2996_v51, %v11753_v35  ;;  %v11835_v4 = vadd.f32 %v11707_v11, %v2975_v3  ;;  %9674 = vmatprep.mubr.msk.f32.mxu0 %vm345_vm1, %v10829_v54 }
0x1098   : > { %v2999_v5 = vmul.f32 %v11818_v19, %v11831_v24  ;;  %9675 = vmatmul.mubr.msk.f32.gmra.mrb[60].mxu0 %vm345_vm1, %v10831_v53 }
0x1099   : > { %v2998_v16 = vmul.f32 %v11818_v19, %v11835_v4  ;;  %9681 = vmatprep.mubr.msk.f32.mxu1 %vm270_vm0, %v3002_v55 }
0x109a   : > { %9682 = vmatmul.mubr.msk.f32.vlgmr.msra.gmra.mrb[52].mxu1 %vm270_vm0, %v3003_v57  ;;  %v3005_v7 = vadd.f32 %v2999_v5, %v11773_v42 }
0x109b   : > { %v3004_v37 = vadd.f32 %v2998_v16, %v11768_v40  ;;  %10440 = vmatpush3.bf16.msra.mxu1 %v11160_v2 }
0x109c   : > { %10450 = vmatprep.subr.bf16.mxu1 %v11160_v2 }
0x109d   : > { %9684 = vmatprep.mubr.msk.f32.mxu1 %vm270_vm0, %v3004_v37 }
0x109e   : > { %9685 = vmatmul.mubr.msk.f32.gmra.mrb[54].mxu1 %vm270_vm0, %v3005_v7 }
0x116b   : > { %v9676_v9 = vpop.f32.mrb[60].mxu0 }
0x116c   : > { %v11853_v28 = vadd.f32 %v11707_v11, %v9676_v9  ;;  %v2985_v6 = vpop.f32.mrb[61].mxu0 }
0x116d   : > { %v11856_v50 = vadd.f32 %v11707_v11, %v2985_v6  ;;  %v9683_v20 = vpop.f32.mrb[52].mxu1 }
0x116e   : > { %v3001_v21 = vmul.f32 %v11818_v19, %v11853_v28  ;;  %v3098_v43 = vadd.f32 %v11714_v26, %v9683_v20  ;;  %v3092_v33 = vpop.f32.mrb[53].mxu1 }
0x116f   : > { %v3000_v59 = vmul.f32 %v11818_v19, %v11856_v50  ;;  %v3093_v34 = vadd.f32 %v11714_v26, %v3092_v33 }
0x1170   : > { %v3007_v14 = vadd.f32 %v3001_v21, %v11797_v31 }
0x1171   : > { %v3006_v22 = vadd.f32 %v3000_v59, %v11794_v44  ;;  %10832 = vtanh.f32 %v3093_v34  ;;  %v9686_v12 = vpop.f32.mrb[54].mxu1 }
0x1172   : > { %10834 = vtanh.f32 %v3098_v43  ;;  %v3108_v46 = vadd.f32 %v11714_v26, %v9686_v12  ;;  %v3102_v23 = vpop.f32.mrb[55].mxu1 }
0x1173   : > { %v3103_v13 = vadd.f32 %v11714_v26, %v3102_v23  ;;  %9687 = vmatprep.mubr.msk.f32.mxu1 %vm270_vm0, %v3006_v22 }
0x1174   : > { %9688 = vmatmul.mubr.msk.f32.gmra.mrb[56].mxu1 %vm270_vm0, %v3007_v14 }
0x1175   : > { %10836 = vtanh.f32 %v3103_v13 }
0x1176   : > { %10838 = vtanh.f32 %v3108_v46 }
0x117b   : > { %v10833_v10 = vpop.eup %10832 }
0x117c   : > { %v10835_v47 = vpop.eup %10834  ;;  %9698 = vmatprep.mubr.msk.f32.mxu0 %vm345_vm1, %v10833_v10 }
0x117d   : > { %9699 = vmatmul.mubr.msk.f32.vlgmr.msra.gmra.mrb[62].mxu0 %vm345_vm1, %v10835_v47 }
0x117e   : > { %10444 = vmatpush3.bf16.msra.mxu0 %v11213_v52 }
0x117f   : > { %v10837_v29 = vpop.eup %10836  ;;  %10446 = vmatprep.subr.bf16.mxu0 %v11223_v56 }
0x1180   : > { %v10839_v18 = vpop.eup %10838  ;;  %9701 = vmatprep.mubr.msk.f32.mxu0 %vm345_vm1, %v10837_v29 }
0x1181   : > { %9702 = vmatmul.mubr.msk.f32.gmra.mrb[64].mxu0 %vm345_vm1, %v10839_v18 }
0x1182   : > { %10448 = vmatpush3.bf16.msra.mxu0 %v11223_v56 }
0x1183   : > { %10454 = vmatprep.subr.bf16.mxu0 %v11213_v52 }
0x1247   : > { %v9689_v60 = vpop.f32.mrb[56].mxu1 }
0x1248   : > { %v3118_v32 = vadd.f32 %v11714_v26, %v9689_v60  ;;  %v3112_v0 = vpop.f32.mrb[57].mxu1 }
0x1249   : > { %v3113_v27 = vadd.f32 %v11714_v26, %v3112_v0 }
0x124b   : > { %10840 = vtanh.f32 %v3113_v27 }
0x124c   : > { %10842 = vtanh.f32 %v3118_v32 }
0x1250   : > { %v9700_v62 = vpop.f32.mrb[62].mxu0 }
0x1251   : > { %v11881_v48 = vadd.f32 %v11707_v11, %v9700_v62  ;;  %v3211_v45 = vpop.f32.mrb[63].mxu0 }
0x1252   : > { %v3212_v58 = vadd.f32 %v11707_v11, %v3211_v45 }
0x1253   : > { %v3241_v36 = vmul.f32 %v11881_v48, %v11818_v19  ;;  %v3733_v27 = vmul.f32 2.0, %v11881_v48 }
0x1254   : > { %v3240_v38 = vmul.f32 %v3212_v58, %v11818_v19  ;;  %v9703_v17 = vpop.f32.mrb[64].mxu0  ;;  %v3732_v62 = vmul.f32 2.0, %v3212_v58 }
0x1255   : > { %v10841_v41 = vpop.eup %10840  ;;  %v11888_v49 = vadd.f32 %v11707_v11, %v9703_v17  ;;  %v3221_v51 = vpop.f32.mrb[65].mxu0  ;;  %v3247_v53 = vadd.f32 %v3241_v36, %v11757_v15  ;;  %v3484_v36 = vstv %s11813_s14  ;;  %s7438_s14 = smul.f32 0.5, %s12875_s13 }
0x1256   : > { %v10843_v30 = vpop.eup %10842  ;;  %v3246_v54 = vadd.f32 %v3240_v38, %v11753_v35  ;;  %v11892_v3 = vadd.f32 %v11707_v11, %v3221_v51  ;;  %9704 = vmatprep.mubr.msk.f32.mxu0 %vm345_vm1, %v10841_v41  ;;  %v3739_v51 = vadd.f32 %v3733_v27, %v11821_v39 }
0x1257   : > { %v3243_v55 = vmul.f32 %v11888_v49, %v11818_v19  ;;  %9705 = vmatmul.mubr.msk.f32.gmra.mrb[66].mxu0 %vm345_vm1, %v10843_v30  ;;  %v3735_v30 = vmul.f32 2.0, %v11888_v49 }
0x1258   : > { %v3242_v57 = vmul.f32 %v11892_v3, %v11818_v19  ;;  %9711 = vmatprep.mubr.msk.f32.mxu1 %vm270_vm0, %v3246_v54 }
0x1259   : > { %9712 = vmatmul.mubr.msk.f32.vlgmr.msra.gmra.mrb[58].mxu1 %vm270_vm0, %v3247_v53  ;;  %v3249_v16 = vadd.f32 %v3243_v55, %v11773_v42  ;;  %v3738_v55 = vadd.f32 %v3732_v62, %v11824_v25  ;;  %v3741_v25 = vadd.f32 %v3735_v30, %v11831_v24 }
0x125a   : > { %v3248_v5 = vadd.f32 %v3242_v57, %v11768_v40  ;;  %10452 = vmatpush3.bf16.msra.mxu1 %v11160_v2  ;;  %v3734_v57 = vmul.f32 2.0, %v11892_v3 }
0x125c   : > { %9714 = vmatprep.mubr.msk.f32.mxu1 %vm270_vm0, %v3248_v5 }
0x125d   : > { %9715 = vmatmul.mubr.msk.f32.gmra.mrb[60].mxu1 %vm270_vm0, %v3249_v16 }
0x132a   : > { %v9706_v37 = vpop.f32.mrb[66].mxu0 }
0x132b   : > { %v11909_v7 = vadd.f32 %v11707_v11, %v9706_v37  ;;  %v3231_v9 = vpop.f32.mrb[67].mxu0 }
0x132c   : > { %v11912_v6 = vadd.f32 %v11707_v11, %v3231_v9  ;;  %v9713_v20 = vpop.f32.mrb[58].mxu1 }
0x132d   : > { %v3245_v21 = vmul.f32 %v11909_v7, %v11818_v19  ;;  %v3342_v43 = vadd.f32 %v11714_v26, %v9713_v20  ;;  %v3336_v33 = vpop.f32.mrb[59].mxu1 }
0x132e   : > { %v3244_v59 = vmul.f32 %v11912_v6, %v11818_v19  ;;  %v3337_v34 = vadd.f32 %v11714_v26, %v3336_v33 }
0x132f   : > { %v3251_v14 = vadd.f32 %v3245_v21, %v11797_v31 }
0x1330   : > { %v3250_v22 = vadd.f32 %v3244_v59, %v11794_v44  ;;  %10844 = vtanh.f32 %v3337_v34  ;;  %v9716_v12 = vpop.f32.mrb[60].mxu1  ;;  %v3740_v34 = vadd.f32 %v3734_v57, %v11835_v4  ;;  %v3737_v4 = vmul.f32 2.0, %v11909_v7 }
0x1331   : > { %10846 = vtanh.f32 %v3342_v43  ;;  %v3352_v46 = vadd.f32 %v11714_v26, %v9716_v12  ;;  %v3346_v23 = vpop.f32.mrb[61].mxu1 }
0x1332   : > { %v3347_v13 = vadd.f32 %v11714_v26, %v3346_v23  ;;  %9717 = vmatprep.mubr.msk.f32.mxu1 %vm270_vm0, %v3250_v22 }
0x1333   : > { %9718 = vmatmul.mubr.msk.f32.gmra.mrb[62].mxu1 %vm270_vm0, %v3251_v14 }
0x1334   : > { %10848 = vtanh.f32 %v3347_v13  ;;  %v3736_v13 = vmul.f32 2.0, %v11912_v6 }
0x1335   : > { %10850 = vtanh.f32 %v3352_v46 }
0x133a   : > { %v10845_v19 = vpop.eup %10844 }
0x133b   : > { %v10847_v10 = vpop.eup %10846  ;;  %9728 = vmatprep.mubr.msk.f32.mxu0 %vm345_vm1, %v10845_v19 }
0x133c   : > { %9729 = vmatmul.mubr.msk.f32.vlgmr.msra.gmra.mrb[68].mxu0 %vm345_vm1, %v10847_v10 }
0x133d   : > { %10456 = vmatpush3.bf16.msra.mxu0 %v11213_v52 }
0x133e   : > { %v10849_v47 = vpop.eup %10848  ;;  %10458 = vmatprep.subr.bf16.mxu0 %v11223_v56 }
0x133f   : > { %v10851_v29 = vpop.eup %10850  ;;  %9731 = vmatprep.mubr.msk.f32.mxu0 %vm345_vm1, %v10849_v47 }
0x1340   : > { %9732 = vmatmul.mubr.msk.f32.gmra.mrb[70].mxu0 %vm345_vm1, %v10851_v29 }
0x1341   : > { %10460 = vmatpush3.bf16.msra.mxu0 %v11223_v56 }
0x1342   : > { %10470 = vmatprep.subr.bf16.mxu0 %v11213_v52 }
0x1406   : > { %v9719_v18 = vpop.f32.mrb[62].mxu1 }
0x1407   : > { %v3362_v60 = vadd.f32 %v11714_v26, %v9719_v18  ;;  %v3356_v32 = vpop.f32.mrb[63].mxu1 }
0x1408   : > { %v3357_v0 = vadd.f32 %v11714_v26, %v3356_v32 }
0x140a   : > { %10852 = vtanh.f32 %v3357_v0 }
0x140b   : > { %10854 = vtanh.f32 %v3362_v60  ;;  %v3743_v60 = vadd.f32 %v3737_v4, %v11853_v28 }
0x140f   : > { %v9730_v45 = vpop.f32.mrb[68].mxu0 }
0x1410   : > { %v3461_v38 = vadd.f32 %v11707_v11, %v9730_v45  ;;  %v3455_v17 = vpop.f32.mrb[69].mxu0  ;;  %v3742_v45 = vadd.f32 %v3736_v13, %v11856_v50 }
0x1411   : > { %v3456_v41 = vadd.f32 %v11707_v11, %v3455_v17 }
0x1412   : > { %v3486_v54 = vmul.f32 %v3484_v36, %v3461_v38  ;;  %v3745_v53 = vmul.f32 2.0, %v3461_v38 }
0x1413   : > { %v3485_v5 = vmul.f32 %v3484_v36, %v3456_v41  ;;  %v3744_v48 = vmul.f32 2.0, %v3456_v41  ;;  %v9733_v58 = vpop.f32.mrb[70].mxu0 }
0x1414   : > { %v10853_v16 = vpop.eup %10852  ;;  %v3471_v37 = vadd.f32 %v11707_v11, %v9733_v58  ;;  %v3465_v9 = vpop.f32.mrb[71].mxu0  ;;  %v11945_v20 = vadd.f32 %v3745_v53, %v3739_v51  ;;  %v3492_v3 = vadd.f32 %v3486_v54, %v11757_v15  ;;  %v3776_v58 = vadd.s32 48, %v11432_v63 }
0x1415   : > { %v10855_v21 = vpop.eup %10854  ;;  %v3491_v39 = vadd.f32 %v3485_v5, %v11753_v35  ;;  %v3466_v49 = vadd.f32 %v11707_v11, %v3465_v9  ;;  %9734 = vmatprep.mubr.msk.f32.mxu0 %vm345_vm1, %v10853_v16  ;;  %v11950_v43 = vadd.f32 %v3744_v48, %v3738_v55  ;;  %v3775_v48 = vadd.s32 48, %v11429_v61 }
0x1416   : > { %v3488_v33 = vmul.f32 %v3484_v36, %v3471_v37  ;;  %v3747_v59 = vmul.f32 2.0, %v3471_v37  ;;  %9735 = vmatmul.mubr.msk.f32.gmra.mrb[72].mxu0 %vm345_vm1, %v10855_v21  ;;  %vm3778_vm12 = vcmp.eq.s32.totalorder %v11434_v1, %v3776_v58 }
0x1417   : > { %v3487_v22 = vmul.f32 %v3484_v36, %v3466_v49  ;;  %v3746_v12 = vmul.f32 2.0, %v3466_v49  ;;  %9741 = vmatprep.mubr.msk.f32.mxu1 %vm270_vm0, %v3491_v39  ;;  %vm3777_vm11 = vcmp.eq.s32.totalorder %v11434_v1, %v3775_v48 }
0x1418   : > { %9742 = vmatmul.mubr.msk.f32.vlgmr.msra.gmra.mrb[64].mxu1 %vm270_vm0, %v3492_v3  ;;  %v11958_v14 = vadd.f32 %v3747_v59, %v3741_v25  ;;  %v3494_v24 = vadd.f32 %v3488_v33, %v11773_v42  ;;  %vm10461_vm13 = vmpackc.low %vm3778_vm12, %vm3777_vm11  ;;  %v3762_v3 = vstv %s3731_s16 }
0x1419   : > { %v3493_v46 = vadd.f32 %v3487_v22, %v11768_v40  ;;  %v11961_v23 = vadd.f32 %v3746_v12, %v3740_v34  ;;  %10462 = vmatprep.subr.msk.bf16.mxu1 %vm10461_vm13, %v11096_v8 }
0x141a   : > { %10464 = vmatpush3.bf16.msk.msra.mxu1 %vm10461_vm13, %v11096_v8 }
0x141b   : > { %9744 = vmatprep.mubr.msk.f32.mxu1 %vm270_vm0, %v3493_v46  ;;  %10466 = vmatprep.subr.bf16.mxu1 %v11160_v2 }
0x141c   : > { %9745 = vmatmul.mubr.msk.f32.gmra.mrb[66].mxu1 %vm270_vm0, %v3494_v24 }
0x14e9   : > { %v9736_v19 = vpop.f32.mrb[72].mxu0 }
0x14ea   : > { %v3481_v10 = vadd.f32 %v11707_v11, %v9736_v19  ;;  %v3475_v47 = vpop.f32.mrb[73].mxu0 }
0x14eb   : > { %v3476_v29 = vadd.f32 %v11707_v11, %v3475_v47  ;;  %v9743_v18 = vpop.f32.mrb[64].mxu1 }
0x14ec   : > { %v3490_v32 = vmul.f32 %v3484_v36, %v3481_v10  ;;  %v3749_v0 = vmul.f32 2.0, %v3481_v10  ;;  %v3587_v27 = vadd.f32 %v11714_v26, %v9743_v18  ;;  %v3581_v62 = vpop.f32.mrb[65].mxu1 }
0x14ed   : > { %v3489_v38 = vmul.f32 %v3484_v36, %v3476_v29  ;;  %v3748_v7 = vmul.f32 2.0, %v3476_v29  ;;  %v3582_v6 = vadd.f32 %v11714_v26, %v3581_v62 }
0x14ee   : > { %v11974_v17 = vadd.f32 %v3749_v0, %v3743_v60  ;;  %v3496_v28 = vadd.f32 %v3490_v32, %v11797_v31 }
0x14ef   : > { %v3495_v41 = vadd.f32 %v3489_v38, %v11794_v44  ;;  %10856 = vtanh.f32 %v3582_v6  ;;  %v9746_v51 = vpop.f32.mrb[66].mxu1  ;;  %v11977_v30 = vadd.f32 %v3748_v7, %v3742_v45 }
0x14f0   : > { %10858 = vtanh.f32 %v3587_v27  ;;  %v3597_v54 = vadd.f32 %v11714_v26, %v9746_v51  ;;  %v3591_v53 = vpop.f32.mrb[67].mxu1 }
0x14f1   : > { %v3592_v50 = vadd.f32 %v11714_v26, %v3591_v53  ;;  %9747 = vmatprep.mubr.msk.f32.mxu1 %vm270_vm0, %v3495_v41 }
0x14f2   : > { %9748 = vmatmul.mubr.msk.f32.gmra.mrb[68].mxu1 %vm270_vm0, %v3496_v28 }
0x14f3   : > { %10860 = vtanh.f32 %v3592_v50 }
0x14f4   : > { %10862 = vtanh.f32 %v3597_v54 }
0x14f9   : > { %v10857_v36 = vpop.eup %10856 }
0x14fa   : > { %v10859_v55 = vpop.eup %10858  ;;  %9758 = vmatprep.mubr.msk.f32.mxu0 %vm345_vm1, %v10857_v36 }
0x14fb   : > { %9759 = vmatmul.mubr.msk.f32.vlgmr.msra.gmra.mrb[74].mxu0 %vm345_vm1, %v10859_v55 }
0x14fc   : > { %10472 = vmatpush3.bf16.msra.mxu0 %v11213_v52 }
0x14fd   : > { %v10861_v57 = vpop.eup %10860  ;;  %10474 = vmatprep.subr.bf16.mxu0 %v11223_v56 }
0x14fe   : > { %v10863_v5 = vpop.eup %10862  ;;  %9761 = vmatprep.mubr.msk.f32.mxu0 %vm345_vm1, %v10861_v57 }
0x14ff   : > { %9762 = vmatmul.mubr.msk.f32.gmra.mrb[76].mxu0 %vm345_vm1, %v10863_v5 }
0x1500   : > { %10476 = vmatpush3.bf16.msra.mxu0 %v11223_v56 }
0x1501   : > { %10482 = vmatprep.subr.bf16.mxu0 %v11213_v52 }
0x15c5   : > { %v9749_v16 = vpop.f32.mrb[68].mxu1 }
0x15c6   : > { %v3607_v37 = vadd.f32 %v11714_v26, %v9749_v16  ;;  %v3601_v9 = vpop.f32.mrb[69].mxu1 }
0x15c7   : > { %v3602_v21 = vadd.f32 %v11714_v26, %v3601_v9 }
0x15c9   : > { %10864 = vtanh.f32 %v3602_v21 }
0x15ca   : > { %10866 = vtanh.f32 %v3607_v37  ;;  %v12077_v37 = vstv %s4105_s18 }
0x15ce   : > { %v9760_v39 = vpop.f32.mrb[74].mxu0 }
0x15cf   : > { %v3706_v49 = vadd.f32 %v11707_v11, %v9760_v39  ;;  %v3700_v25 = vpop.f32.mrb[75].mxu0 }
0x15d0   : > { %v3701_v33 = vadd.f32 %v11707_v11, %v3700_v25 }
0x15d1   : > { %v3757_v59 = vadd.f32 %v11945_v20, %v3706_v49 }
0x15d2   : > { %v3756_v34 = vadd.f32 %v11950_v43, %v3701_v33  ;;  %v9763_v22 = vpop.f32.mrb[76].mxu0 }
0x15d3   : > { %v10865_v12 = vpop.eup %10864  ;;  %v3764_v46 = vmul.f32 %v3762_v3, %v3757_v59  ;;  %v3716_v24 = vadd.f32 %v11707_v11, %v9763_v22  ;;  %v3710_v4 = vpop.f32.mrb[77].mxu0 }
0x15d4   : > { %v10867_v13 = vpop.eup %10866  ;;  %v3763_v19 = vmul.f32 %v3762_v3, %v3756_v34  ;;  %v3711_v10 = vadd.f32 %v11707_v11, %v3710_v4  ;;  %9764 = vmatprep.mubr.msk.f32.mxu0 %vm345_vm1, %v10865_v12 }
0x15d5   : > { %v3759_v47 = vadd.f32 %v11958_v14, %v3716_v24  ;;  %9765 = vmatmul.mubr.msk.f32.gmra.mrb[78].mxu0 %vm345_vm1, %v10867_v13  ;;  %v12016_v29 = vadd.f32 %v3764_v46, %v11757_v15 }
0x15d6   : > { %v12012_v20 = vadd.f32 %v3763_v19, %v11753_v35  ;;  %v3758_v43 = vadd.f32 %v11961_v23, %v3711_v10 }
0x15d7   : > { %v3766_v18 = vmul.f32 %v3762_v3, %v3759_v47 }
0x15d8   : > { %v3765_v60 = vmul.f32 %v3762_v3, %v3758_v43  ;;  %9771 = vmatprep.mubr.msk.f32.mxu1 %vm270_vm0, %v12012_v20 }
0x15d9   : > { %9772 = vmatmul.mubr.msk.f32.vlgmr.msra.gmra.mrb[24].mxu1 %vm270_vm0, %v12016_v29  ;;  %v12027_v35 = vadd.f32 %v3766_v18, %v11773_v42 }
0x15da   : > { %v12023_v14 = vadd.f32 %v3765_v60, %v11768_v40  ;;  %10468 = vmatpush3.bf16.msra.mxu1 %v11160_v2 }
0x15db   : > { %10478 = vmatprep.subr.bf16.mxu1 %v11160_v2 }
0x15dc   : > { %9774 = vmatprep.mubr.msk.f32.mxu1 %vm270_vm0, %v12023_v14 }
0x15dd   : > { %9775 = vmatmul.mubr.msk.f32.gmra.mrb[26].mxu1 %vm270_vm0, %v12027_v35 }
0x15de   : > { %9781 = vmatprep.mubr.msk.f32.mxu1 %vm270_vm0, %v12012_v20 }
0x15e1   : > { %9782 = vmatmul.mubr.msk.f32.vlgmr.msra.gmra.mrb[70].mxu1 %vm270_vm0, %v12016_v29 }
0x15e2   : > { %9784 = vmatprep.mubr.msk.f32.mxu1 %vm270_vm0, %v12023_v14  ;;  %10480 = vmatpush3.bf16.msra.mxu1 %v11160_v2 }
0x15e3   : > { %10490 = vmatprep.subr.bf16.mxu1 %v11160_v2 }
0x15e5   : > { %9785 = vmatmul.mubr.msk.f32.gmra.mrb[72].mxu1 %vm270_vm0, %v12027_v35 }
0x16a8   : > { %v9766_v15 = vpop.f32.mrb[78].mxu0 }
0x16a9   : > { %v3726_v40 = vadd.f32 %v11707_v11, %v9766_v15  ;;  %v3720_v42 = vpop.f32.mrb[79].mxu0 }
0x16aa   : > { %v3721_v23 = vadd.f32 %v11707_v11, %v3720_v42 }
0x16ab   : > { %v3761_v32 = vadd.f32 %v11974_v17, %v3726_v40 }
0x16ac   : > { %v3760_v0 = vadd.f32 %v11977_v30, %v3721_v23 }
0x16ad   : > { %v3768_v27 = vmul.f32 %v3762_v3, %v3761_v32 }
0x16ae   : > { %v3767_v62 = vmul.f32 %v3762_v3, %v3760_v0 }
0x16af   : > { %v12052_v38 = vadd.f32 %v3768_v27, %v11797_v31 }
0x16b0   : > { %v12049_v45 = vadd.f32 %v3767_v62, %v11794_v44 }
0x16b2   : > { %9787 = vmatprep.mubr.msk.f32.mxu1 %vm270_vm0, %v12049_v45 }
0x16b3   : > { %9788 = vmatmul.mubr.msk.f32.gmra.mrb[74].mxu1 %vm270_vm0, %v12052_v38 }
0x16b4   : > { %v9783_v7 = vpop.f32.mrb[70].mxu1 }
0x16b5   : > { %v3963_v6 = vadd.f32 %v11714_v26, %v9783_v7  ;;  %v3957_v17 = vpop.f32.mrb[71].mxu1 }
0x16b6   : > { %v3958_v41 = vadd.f32 %v11714_v26, %v3957_v17 }
0x16b8   : > { %10868 = vtanh.f32 %v3958_v41  ;;  %v9786_v51 = vpop.f32.mrb[72].mxu1 }
0x16b9   : > { %10870 = vtanh.f32 %v3963_v6  ;;  %v3973_v44 = vadd.f32 %v11714_v26, %v9786_v51  ;;  %v3967_v30 = vpop.f32.mrb[73].mxu1 }
0x16ba   : > { %v3968_v31 = vadd.f32 %v11714_v26, %v3967_v30 }
0x16bc   : > { %10872 = vtanh.f32 %v3968_v31 }
0x16bd   : > { %10874 = vtanh.f32 %v3973_v44 }
0x16c2   : > { %v10869_v28 = vpop.eup %10868 }
0x16c3   : > { %v10871_v54 = vpop.eup %10870  ;;  %9798 = vmatprep.mubr.msk.f32.mxu0 %vm345_vm1, %v10869_v28 }
0x16c4   : > { %9799 = vmatmul.mubr.msk.f32.vlgmr.msra.gmra.mrb[80].mxu0 %vm345_vm1, %v10871_v54 }
0x16c5   : > { %10484 = vmatpush3.bf16.msra.mxu0 %v11213_v52 }
0x16c6   : > { %v10873_v53 = vpop.eup %10872  ;;  %10486 = vmatprep.subr.bf16.mxu0 %v11223_v56 }
0x16c7   : > { %v10875_v50 = vpop.eup %10874  ;;  %9801 = vmatprep.mubr.msk.f32.mxu0 %vm345_vm1, %v10873_v53 }
0x16c8   : > { %9802 = vmatmul.mubr.msk.f32.gmra.mrb[82].mxu0 %vm345_vm1, %v10875_v50 }
0x16c9   : > { %10488 = vmatpush3.bf16.msra.mxu0 %v11223_v56 }
0x16ca   : > { %10494 = vmatprep.subr.bf16.mxu0 %v11213_v52 }
0x1786   : > { %v9789_v36 = vpop.f32.mrb[74].mxu1 }
0x1787   : > { %v3983_v55 = vadd.f32 %v11714_v26, %v9789_v36  ;;  %v3977_v57 = vpop.f32.mrb[75].mxu1  ;;  %v12142_v36 = vld [vmem:[%s13067_s5] ss:$0 sm:$0xff] }
0x1788   : > { %v3978_v5 = vadd.f32 %v11714_v26, %v3977_v57 }
0x178a   : > { %10876 = vtanh.f32 %v3978_v5 }
0x178b   : > { %10878 = vtanh.f32 %v3983_v55 }
0x1794   : > { %v10877_v48 = vpop.eup %10876 }
0x1795   : > { %v10879_v58 = vpop.eup %10878  ;;  %9804 = vmatprep.mubr.msk.f32.mxu0 %vm345_vm1, %v10877_v48 }
0x1796   : > { %9805 = vmatmul.mubr.msk.f32.gmra.mrb[84].mxu0 %vm345_vm1, %v10879_v58 }
0x1797   : > { %v9800_v16 = vpop.f32.mrb[80].mxu0 }
0x1798   : > { %v12080_v9 = vadd.f32 %v11707_v11, %v9800_v16  ;;  %v4076_v21 = vpop.f32.mrb[81].mxu0 }
0x1799   : > { %v12083_v39 = vadd.f32 %v11707_v11, %v4076_v21 }
0x179a   : > { %v4108_v49 = vmul.f32 %v12077_v37, %v12080_v9 }
0x179b   : > { %v4107_v25 = vmul.f32 %v12077_v37, %v12083_v39  ;;  %v9803_v3 = vpop.f32.mrb[82].mxu0 }
0x179c   : > { %v12090_v33 = vadd.f32 %v11707_v11, %v9803_v3  ;;  %v4086_v59 = vpop.f32.mrb[83].mxu0  ;;  %v4114_v12 = vadd.f32 %v4108_v49, %v12016_v29 }
0x179d   : > { %v4113_v34 = vadd.f32 %v4107_v25, %v12012_v20  ;;  %v12094_v22 = vadd.f32 %v11707_v11, %v4086_v59 }
0x179e   : > { %v4110_v46 = vmul.f32 %v12077_v37, %v12090_v33 }
0x179f   : > { %v4109_v24 = vmul.f32 %v12077_v37, %v12094_v22  ;;  %9811 = vmatprep.mubr.msk.f32.mxu1 %vm270_vm0, %v4113_v34 }
0x17a0   : > { %9812 = vmatmul.mubr.msk.f32.vlgmr.msra.gmra.mrb[76].mxu1 %vm270_vm0, %v4114_v12  ;;  %v4116_v13 = vadd.f32 %v4110_v46, %v12027_v35 }
0x17a1   : > { %v4115_v4 = vadd.f32 %v4109_v24, %v12023_v14  ;;  %10492 = vmatpush3.bf16.msra.mxu1 %v11160_v2 }
0x17a2   : > { %10502 = vmatprep.subr.bf16.mxu1 %v11160_v2 }
0x17a3   : > { %9814 = vmatprep.mubr.msk.f32.mxu1 %vm270_vm0, %v4115_v4 }
0x17a4   : > { %9815 = vmatmul.mubr.msk.f32.gmra.mrb[78].mxu1 %vm270_vm0, %v4116_v13 }
0x1869   : > { %v9806_v19 = vpop.f32.mrb[84].mxu0 }
0x186a   : > { %v12110_v10 = vadd.f32 %v11707_v11, %v9806_v19  ;;  %v4096_v47 = vpop.f32.mrb[85].mxu0 }
0x186b   : > { %v12113_v43 = vadd.f32 %v11707_v11, %v4096_v47 }
0x186c   : > { %v4112_v18 = vmul.f32 %v12077_v37, %v12110_v10 }
0x186d   : > { %v4111_v60 = vmul.f32 %v12077_v37, %v12113_v43 }
0x186e   : > { %v4118_v40 = vadd.f32 %v4112_v18, %v12052_v38 }
0x186f   : > { %v4117_v15 = vadd.f32 %v4111_v60, %v12049_v45 }
0x1871   : > { %9817 = vmatprep.mubr.msk.f32.mxu1 %vm270_vm0, %v4117_v15 }
0x1872   : > { %9818 = vmatmul.mubr.msk.f32.gmra.mrb[80].mxu1 %vm270_vm0, %v4118_v40 }
0x1873   : > { %v9813_v42 = vpop.f32.mrb[76].mxu1 }
0x1874   : > { %v4209_v23 = vadd.f32 %v11714_v26, %v9813_v42  ;;  %v4203_v32 = vpop.f32.mrb[77].mxu1  ;;  %v12190_v42 = vld [vmem:[%s13065_s3] ss:$0 sm:$0xff] }
0x1875   : > { %v4204_v11 = vadd.f32 %v11714_v26, %v4203_v32 }
0x1877   : > { %10880 = vtanh.f32 %v4204_v11  ;;  %v9816_v0 = vpop.f32.mrb[78].mxu1 }
0x1878   : > { %10882 = vtanh.f32 %v4209_v23  ;;  %v4219_v27 = vadd.f32 %v11714_v26, %v9816_v0  ;;  %v4213_v62 = vpop.f32.mrb[79].mxu1 }
0x1879   : > { %v4214_v7 = vadd.f32 %v11714_v26, %v4213_v62 }
0x187b   : > { %10884 = vtanh.f32 %v4214_v7 }
0x187c   : > { %10886 = vtanh.f32 %v4219_v27 }
0x1881   : > { %v10881_v6 = vpop.eup %10880 }
0x1882   : > { %v10883_v17 = vpop.eup %10882  ;;  %9828 = vmatprep.mubr.msk.f32.mxu0 %vm345_vm1, %v10881_v6 }
0x1883   : > { %9829 = vmatmul.mubr.msk.f32.vlgmr.msra.gmra.mrb[86].mxu0 %vm345_vm1, %v10883_v17 }
0x1884   : > { %10496 = vmatpush3.bf16.msra.mxu0 %v11213_v52 }
0x1885   : > { %v10885_v41 = vpop.eup %10884  ;;  %10498 = vmatprep.subr.bf16.mxu0 %v11223_v56 }
0x1886   : > { %v10887_v51 = vpop.eup %10886  ;;  %9831 = vmatprep.mubr.msk.f32.mxu0 %vm345_vm1, %v10885_v41 }
0x1887   : > { %9832 = vmatmul.mubr.msk.f32.gmra.mrb[88].mxu0 %vm345_vm1, %v10887_v51 }
0x1888   : > { %10500 = vmatpush3.bf16.msra.mxu0 %v11223_v56 }
0x1889   : > { %10506 = vmatprep.subr.bf16.mxu0 %v11213_v52 }
0x1945   : > { %v9819_v44 = vpop.f32.mrb[80].mxu1 }
0x1946   : > { %v4229_v30 = vadd.f32 %v11714_v26, %v9819_v44  ;;  %v4223_v31 = vpop.f32.mrb[81].mxu1 }
0x1947   : > { %v4224_v28 = vadd.f32 %v11714_v26, %v4223_v31 }
0x1949   : > { %10888 = vtanh.f32 %v4224_v28 }
0x194a   : > { %10890 = vtanh.f32 %v4229_v30 }
0x1953   : > { %v10889_v54 = vpop.eup %10888 }
0x1954   : > { %v10891_v53 = vpop.eup %10890  ;;  %9834 = vmatprep.mubr.msk.f32.mxu0 %vm345_vm1, %v10889_v54 }
0x1955   : > { %9835 = vmatmul.mubr.msk.f32.gmra.mrb[90].mxu0 %vm345_vm1, %v10891_v53 }
0x1956   : > { %v9830_v50 = vpop.f32.mrb[86].mxu0 }
0x1957   : > { %v12145_v55 = vadd.f32 %v12142_v36, %v9830_v50  ;;  %v4322_v57 = vpop.f32.mrb[87].mxu0 }
0x1958   : > { %v12148_v26 = vadd.f32 %v12142_v36, %v4322_v57 }
0x1959   : > { %v4352_v5 = vmul.f32 %v12145_v55, %v12077_v37  ;;  %v4844_v53 = vmul.f32 2.0, %v12145_v55 }
0x195a   : > { %v4351_v48 = vmul.f32 %v12148_v26, %v12077_v37  ;;  %v9833_v58 = vpop.f32.mrb[88].mxu0  ;;  %v4843_v50 = vmul.f32 2.0, %v12148_v26 }
0x195b   : > { %v12155_v16 = vadd.f32 %v12142_v36, %v9833_v58  ;;  %v4332_v21 = vpop.f32.mrb[89].mxu0  ;;  %v4358_v3 = vadd.f32 %v4352_v5, %v12016_v29  ;;  %v4595_v5 = vstv %s12072_s17  ;;  %s8173_s17 = smul.f32 0.16666667, %s12875_s13 }
0x195c   : > { %v4357_v49 = vadd.f32 %v4351_v48, %v12012_v20  ;;  %v12159_v25 = vadd.f32 %v12142_v36, %v4332_v21 }
0x195d   : > { %v4354_v59 = vmul.f32 %v12155_v16, %v12077_v37 }
0x195e   : > { %v4353_v34 = vmul.f32 %v12159_v25, %v12077_v37  ;;  %9841 = vmatprep.mubr.msk.f32.mxu1 %vm270_vm0, %v4357_v49  ;;  %v4850_v49 = vadd.f32 %v4844_v53, %v12080_v9  ;;  %v4845_v55 = vmul.f32 2.0, %v12159_v25 }
0x195f   : > { %9842 = vmatmul.mubr.msk.f32.vlgmr.msra.gmra.mrb[82].mxu1 %vm270_vm0, %v4358_v3  ;;  %v4360_v46 = vadd.f32 %v4354_v59, %v12027_v35  ;;  %v4846_v3 = vmul.f32 2.0, %v12155_v16 }
0x1960   : > { %v4359_v12 = vadd.f32 %v4353_v34, %v12023_v14  ;;  %10504 = vmatpush3.bf16.msra.mxu1 %v11160_v2 }
0x1961   : > { %v4852_v16 = vadd.f32 %v4846_v3, %v12090_v33 }
0x1962   : > { %9844 = vmatprep.mubr.msk.f32.mxu1 %vm270_vm0, %v4359_v12  ;;  %v4849_v12 = vadd.f32 %v4843_v50, %v12083_v39 }
0x1963   : > { %9845 = vmatmul.mubr.msk.f32.gmra.mrb[84].mxu1 %vm270_vm0, %v4360_v46 }
0x1a28   : > { %v9836_v24 = vpop.f32.mrb[90].mxu0 }
0x1a29   : > { %v12174_v4 = vadd.f32 %v12142_v36, %v9836_v24  ;;  %v4342_v13 = vpop.f32.mrb[91].mxu0 }
0x1a2a   : > { %v12177_v19 = vadd.f32 %v12142_v36, %v4342_v13 }
0x1a2b   : > { %v4356_v47 = vmul.f32 %v12174_v4, %v12077_v37 }
0x1a2c   : > { %v4355_v18 = vmul.f32 %v12177_v19, %v12077_v37 }
0x1a2d   : > { %v4362_v15 = vadd.f32 %v4356_v47, %v12052_v38 }
0x1a2e   : > { %v4361_v60 = vadd.f32 %v4355_v18, %v12049_v45 }
0x1a30   : > { %9847 = vmatprep.mubr.msk.f32.mxu1 %vm270_vm0, %v4361_v60 }
0x1a31   : > { %9848 = vmatmul.mubr.msk.f32.gmra.mrb[86].mxu1 %vm270_vm0, %v4362_v15 }
0x1a32   : > { %v9843_v40 = vpop.f32.mrb[82].mxu1 }
0x1a33   : > { %v4453_v23 = vadd.f32 %v12190_v42, %v9843_v40  ;;  %v4447_v32 = vpop.f32.mrb[83].mxu1 }
0x1a34   : > { %v4448_v11 = vadd.f32 %v12190_v42, %v4447_v32 }
0x1a36   : > { %10892 = vtanh.f32 %v4448_v11  ;;  %v9846_v37 = vpop.f32.mrb[84].mxu1 }
0x1a37   : > { %10894 = vtanh.f32 %v4453_v23  ;;  %v4463_v0 = vadd.f32 %v12190_v42, %v9846_v37  ;;  %v4457_v27 = vpop.f32.mrb[85].mxu1  ;;  %v4851_v23 = vadd.f32 %v4845_v55, %v12094_v22  ;;  %v4848_v22 = vmul.f32 2.0, %v12174_v4 }
0x1a38   : > { %v4458_v62 = vadd.f32 %v12190_v42, %v4457_v27  ;;  %v4886_v55 = vadd.s32 64, %v11429_v61 }
0x1a3a   : > { %10896 = vtanh.f32 %v4458_v62  ;;  %v4847_v62 = vmul.f32 2.0, %v12177_v19  ;;  %vm4888_vm14 = vcmp.eq.s32.totalorder %v11434_v1, %v4886_v55 }
0x1a3b   : > { %10898 = vtanh.f32 %v4463_v0 }
0x1a40   : > { %v10893_v7 = vpop.eup %10892 }
0x1a41   : > { %v10895_v6 = vpop.eup %10894  ;;  %9858 = vmatprep.mubr.msk.f32.mxu0 %vm345_vm1, %v10893_v7 }
0x1a42   : > { %9859 = vmatmul.mubr.msk.f32.vlgmr.msra.gmra.mrb[92].mxu0 %vm345_vm1, %v10895_v6 }
0x1a43   : > { %10508 = vmatpush3.bf16.msra.mxu0 %v11213_v52 }
0x1a44   : > { %v10897_v17 = vpop.eup %10896  ;;  %10510 = vmatprep.subr.bf16.mxu0 %v11223_v56 }
0x1a45   : > { %v10899_v41 = vpop.eup %10898  ;;  %9861 = vmatprep.mubr.msk.f32.mxu0 %vm345_vm1, %v10897_v17 }
0x1a46   : > { %9862 = vmatmul.mubr.msk.f32.gmra.mrb[94].mxu0 %vm345_vm1, %v10899_v41 }
0x1a47   : > { %10512 = vmatpush3.bf16.msra.mxu0 %v11223_v56 }
0x1a48   : > { %10518 = vmatprep.subr.bf16.mxu0 %v11160_v2 }
0x1b04   : > { %v9849_v51 = vpop.f32.mrb[86].mxu1 }
0x1b05   : > { %v4473_v44 = vadd.f32 %v12190_v42, %v9849_v51  ;;  %v4467_v30 = vpop.f32.mrb[87].mxu1  ;;  %v4854_v51 = vadd.f32 %v4848_v22, %v12110_v10 }
0x1b06   : > { %v4468_v31 = vadd.f32 %v12190_v42, %v4467_v30 }
0x1b08   : > { %10900 = vtanh.f32 %v4468_v31  ;;  %v4853_v31 = vadd.f32 %v4847_v62, %v12113_v43 }
0x1b09   : > { %10902 = vtanh.f32 %v4473_v44 }
0x1b12   : > { %v10901_v28 = vpop.eup %10900 }
0x1b13   : > { %v10903_v54 = vpop.eup %10902  ;;  %9864 = vmatprep.mubr.msk.f32.mxu0 %vm345_vm1, %v10901_v28 }
0x1b14   : > { %9865 = vmatmul.mubr.msk.f32.gmra.mrb[96].mxu0 %vm345_vm1, %v10903_v54 }
0x1b15   : > { %v9860_v57 = vpop.f32.mrb[92].mxu0 }
0x1b16   : > { %v4572_v48 = vadd.f32 %v12142_v36, %v9860_v57  ;;  %v4566_v58 = vpop.f32.mrb[93].mxu0 }
0x1b17   : > { %v4567_v21 = vadd.f32 %v12142_v36, %v4566_v58 }
0x1b18   : > { %v4597_v59 = vmul.f32 %v4595_v5, %v4572_v48  ;;  %v4856_v34 = vmul.f32 2.0, %v4572_v48 }
0x1b19   : > { %v4596_v46 = vmul.f32 %v4595_v5, %v4567_v21  ;;  %v4855_v24 = vmul.f32 2.0, %v4567_v21  ;;  %v9863_v26 = vpop.f32.mrb[94].mxu0 }
0x1b1a   : > { %v4582_v13 = vadd.f32 %v12142_v36, %v9863_v26  ;;  %v4576_v47 = vpop.f32.mrb[95].mxu0  ;;  %v12218_v18 = vadd.f32 %v4856_v34, %v4850_v49  ;;  %v4603_v39 = vadd.f32 %v4597_v59, %v12016_v29 }
0x1b1b   : > { %v4602_v60 = vadd.f32 %v4596_v46, %v12012_v20  ;;  %v4577_v9 = vadd.f32 %v12142_v36, %v4576_v47  ;;  %v12222_v15 = vadd.f32 %v4855_v24, %v4849_v12  ;;  %v4887_v46 = vadd.s32 64, %v11432_v63 }
0x1b1c   : > { %v4599_v40 = vmul.f32 %v4595_v5, %v4582_v13  ;;  %v4858_v25 = vmul.f32 2.0, %v4582_v13 }
0x1b1d   : > { %v4598_v32 = vmul.f32 %v4595_v5, %v4577_v9  ;;  %v4857_v11 = vmul.f32 2.0, %v4577_v9  ;;  %9871 = vmatprep.mubr.msk.f32.mxu1 %vm270_vm0, %v4602_v60  ;;  %vm4889_vm15 = vcmp.eq.s32.totalorder %v11434_v1, %v4887_v46 }
0x1b1e   : > { %9872 = vmatmul.mubr.msk.f32.vlgmr.msra.gmra.mrb[88].mxu1 %vm270_vm0, %v4603_v39  ;;  %v12229_v37 = vadd.f32 %v4858_v25, %v4852_v16  ;;  %v4605_v33 = vadd.f32 %v4599_v40, %v12027_v35  ;;  %vm10513_vm2 = vmpackc.low %vm4889_vm15, %vm4888_vm14  ;;  %v4873_v25 = vstv %s4842_s25 }
0x1b1f   : > { %v4604_v0 = vadd.f32 %v4598_v32, %v12023_v14  ;;  %v12232_v27 = vadd.f32 %v4857_v11, %v4851_v23  ;;  %10514 = vmatprep.subr.msk.bf16.mxu1 %vm10513_vm2, %v11096_v8 }
0x1b20   : > { %10516 = vmatpush3.bf16.msk.msra.mxu1 %vm10513_vm2, %v11096_v8 }
0x1b21   : > { %9874 = vmatprep.mubr.msk.f32.mxu1 %vm270_vm0, %v4604_v0  ;;  %10522 = vmatprep.subr.bf16.mxu1 %v11213_v52 }
0x1b22   : > { %9875 = vmatmul.mubr.msk.f32.gmra.mrb[90].mxu1 %vm270_vm0, %v4605_v33 }
0x1be7   : > { %v9866_v7 = vpop.f32.mrb[96].mxu0 }
0x1be8   : > { %v4592_v6 = vadd.f32 %v12142_v36, %v9866_v7  ;;  %v4586_v17 = vpop.f32.mrb[97].mxu0 }
0x1be9   : > { %v4587_v41 = vadd.f32 %v12142_v36, %v4586_v17 }
0x1bea   : > { %v4601_v44 = vmul.f32 %v4595_v5, %v4592_v6  ;;  %v4860_v30 = vmul.f32 2.0, %v4592_v6 }
0x1beb   : > { %v4600_v28 = vmul.f32 %v4595_v5, %v4587_v41  ;;  %v4859_v54 = vmul.f32 2.0, %v4587_v41 }
0x1bec   : > { %v12243_v53 = vadd.f32 %v4860_v30, %v4854_v51  ;;  %v4607_v19 = vadd.f32 %v4601_v44, %v12052_v38 }
0x1bed   : > { %v4606_v4 = vadd.f32 %v4600_v28, %v12049_v45  ;;  %v12246_v50 = vadd.f32 %v4859_v54, %v4853_v31 }
0x1bef   : > { %9877 = vmatprep.mubr.msk.f32.mxu1 %vm270_vm0, %v4606_v4 }
0x1bf0   : > { %9878 = vmatmul.mubr.msk.f32.gmra.mrb[92].mxu1 %vm270_vm0, %v4607_v19 }
0x1bf1   : > { %v9873_v57 = vpop.f32.mrb[88].mxu1 }
0x1bf2   : > { %v4698_v10 = vadd.f32 %v12190_v42, %v9873_v57  ;;  %v4692_v48 = vpop.f32.mrb[89].mxu1 }
0x1bf3   : > { %v4693_v43 = vadd.f32 %v12190_v42, %v4692_v48 }
0x1bf5   : > { %10904 = vtanh.f32 %v4693_v43  ;;  %v9876_v5 = vpop.f32.mrb[90].mxu1 }
0x1bf6   : > { %10906 = vtanh.f32 %v4698_v10  ;;  %v4708_v58 = vadd.f32 %v12190_v42, %v9876_v5  ;;  %v4702_v21 = vpop.f32.mrb[91].mxu1 }
0x1bf7   : > { %v4703_v49 = vadd.f32 %v12190_v42, %v4702_v21 }
0x1bf9   : > { %10908 = vtanh.f32 %v4703_v49 }
0x1bfa   : > { %10910 = vtanh.f32 %v4708_v58 }
0x1bff   : > { %v10905_v3 = vpop.eup %10904 }
0x1c00   : > { %v10907_v59 = vpop.eup %10906  ;;  %9888 = vmatprep.mubr.msk.f32.mxu0 %vm345_vm1, %v10905_v3 }
0x1c01   : > { %9889 = vmatmul.mubr.msk.f32.vlgmr.msra.gmra.mrb[98].mxu0 %vm345_vm1, %v10907_v59 }
0x1c02   : > { %10520 = vmatpush3.bf16.msra.mxu0 %v11160_v2 }
0x1c03   : > { %v10909_v34 = vpop.eup %10908  ;;  %10530 = vmatprep.subr.bf16.mxu0 %v11160_v2 }
0x1c04   : > { %v10911_v12 = vpop.eup %10910  ;;  %9891 = vmatprep.mubr.msk.f32.mxu0 %vm345_vm1, %v10909_v34 }
0x1c05   : > { %9892 = vmatmul.mubr.msk.f32.gmra.mrb[100].mxu0 %vm345_vm1, %v10911_v12 }
0x1cc3   : > { %v9879_v24 = vpop.f32.mrb[92].mxu1 }
0x1cc4   : > { %v4718_v26 = vadd.f32 %v12190_v42, %v9879_v24  ;;  %v4712_v13 = vpop.f32.mrb[93].mxu1 }
0x1cc5   : > { %v4713_v47 = vadd.f32 %v12190_v42, %v4712_v13 }
0x1cc7   : > { %10912 = vtanh.f32 %v4713_v47 }
0x1cc8   : > { %10914 = vtanh.f32 %v4718_v26  ;;  %v12348_v26 = vstv %s5216_s27 }
0x1cd1   : > { %v10913_v60 = vpop.eup %10912 }
0x1cd2   : > { %v10915_v9 = vpop.eup %10914  ;;  %9894 = vmatprep.mubr.msk.f32.mxu0 %vm345_vm1, %v10913_v60 }
0x1cd3   : > { %9895 = vmatmul.mubr.msk.f32.gmra.mrb[102].mxu0 %vm345_vm1, %v10915_v9 }
0x1cd4   : > { %v9890_v16 = vpop.f32.mrb[98].mxu0 }
0x1cd5   : > { %v4817_v39 = vadd.f32 %v12142_v36, %v9890_v16  ;;  %v4811_v40 = vpop.f32.mrb[99].mxu0 }
0x1cd6   : > { %v4812_v23 = vadd.f32 %v12142_v36, %v4811_v40 }
0x1cd7   : > { %v4868_v32 = vadd.f32 %v12218_v18, %v4817_v39 }
0x1cd8   : > { %v4867_v11 = vadd.f32 %v12222_v15, %v4812_v23  ;;  %v9893_v0 = vpop.f32.mrb[100].mxu0 }
0x1cd9   : > { %v4875_v33 = vmul.f32 %v4873_v25, %v4868_v32  ;;  %v4827_v22 = vadd.f32 %v12142_v36, %v9893_v0  ;;  %v4821_v62 = vpop.f32.mrb[101].mxu0 }
0x1cda   : > { %v4874_v7 = vmul.f32 %v4873_v25, %v4867_v11  ;;  %v4822_v6 = vadd.f32 %v12142_v36, %v4821_v62 }
0x1cdb   : > { %v4870_v17 = vadd.f32 %v12229_v37, %v4827_v22  ;;  %v12285_v44 = vadd.f32 %v4875_v33, %v12016_v29 }
0x1cdc   : > { %v12281_v41 = vadd.f32 %v4874_v7, %v12012_v20  ;;  %v4869_v51 = vadd.f32 %v12232_v27, %v4822_v6 }
0x1cdd   : > { %v4877_v18 = vmul.f32 %v4873_v25, %v4870_v17 }
0x1cde   : > { %v4876_v15 = vmul.f32 %v4873_v25, %v4869_v51  ;;  %9901 = vmatprep.mubr.msk.f32.mxu1 %vm270_vm0, %v12281_v41  ;;  %9911 = vmatprep.mubr.msk.f32.mxu0 %vm270_vm0, %v12281_v41 }
0x1cdf   : > { %9902 = vmatmul.mubr.msk.f32.vlgmr.msra.gmra.mrb[24].mxu1 %vm270_vm0, %v12285_v44  ;;  %9912 = vmatmul.mubr.msk.f32.vlgmr.msra.gmra.mrb[104].mxu0 %vm270_vm0, %v12285_v44  ;;  %v12301_v29 = vadd.f32 %v4877_v18, %v12027_v35 }
0x1ce0   : > { %v12296_v20 = vadd.f32 %v4876_v15, %v12023_v14  ;;  %10524 = vmatpush3.bf16.msra.mxu1 %v11213_v52  ;;  %10532 = vmatpush3.bf16.msra.mxu0 %v11160_v2 }
0x1ce1   : > { %10526 = vmatprep.subr.bf16.mxu1 %v11223_v56  ;;  %10542 = vmatprep.subr.bf16.mxu0 %v11160_v2 }
0x1ce2   : > { %9904 = vmatprep.mubr.msk.f32.mxu1 %vm270_vm0, %v12296_v20  ;;  %9914 = vmatprep.mubr.msk.f32.mxu0 %vm270_vm0, %v12296_v20 }
0x1ce3   : > { %9905 = vmatmul.mubr.msk.f32.gmra.mrb[26].mxu1 %vm270_vm0, %v12301_v29  ;;  %9915 = vmatmul.mubr.msk.f32.gmra.mrb[106].mxu0 %vm270_vm0, %v12301_v29 }
0x1ce4   : > { %10528 = vmatpush3.bf16.msra.mxu1 %v11223_v56 }
0x1ce5   : > { %10534 = vmatprep.subr.bf16.mxu1 %v11213_v52 }
0x1da6   : > { %v9896_v14 = vpop.f32.mrb[102].mxu0 }
0x1da7   : > { %v4837_v35 = vadd.f32 %v12142_v36, %v9896_v14  ;;  %v4831_v37 = vpop.f32.mrb[103].mxu0 }
0x1da8   : > { %v4832_v27 = vadd.f32 %v12142_v36, %v4831_v37 }
0x1da9   : > { %v4872_v30 = vadd.f32 %v12243_v53, %v4837_v35 }
0x1daa   : > { %v4871_v31 = vadd.f32 %v12246_v50, %v4832_v27 }
0x1dab   : > { %v4879_v28 = vmul.f32 %v4873_v25, %v4872_v30 }
0x1dac   : > { %v4878_v54 = vmul.f32 %v4873_v25, %v4871_v31 }
0x1dad   : > { %v12323_v19 = vadd.f32 %v4879_v28, %v12052_v38 }
0x1dae   : > { %v12320_v4 = vadd.f32 %v4878_v54, %v12049_v45 }
0x1db0   : > { %9917 = vmatprep.mubr.msk.f32.mxu0 %vm270_vm0, %v12320_v4 }
0x1db1   : > { %9918 = vmatmul.mubr.msk.f32.gmra.mrb[108].mxu0 %vm270_vm0, %v12323_v19 }
0x1db2   : > { %v9913_v57 = vpop.f32.mrb[104].mxu0 }
0x1db3   : > { %v5074_v10 = vadd.f32 %v12190_v42, %v9913_v57  ;;  %v5068_v53 = vpop.f32.mrb[105].mxu0 }
0x1db4   : > { %v5069_v50 = vadd.f32 %v12190_v42, %v5068_v53 }
0x1db6   : > { %10916 = vtanh.f32 %v5069_v50  ;;  %v9916_v48 = vpop.f32.mrb[106].mxu0 }
0x1db7   : > { %10918 = vtanh.f32 %v5074_v10  ;;  %v5084_v45 = vadd.f32 %v12190_v42, %v9916_v48  ;;  %v5078_v43 = vpop.f32.mrb[107].mxu0 }
0x1db8   : > { %v5079_v38 = vadd.f32 %v12190_v42, %v5078_v43 }
0x1dba   : > { %10920 = vtanh.f32 %v5079_v38 }
0x1dbb   : > { %10922 = vtanh.f32 %v5084_v45 }
0x1dc0   : > { %v10917_v5 = vpop.eup %10916 }
0x1dc1   : > { %v10919_v58 = vpop.eup %10918  ;;  %9928 = vmatprep.mubr.msk.f32.mxu1 %vm345_vm1, %v10917_v5 }
0x1dc2   : > { %9929 = vmatmul.mubr.msk.f32.vlgmr.msra.gmra.mrb[94].mxu1 %vm345_vm1, %v10919_v58 }
0x1dc3   : > { %10536 = vmatpush3.bf16.msra.mxu1 %v11213_v52 }
0x1dc4   : > { %v10921_v21 = vpop.eup %10920  ;;  %10538 = vmatprep.subr.bf16.mxu1 %v11223_v56 }
0x1dc5   : > { %v10923_v49 = vpop.eup %10922  ;;  %9931 = vmatprep.mubr.msk.f32.mxu1 %vm345_vm1, %v10921_v21 }
0x1dc6   : > { %9932 = vmatmul.mubr.msk.f32.gmra.mrb[96].mxu1 %vm345_vm1, %v10923_v49 }
0x1dc7   : > { %10540 = vmatpush3.bf16.msra.mxu1 %v11223_v56 }
0x1dc8   : > { %10546 = vmatprep.subr.bf16.mxu1 %v11213_v52 }
0x1e84   : > { %v9919_v3 = vpop.f32.mrb[108].mxu0 }
0x1e85   : > { %v5094_v59 = vadd.f32 %v12190_v42, %v9919_v3  ;;  %v5088_v34 = vpop.f32.mrb[109].mxu0 }
0x1e86   : > { %v5089_v12 = vadd.f32 %v12190_v42, %v5088_v34 }
0x1e88   : > { %10924 = vtanh.f32 %v5089_v12 }
0x1e89   : > { %10926 = vtanh.f32 %v5094_v59 }
0x1e92   : > { %v10925_v55 = vpop.eup %10924 }
0x1e93   : > { %v10927_v46 = vpop.eup %10926  ;;  %9934 = vmatprep.mubr.msk.f32.mxu1 %vm345_vm1, %v10925_v55 }
0x1e94   : > { %9935 = vmatmul.mubr.msk.f32.gmra.mrb[98].mxu1 %vm345_vm1, %v10927_v46 }
0x1e95   : > { %v9930_v24 = vpop.f32.mrb[94].mxu1 }
0x1e96   : > { %v12351_v13 = vadd.f32 %v12142_v36, %v9930_v24  ;;  %v5187_v47 = vpop.f32.mrb[95].mxu1 }
0x1e97   : > { %v12354_v60 = vadd.f32 %v12142_v36, %v5187_v47 }
0x1e98   : > { %v5219_v9 = vmul.f32 %v12348_v26, %v12351_v13 }
0x1e99   : > { %v5218_v16 = vmul.f32 %v12348_v26, %v12354_v60  ;;  %v9933_v39 = vpop.f32.mrb[96].mxu1 }
0x1e9a   : > { %v12361_v40 = vadd.f32 %v12142_v36, %v9933_v39  ;;  %v5197_v25 = vpop.f32.mrb[97].mxu1  ;;  %v5225_v11 = vadd.f32 %v5219_v9, %v12285_v44 }
0x1e9b   : > { %v5224_v23 = vadd.f32 %v5218_v16, %v12281_v41  ;;  %v12365_v32 = vadd.f32 %v12142_v36, %v5197_v25 }
0x1e9c   : > { %v5221_v0 = vmul.f32 %v12348_v26, %v12361_v40 }
0x1e9d   : > { %v5220_v33 = vmul.f32 %v12348_v26, %v12365_v32  ;;  %9941 = vmatprep.mubr.msk.f32.mxu0 %vm270_vm0, %v5224_v23 }
0x1e9e   : > { %9942 = vmatmul.mubr.msk.f32.vlgmr.msra.gmra.mrb[110].mxu0 %vm270_vm0, %v5225_v11  ;;  %v5227_v62 = vadd.f32 %v5221_v0, %v12301_v29 }
0x1e9f   : > { %v5226_v22 = vadd.f32 %v5220_v33, %v12296_v20  ;;  %10544 = vmatpush3.bf16.msra.mxu0 %v11160_v2 }
0x1ea0   : > { %10554 = vmatprep.subr.bf16.mxu0 %v11160_v2 }
0x1ea1   : > { %9944 = vmatprep.mubr.msk.f32.mxu0 %vm270_vm0, %v5226_v22 }
0x1ea2   : > { %9945 = vmatmul.mubr.msk.f32.gmra.mrb[112].mxu0 %vm270_vm0, %v5227_v62 }
0x1f67   : > { %v9936_v7 = vpop.f32.mrb[98].mxu1 }
0x1f68   : > { %v12381_v6 = vadd.f32 %v12142_v36, %v9936_v7  ;;  %v5207_v17 = vpop.f32.mrb[99].mxu1 }
0x1f69   : > { %v12384_v51 = vadd.f32 %v12142_v36, %v5207_v17 }
0x1f6a   : > { %v5223_v18 = vmul.f32 %v12348_v26, %v12381_v6 }
0x1f6b   : > { %v5222_v15 = vmul.f32 %v12348_v26, %v12384_v51 }
0x1f6c   : > { %v5229_v35 = vadd.f32 %v5223_v18, %v12323_v19 }
0x1f6d   : > { %v5228_v14 = vadd.f32 %v5222_v15, %v12320_v4 }
0x1f6f   : > { %9947 = vmatprep.mubr.msk.f32.mxu0 %vm270_vm0, %v5228_v14 }
0x1f70   : > { %9948 = vmatmul.mubr.msk.f32.gmra.mrb[114].mxu0 %vm270_vm0, %v5229_v35 }
0x1f71   : > { %v9943_v37 = vpop.f32.mrb[110].mxu0 }
0x1f72   : > { %v5320_v27 = vadd.f32 %v12190_v42, %v9943_v37  ;;  %v5314_v30 = vpop.f32.mrb[111].mxu0 }
0x1f73   : > { %v5315_v31 = vadd.f32 %v12190_v42, %v5314_v30 }
0x1f75   : > { %10928 = vtanh.f32 %v5315_v31  ;;  %v9946_v28 = vpop.f32.mrb[112].mxu0 }
0x1f76   : > { %10930 = vtanh.f32 %v5320_v27  ;;  %v5330_v54 = vadd.f32 %v12190_v42, %v9946_v28  ;;  %v5324_v57 = vpop.f32.mrb[113].mxu0 }
0x1f77   : > { %v5325_v10 = vadd.f32 %v12190_v42, %v5324_v57 }
0x1f79   : > { %10932 = vtanh.f32 %v5325_v10 }
0x1f7a   : > { %10934 = vtanh.f32 %v5330_v54 }
0x1f7f   : > { %v10929_v53 = vpop.eup %10928 }
0x1f80   : > { %v10931_v50 = vpop.eup %10930  ;;  %9958 = vmatprep.mubr.msk.f32.mxu1 %vm345_vm1, %v10929_v53 }
0x1f81   : > { %9959 = vmatmul.mubr.msk.f32.vlgmr.msra.gmra.mrb[100].mxu1 %vm345_vm1, %v10931_v50 }
0x1f82   : > { %10548 = vmatpush3.bf16.msra.mxu1 %v11213_v52 }
0x1f83   : > { %v10933_v48 = vpop.eup %10932  ;;  %10550 = vmatprep.subr.bf16.mxu1 %v11223_v56 }
0x1f84   : > { %v10935_v45 = vpop.eup %10934  ;;  %9961 = vmatprep.mubr.msk.f32.mxu1 %vm345_vm1, %v10933_v48 }
0x1f85   : > { %9962 = vmatmul.mubr.msk.f32.gmra.mrb[102].mxu1 %vm345_vm1, %v10935_v45 }
0x1f86   : > { %10552 = vmatpush3.bf16.msra.mxu1 %v11223_v56 }
0x1f87   : > { %10558 = vmatprep.subr.bf16.mxu1 %v11213_v52 }
0x2043   : > { %v9949_v43 = vpop.f32.mrb[114].mxu0 }
0x2044   : > { %v5340_v38 = vadd.f32 %v12190_v42, %v9949_v43  ;;  %v5334_v5 = vpop.f32.mrb[115].mxu0 }
0x2045   : > { %v5335_v58 = vadd.f32 %v12190_v42, %v5334_v5 }
0x2047   : > { %10936 = vtanh.f32 %v5335_v58 }
0x2048   : > { %10938 = vtanh.f32 %v5340_v38 }
0x2051   : > { %v10937_v21 = vpop.eup %10936 }
0x2052   : > { %v10939_v49 = vpop.eup %10938  ;;  %9964 = vmatprep.mubr.msk.f32.mxu1 %vm345_vm1, %v10937_v21 }
0x2053   : > { %9965 = vmatmul.mubr.msk.f32.gmra.mrb[104].mxu1 %vm345_vm1, %v10939_v49 }
0x2054   : > { %v9960_v3 = vpop.f32.mrb[100].mxu1 }
0x2055   : > { %v12411_v59 = vadd.f32 %v12142_v36, %v9960_v3  ;;  %v5433_v34 = vpop.f32.mrb[101].mxu1 }
0x2056   : > { %v12414_v12 = vadd.f32 %v12142_v36, %v5433_v34 }
0x2057   : > { %v5463_v55 = vmul.f32 %v12411_v59, %v12348_v26  ;;  %v5955_v49 = vmul.f32 2.0, %v12411_v59 }
0x2058   : > { %v5462_v46 = vmul.f32 %v12414_v12, %v12348_v26  ;;  %v9963_v24 = vpop.f32.mrb[102].mxu1  ;;  %v5954_v3 = vmul.f32 2.0, %v12414_v12 }
0x2059   : > { %v12421_v47 = vadd.f32 %v12142_v36, %v9963_v24  ;;  %v5443_v9 = vpop.f32.mrb[103].mxu1  ;;  %v5469_v25 = vadd.f32 %v5463_v55, %v12285_v44  ;;  %v5706_v55 = vstv %s12343_s26 }
0x205a   : > { %v5468_v16 = vadd.f32 %v5462_v46, %v12281_v41  ;;  %v12425_v39 = vadd.f32 %v12142_v36, %v5443_v9 }
0x205b   : > { %v5465_v23 = vmul.f32 %v12421_v47, %v12348_v26 }
0x205c   : > { %v5464_v11 = vmul.f32 %v12425_v39, %v12348_v26  ;;  %9971 = vmatprep.mubr.msk.f32.mxu0 %vm270_vm0, %v5468_v16  ;;  %v5961_v16 = vadd.f32 %v5955_v49, %v12351_v13  ;;  %v5956_v59 = vmul.f32 2.0, %v12425_v39 }
0x205d   : > { %9972 = vmatmul.mubr.msk.f32.vlgmr.msra.gmra.mrb[116].mxu0 %vm270_vm0, %v5469_v25  ;;  %v5471_v33 = vadd.f32 %v5465_v23, %v12301_v29  ;;  %v5957_v25 = vmul.f32 2.0, %v12421_v47 }
0x205e   : > { %v5470_v0 = vadd.f32 %v5464_v11, %v12296_v20  ;;  %10556 = vmatpush3.bf16.msra.mxu0 %v11160_v2 }
0x205f   : > { %10570 = vmatprep.subr.bf16.mxu0 %v11160_v2  ;;  %v5963_v47 = vadd.f32 %v5957_v25, %v12361_v40 }
0x2060   : > { %9974 = vmatprep.mubr.msk.f32.mxu0 %vm270_vm0, %v5470_v0  ;;  %v5960_v0 = vadd.f32 %v5954_v3, %v12354_v60 }
0x2061   : > { %9975 = vmatmul.mubr.msk.f32.gmra.mrb[118].mxu0 %vm270_vm0, %v5471_v33 }
0x2126   : > { %v9966_v22 = vpop.f32.mrb[104].mxu1 }
0x2127   : > { %v12441_v62 = vadd.f32 %v12142_v36, %v9966_v22  ;;  %v5453_v7 = vpop.f32.mrb[105].mxu1 }
0x2128   : > { %v12444_v17 = vadd.f32 %v12142_v36, %v5453_v7 }
0x2129   : > { %v5467_v18 = vmul.f32 %v12441_v62, %v12348_v26 }
0x212a   : > { %v5466_v15 = vmul.f32 %v12444_v17, %v12348_v26 }
0x212b   : > { %v5473_v35 = vadd.f32 %v5467_v18, %v12323_v19 }
0x212c   : > { %v5472_v14 = vadd.f32 %v5466_v15, %v12320_v4 }
0x212e   : > { %9977 = vmatprep.mubr.msk.f32.mxu0 %vm270_vm0, %v5472_v14 }
0x212f   : > { %9978 = vmatmul.mubr.msk.f32.gmra.mrb[120].mxu0 %vm270_vm0, %v5473_v35 }
0x2130   : > { %v9973_v37 = vpop.f32.mrb[116].mxu0 }
0x2131   : > { %v5564_v27 = vadd.f32 %v12190_v42, %v9973_v37  ;;  %v5558_v30 = vpop.f32.mrb[117].mxu0 }
0x2132   : > { %v5559_v31 = vadd.f32 %v12190_v42, %v5558_v30 }
0x2134   : > { %10940 = vtanh.f32 %v5559_v31  ;;  %v9976_v28 = vpop.f32.mrb[118].mxu0 }
0x2135   : > { %10942 = vtanh.f32 %v5564_v27  ;;  %v5574_v54 = vadd.f32 %v12190_v42, %v9976_v28  ;;  %v5568_v26 = vpop.f32.mrb[119].mxu0  ;;  %v5962_v27 = vadd.f32 %v5956_v59, %v12365_v32  ;;  %v5959_v32 = vmul.f32 2.0, %v12441_v62 }
0x2136   : > { %v5569_v57 = vadd.f32 %v12190_v42, %v5568_v26  ;;  %v5997_v59 = vadd.s32 80, %v11429_v61 }
0x2138   : > { %10944 = vtanh.f32 %v5569_v57  ;;  %v5958_v57 = vmul.f32 2.0, %v12444_v17  ;;  %vm5999_vm3 = vcmp.eq.s32.totalorder %v11434_v1, %v5997_v59 }
0x2139   : > { %10946 = vtanh.f32 %v5574_v54 }
0x213e   : > { %v10941_v10 = vpop.eup %10940 }
0x213f   : > { %v10943_v53 = vpop.eup %10942  ;;  %9988 = vmatprep.mubr.msk.f32.mxu1 %vm345_vm1, %v10941_v10 }
0x2140   : > { %9989 = vmatmul.mubr.msk.f32.vlgmr.msra.gmra.mrb[106].mxu1 %vm345_vm1, %v10943_v53 }
0x2141   : > { %10560 = vmatpush3.bf16.msra.mxu1 %v11213_v52 }
0x2142   : > { %v10945_v50 = vpop.eup %10944  ;;  %10562 = vmatprep.subr.bf16.mxu1 %v11223_v56 }
0x2143   : > { %v10947_v48 = vpop.eup %10946  ;;  %9991 = vmatprep.mubr.msk.f32.mxu1 %vm345_vm1, %v10945_v50 }
0x2144   : > { %9992 = vmatmul.mubr.msk.f32.gmra.mrb[108].mxu1 %vm345_vm1, %v10947_v48 }
0x2145   : > { %10564 = vmatpush3.bf16.msra.mxu1 %v11223_v56 }
0x2202   : > { %v9979_v45 = vpop.f32.mrb[120].mxu0 }
0x2203   : > { %v5584_v43 = vadd.f32 %v12190_v42, %v9979_v45  ;;  %v5578_v38 = vpop.f32.mrb[121].mxu0  ;;  %v5965_v45 = vadd.f32 %v5959_v32, %v12381_v6 }
0x2204   : > { %v5579_v5 = vadd.f32 %v12190_v42, %v5578_v38 }
0x2206   : > { %10948 = vtanh.f32 %v5579_v5  ;;  %v5964_v5 = vadd.f32 %v5958_v57, %v12384_v51 }
0x2207   : > { %10950 = vtanh.f32 %v5584_v43 }
0x2210   : > { %v10949_v58 = vpop.eup %10948 }
0x2211   : > { %v10951_v21 = vpop.eup %10950  ;;  %9994 = vmatprep.mubr.msk.f32.mxu1 %vm345_vm1, %v10949_v58 }
0x2212   : > { %9995 = vmatmul.mubr.msk.f32.gmra.mrb[110].mxu1 %vm345_vm1, %v10951_v21 }
0x2213   : > { %v9990_v34 = vpop.f32.mrb[106].mxu1 }
0x2214   : > { %v5683_v46 = vadd.f32 %v12142_v36, %v9990_v34  ;;  %v5677_v24 = vpop.f32.mrb[107].mxu1 }
0x2215   : > { %v5678_v9 = vadd.f32 %v12142_v36, %v5677_v24 }
0x2216   : > { %v5708_v23 = vmul.f32 %v5706_v55, %v5683_v46  ;;  %v5967_v11 = vmul.f32 2.0, %v5683_v46 }
0x2217   : > { %v5707_v33 = vmul.f32 %v5706_v55, %v5678_v9  ;;  %v5966_v22 = vmul.f32 2.0, %v5678_v9  ;;  %v9993_v12 = vpop.f32.mrb[108].mxu1 }
0x2218   : > { %v5693_v7 = vadd.f32 %v12142_v36, %v9993_v12  ;;  %v5687_v18 = vpop.f32.mrb[109].mxu1  ;;  %v12479_v15 = vadd.f32 %v5967_v11, %v5961_v16  ;;  %v5714_v60 = vadd.f32 %v5708_v23, %v12285_v44 }
0x2219   : > { %v5713_v14 = vadd.f32 %v5707_v33, %v12281_v41  ;;  %v5688_v13 = vadd.f32 %v12142_v36, %v5687_v18  ;;  %v12483_v35 = vadd.f32 %v5966_v22, %v5960_v0  ;;  %v5998_v33 = vadd.s32 80, %v11432_v63 }
0x221a   : > { %v5710_v37 = vmul.f32 %v5706_v55, %v5693_v7  ;;  %v5969_v39 = vmul.f32 2.0, %v5693_v7 }
0x221b   : > { %v5709_v30 = vmul.f32 %v5706_v55, %v5688_v13  ;;  %v5968_v31 = vmul.f32 2.0, %v5688_v13  ;;  %10001 = vmatprep.mubr.msk.f32.mxu0 %vm270_vm0, %v5713_v14  ;;  %vm6000_vm4 = vcmp.eq.s32.totalorder %v11434_v1, %v5998_v33 }
0x221c   : > { %10002 = vmatmul.mubr.msk.f32.vlgmr.msra.gmra.mrb[122].mxu0 %vm270_vm0, %v5714_v60  ;;  %v12490_v28 = vadd.f32 %v5969_v39, %v5963_v47  ;;  %v5716_v40 = vadd.f32 %v5710_v37, %v12301_v29  ;;  %vm10565_vm5 = vmpackc.low %vm6000_vm4, %vm5999_vm3  ;;  %v5984_v39 = vstv %s5953_s28 }
0x221d   : > { %v5715_v54 = vadd.f32 %v5709_v30, %v12296_v20  ;;  %10572 = vmatpush3.bf16.msra.mxu0 %v11160_v2  ;;  %v12494_v26 = vadd.f32 %v5968_v31, %v5962_v27  ;;  %10566 = vmatprep.subr.msk.bf16.mxu1 %vm10565_vm5, %v11096_v8 }
0x221e   : > { %10574 = vmatprep.subr.bf16.mxu0 %v11213_v52 }
0x221f   : > { %10004 = vmatprep.mubr.msk.f32.mxu0 %vm270_vm0, %v5715_v54 }
0x2220   : > { %10005 = vmatmul.mubr.msk.f32.gmra.mrb[124].mxu0 %vm270_vm0, %v5716_v40 }
0x22e5   : > { %v9996_v10 = vpop.f32.mrb[110].mxu1 }
0x22e6   : > { %v5703_v53 = vadd.f32 %v12142_v36, %v9996_v10  ;;  %v5697_v50 = vpop.f32.mrb[111].mxu1 }
0x22e7   : > { %v5698_v48 = vadd.f32 %v12142_v36, %v5697_v50 }
0x22e8   : > { %v5712_v43 = vmul.f32 %v5706_v55, %v5703_v53  ;;  %v5971_v38 = vmul.f32 2.0, %v5703_v53 }
0x22e9   : > { %v5711_v58 = vmul.f32 %v5706_v55, %v5698_v48  ;;  %v5970_v21 = vmul.f32 2.0, %v5698_v48 }
0x22ea   : > { %v12506_v49 = vadd.f32 %v5971_v38, %v5965_v45  ;;  %v5718_v17 = vadd.f32 %v5712_v43, %v12323_v19 }
0x22eb   : > { %v5717_v62 = vadd.f32 %v5711_v58, %v12320_v4  ;;  %v12509_v3 = vadd.f32 %v5970_v21, %v5964_v5 }
0x22ed   : > { %10007 = vmatprep.mubr.msk.f32.mxu0 %vm270_vm0, %v5717_v62 }
0x22ee   : > { %10008 = vmatmul.mubr.msk.f32.gmra.mrb[126].mxu0 %vm270_vm0, %v5718_v17 }
0x22ef   : > { %v10003_v34 = vpop.f32.mrb[122].mxu0 }
0x22f0   : > { %v5809_v6 = vadd.f32 %v12190_v42, %v10003_v34  ;;  %v5803_v46 = vpop.f32.mrb[123].mxu0 }
0x22f1   : > { %v5804_v51 = vadd.f32 %v12190_v42, %v5803_v46 }
0x22f3   : > { %10952 = vtanh.f32 %v5804_v51  ;;  %v10006_v55 = vpop.f32.mrb[124].mxu0 }
0x22f4   : > { %10954 = vtanh.f32 %v5809_v6  ;;  %v5819_v24 = vadd.f32 %v12190_v42, %v10006_v55  ;;  %v5813_v9 = vpop.f32.mrb[125].mxu0 }
0x22f5   : > { %v5814_v16 = vadd.f32 %v12190_v42, %v5813_v9 }
0x22f7   : > { %10956 = vtanh.f32 %v5814_v16  ;;  %v12605_v16 = vld [vmem:[%s13065_s3] ss:$0 sm:$0xff] }
0x22f8   : > { %10958 = vtanh.f32 %v5819_v24 }
0x22fd   : > { %v10953_v25 = vpop.eup %10952 }
0x22fe   : > { %v10955_v23 = vpop.eup %10954  ;;  %10018 = vmatprep.mubr.msk.f32.mxu1 %vm345_vm1, %v10953_v25 }
0x22ff   : > { %10019 = vmatmul.mubr.msk.f32.vlgmr.msra.gmra.mrb[112].mxu1 %vm345_vm1, %v10955_v23 }
0x2300   : > { %10568 = vmatpush3.bf16.msk.msra.mxu1 %vm10565_vm5, %v11096_v8 }
0x2301   : > { %v10957_v11 = vpop.eup %10956  ;;  %10582 = vmatprep.subr.bf16.mxu1 %v11160_v2 }
0x2302   : > { %v10959_v0 = vpop.eup %10958  ;;  %10021 = vmatprep.mubr.msk.f32.mxu1 %vm345_vm1, %v10957_v11 }
0x2303   : > { %10022 = vmatmul.mubr.msk.f32.gmra.mrb[114].mxu1 %vm345_vm1, %v10959_v0 }
0x23c1   : > { %v10009_v22 = vpop.f32.mrb[126].mxu0 }
0x23c2   : > { %v5829_v12 = vadd.f32 %v12190_v42, %v10009_v22  ;;  %v5823_v7 = vpop.f32.mrb[127].mxu0  ;;  %v12614_v22 = vstv %s6327_s8 }
0x23c3   : > { %v5824_v18 = vadd.f32 %v12190_v42, %v5823_v7 }
0x23c5   : > { %10960 = vtanh.f32 %v5824_v18 }
0x23c6   : > { %10962 = vtanh.f32 %v5829_v12  ;;  %v12619_v12 = vld [vmem:[%s13067_s5] ss:$0 sm:$0xff] }
0x23cf   : > { %v10961_v14 = vpop.eup %10960 }
0x23d0   : > { %v10963_v13 = vpop.eup %10962  ;;  %10024 = vmatprep.mubr.msk.f32.mxu1 %vm345_vm1, %v10961_v14 }
0x23d1   : > { %10025 = vmatmul.mubr.msk.f32.gmra.mrb[116].mxu1 %vm345_vm1, %v10963_v13 }
0x23d2   : > { %v10020_v47 = vpop.f32.mrb[112].mxu1 }
0x23d3   : > { %v5928_v60 = vadd.f32 %v12142_v36, %v10020_v47  ;;  %v5922_v37 = vpop.f32.mrb[113].mxu1 }
0x23d4   : > { %v5923_v27 = vadd.f32 %v12142_v36, %v5922_v37 }
0x23d5   : > { %v5979_v30 = vadd.f32 %v12479_v15, %v5928_v60 }
0x23d6   : > { %v5978_v31 = vadd.f32 %v12483_v35, %v5923_v27  ;;  %v10023_v54 = vpop.f32.mrb[114].mxu1 }
0x23d7   : > { %v5986_v40 = vmul.f32 %v5984_v39, %v5979_v30  ;;  %v5938_v32 = vadd.f32 %v12142_v36, %v10023_v54  ;;  %v5932_v57 = vpop.f32.mrb[115].mxu1 }
0x23d8   : > { %v5985_v10 = vmul.f32 %v5984_v39, %v5978_v31  ;;  %v5933_v53 = vadd.f32 %v12142_v36, %v5932_v57 }
0x23d9   : > { %v5981_v50 = vadd.f32 %v12490_v28, %v5938_v32  ;;  %v12546_v43 = vadd.f32 %v5986_v40, %v12285_v44 }
0x23da   : > { %v12542_v48 = vadd.f32 %v5985_v10, %v12281_v41  ;;  %v5980_v45 = vadd.f32 %v12494_v26, %v5933_v53 }
0x23db   : > { %v5988_v15 = vmul.f32 %v5984_v39, %v5981_v50 }
0x23dc   : > { %v5987_v35 = vmul.f32 %v5984_v39, %v5980_v45  ;;  %10031 = vmatprep.mubr.msk.f32.mxu1 %vm270_vm0, %v12542_v48  ;;  %10041 = vmatprep.mubr.msk.f32.mxu0 %vm270_vm0, %v12542_v48 }
0x23dd   : > { %10032 = vmatmul.mubr.msk.f32.vlgmr.msra.gmra.mrb[24].mxu1 %vm270_vm0, %v12546_v43  ;;  %10042 = vmatmul.mubr.msk.f32.vlgmr.msra.gmra.mrb[128].mxu0 %vm270_vm0, %v12546_v43  ;;  %v12562_v44 = vadd.f32 %v5988_v15, %v12301_v29 }
0x23de   : > { %v12557_v41 = vadd.f32 %v5987_v35, %v12296_v20  ;;  %10576 = vmatpush3.bf16.msra.mxu0 %v11213_v52  ;;  %10584 = vmatpush3.bf16.msra.mxu1 %v11160_v2 }
0x23df   : > { %10578 = vmatprep.subr.bf16.mxu0 %v11223_v56  ;;  %10594 = vmatprep.subr.bf16.mxu1 %v11160_v2 }
0x23e0   : > { %10034 = vmatprep.mubr.msk.f32.mxu1 %vm270_vm0, %v12557_v41  ;;  %10044 = vmatprep.mubr.msk.f32.mxu0 %vm270_vm0, %v12557_v41 }
0x23e1   : > { %10035 = vmatmul.mubr.msk.f32.gmra.mrb[26].mxu1 %vm270_vm0, %v12562_v44  ;;  %10045 = vmatmul.mubr.msk.f32.gmra.mrb[130].mxu0 %vm270_vm0, %v12562_v44 }
0x23e2   : > { %10580 = vmatpush3.bf16.msra.mxu0 %v11223_v56 }
0x23e3   : > { %10586 = vmatprep.subr.bf16.mxu0 %v11213_v52 }
0x24a4   : > { %v10026_v20 = vpop.f32.mrb[116].mxu1 }
0x24a5   : > { %v5948_v29 = vadd.f32 %v12142_v36, %v10026_v20  ;;  %v5942_v28 = vpop.f32.mrb[117].mxu1 }
0x24a6   : > { %v5943_v26 = vadd.f32 %v12142_v36, %v5942_v28 }
0x24a7   : > { %v5983_v38 = vadd.f32 %v12506_v49, %v5948_v29 }
0x24a8   : > { %v5982_v5 = vadd.f32 %v12509_v3, %v5943_v26 }
0x24a9   : > { %v5990_v58 = vmul.f32 %v5984_v39, %v5983_v38 }
0x24aa   : > { %v5989_v21 = vmul.f32 %v5984_v39, %v5982_v5 }
0x24ab   : > { %v12584_v17 = vadd.f32 %v5990_v58, %v12323_v19 }
0x24ac   : > { %v12581_v62 = vadd.f32 %v5989_v21, %v12320_v4 }
0x24ae   : > { %10047 = vmatprep.mubr.msk.f32.mxu0 %vm270_vm0, %v12581_v62 }
0x24af   : > { %10048 = vmatmul.mubr.msk.f32.gmra.mrb[132].mxu0 %vm270_vm0, %v12584_v17 }
0x24b0   : > { %v10043_v34 = vpop.f32.mrb[128].mxu0 }
0x24b1   : > { %v6185_v36 = vadd.f32 %v12190_v42, %v10043_v34  ;;  %v6179_v49 = vpop.f32.mrb[129].mxu0 }
0x24b2   : > { %v6180_v3 = vadd.f32 %v12190_v42, %v6179_v49 }
0x24b4   : > { %10964 = vtanh.f32 %v6180_v3  ;;  %v10046_v6 = vpop.f32.mrb[130].mxu0 }
0x24b5   : > { %10966 = vtanh.f32 %v6185_v36  ;;  %v6195_v4 = vadd.f32 %v12190_v42, %v10046_v6  ;;  %v6189_v46 = vpop.f32.mrb[131].mxu0 }
0x24b6   : > { %v6190_v19 = vadd.f32 %v12190_v42, %v6189_v46 }
0x24b8   : > { %10968 = vtanh.f32 %v6190_v19 }
0x24b9   : > { %10970 = vtanh.f32 %v6195_v4 }
0x24be   : > { %v10965_v51 = vpop.eup %10964 }
0x24bf   : > { %v10967_v55 = vpop.eup %10966  ;;  %10058 = vmatprep.mubr.msk.f32.mxu0 %vm345_vm1, %v10965_v51 }
0x24c0   : > { %10059 = vmatmul.mubr.msk.f32.vlgmr.msra.gmra.mrb[134].mxu0 %vm345_vm1, %v10967_v55 }
0x24c1   : > { %10588 = vmatpush3.bf16.msra.mxu0 %v11213_v52 }
0x24c2   : > { %v10969_v24 = vpop.eup %10968  ;;  %10590 = vmatprep.subr.bf16.mxu0 %v11223_v56 }
0x24c3   : > { %v10971_v9 = vpop.eup %10970  ;;  %10061 = vmatprep.mubr.msk.f32.mxu0 %vm345_vm1, %v10969_v24 }
0x24c4   : > { %10062 = vmatmul.mubr.msk.f32.gmra.mrb[136].mxu0 %vm345_vm1, %v10971_v9 }
0x24c5   : > { %10592 = vmatpush3.bf16.msra.mxu0 %v11223_v56 }
0x24c6   : > { %10598 = vmatprep.subr.bf16.mxu0 %v11213_v52 }
0x2582   : > { %v10049_v42 = vpop.f32.mrb[132].mxu0 }
0x2583   : > { %v6205_v25 = vadd.f32 %v12605_v16, %v10049_v42  ;;  %v6199_v23 = vpop.f32.mrb[133].mxu0 }
0x2584   : > { %v6200_v11 = vadd.f32 %v12605_v16, %v6199_v23 }
0x2586   : > { %10972 = vtanh.f32 %v6200_v11 }
0x2587   : > { %10974 = vtanh.f32 %v6205_v25 }
0x2590   : > { %v10973_v0 = vpop.eup %10972 }
0x2591   : > { %v10975_v59 = vpop.eup %10974  ;;  %10064 = vmatprep.mubr.msk.f32.mxu0 %vm345_vm1, %v10973_v0 }
0x2592   : > { %10065 = vmatmul.mubr.msk.f32.gmra.mrb[138].mxu0 %vm345_vm1, %v10975_v59 }
0x2593   : > { %v10060_v33 = vpop.f32.mrb[134].mxu0 }
0x2594   : > { %v12622_v7 = vadd.f32 %v12619_v12, %v10060_v33  ;;  %v6298_v18 = vpop.f32.mrb[135].mxu0 }
0x2595   : > { %v12625_v14 = vadd.f32 %v12619_v12, %v6298_v18 }
0x2596   : > { %v6330_v13 = vmul.f32 %v12614_v22, %v12622_v7 }
0x2597   : > { %v6329_v47 = vmul.f32 %v12614_v22, %v12625_v14  ;;  %v10063_v60 = vpop.f32.mrb[136].mxu0 }
0x2598   : > { %v12632_v37 = vadd.f32 %v12619_v12, %v10063_v60  ;;  %v6308_v39 = vpop.f32.mrb[137].mxu0  ;;  %v6336_v31 = vadd.f32 %v6330_v13, %v12546_v43 }
0x2599   : > { %v6335_v27 = vadd.f32 %v6329_v47, %v12542_v48  ;;  %v12636_v30 = vadd.f32 %v12619_v12, %v6308_v39 }
0x259a   : > { %v6332_v54 = vmul.f32 %v12614_v22, %v12632_v37 }
0x259b   : > { %v6331_v40 = vmul.f32 %v12614_v22, %v12636_v30  ;;  %10071 = vmatprep.mubr.msk.f32.mxu1 %vm270_vm0, %v6335_v27 }
0x259c   : > { %10072 = vmatmul.mubr.msk.f32.vlgmr.msra.gmra.mrb[118].mxu1 %vm270_vm0, %v6336_v31  ;;  %v6338_v57 = vadd.f32 %v6332_v54, %v12562_v44 }
0x259d   : > { %v6337_v32 = vadd.f32 %v6331_v40, %v12557_v41  ;;  %10596 = vmatpush3.bf16.msra.mxu1 %v11160_v2 }
0x259e   : > { %10606 = vmatprep.subr.bf16.mxu1 %v11160_v2 }
0x259f   : > { %10074 = vmatprep.mubr.msk.f32.mxu1 %vm270_vm0, %v6337_v32 }
0x25a0   : > { %10075 = vmatmul.mubr.msk.f32.gmra.mrb[120].mxu1 %vm270_vm0, %v6338_v57 }
0x2665   : > { %v10066_v10 = vpop.f32.mrb[138].mxu0 }
0x2666   : > { %v12652_v53 = vadd.f32 %v12619_v12, %v10066_v10  ;;  %v6318_v50 = vpop.f32.mrb[139].mxu0 }
0x2667   : > { %v12655_v45 = vadd.f32 %v12619_v12, %v6318_v50 }
0x2668   : > { %v6334_v15 = vmul.f32 %v12614_v22, %v12652_v53 }
0x2669   : > { %v6333_v35 = vmul.f32 %v12614_v22, %v12655_v45 }
0x266a   : > { %v6340_v29 = vadd.f32 %v6334_v15, %v12584_v17 }
0x266b   : > { %v6339_v20 = vadd.f32 %v6333_v35, %v12581_v62 }
0x266d   : > { %10077 = vmatprep.mubr.msk.f32.mxu1 %vm270_vm0, %v6339_v20 }
0x266e   : > { %10078 = vmatmul.mubr.msk.f32.gmra.mrb[122].mxu1 %vm270_vm0, %v6340_v29 }
0x266f   : > { %v10073_v28 = vpop.f32.mrb[118].mxu1 }
0x2670   : > { %v6431_v26 = vadd.f32 %v12605_v16, %v10073_v28  ;;  %v6425_v38 = vpop.f32.mrb[119].mxu1 }
0x2671   : > { %v6426_v5 = vadd.f32 %v12605_v16, %v6425_v38 }
0x2673   : > { %10976 = vtanh.f32 %v6426_v5  ;;  %v10076_v58 = vpop.f32.mrb[120].mxu1 }
0x2674   : > { %10978 = vtanh.f32 %v6431_v26  ;;  %v6441_v21 = vadd.f32 %v12605_v16, %v10076_v58  ;;  %v6435_v34 = vpop.f32.mrb[121].mxu1 }
0x2675   : > { %v6436_v36 = vadd.f32 %v12605_v16, %v6435_v34 }
0x2677   : > { %10980 = vtanh.f32 %v6436_v36 }
0x2678   : > { %10982 = vtanh.f32 %v6441_v21 }
0x267d   : > { %v10977_v49 = vpop.eup %10976 }
0x267e   : > { %v10979_v3 = vpop.eup %10978  ;;  %10088 = vmatprep.mubr.msk.f32.mxu0 %vm345_vm1, %v10977_v49 }
0x267f   : > { %10089 = vmatmul.mubr.msk.f32.vlgmr.msra.gmra.mrb[140].mxu0 %vm345_vm1, %v10979_v3 }
0x2680   : > { %10600 = vmatpush3.bf16.msra.mxu0 %v11213_v52 }
0x2681   : > { %v10981_v6 = vpop.eup %10980  ;;  %10602 = vmatprep.subr.bf16.mxu0 %v11223_v56 }
0x2682   : > { %v10983_v4 = vpop.eup %10982  ;;  %10091 = vmatprep.mubr.msk.f32.mxu0 %vm345_vm1, %v10981_v6 }
0x2683   : > { %10092 = vmatmul.mubr.msk.f32.gmra.mrb[142].mxu0 %vm345_vm1, %v10983_v4 }
0x2684   : > { %10604 = vmatpush3.bf16.msra.mxu0 %v11223_v56 }
0x2685   : > { %10610 = vmatprep.subr.bf16.mxu0 %v11213_v52 }
0x2741   : > { %v10079_v46 = vpop.f32.mrb[122].mxu1 }
0x2742   : > { %v6451_v19 = vadd.f32 %v12605_v16, %v10079_v46  ;;  %v6445_v51 = vpop.f32.mrb[123].mxu1 }
0x2743   : > { %v6446_v55 = vadd.f32 %v12605_v16, %v6445_v51 }
0x2745   : > { %10984 = vtanh.f32 %v6446_v55 }
0x2746   : > { %10986 = vtanh.f32 %v6451_v19 }
0x274f   : > { %v10985_v24 = vpop.eup %10984 }
0x2750   : > { %v10987_v9 = vpop.eup %10986  ;;  %10094 = vmatprep.mubr.msk.f32.mxu0 %vm345_vm1, %v10985_v24 }
0x2751   : > { %10095 = vmatmul.mubr.msk.f32.gmra.mrb[144].mxu0 %vm345_vm1, %v10987_v9 }
0x2752   : > { %v10090_v42 = vpop.f32.mrb[140].mxu0 }
0x2753   : > { %v12682_v25 = vadd.f32 %v12619_v12, %v10090_v42  ;;  %v6544_v23 = vpop.f32.mrb[141].mxu0 }
0x2754   : > { %v12685_v11 = vadd.f32 %v12619_v12, %v6544_v23 }
0x2755   : > { %v6574_v0 = vmul.f32 %v12682_v25, %v12614_v22  ;;  %v7066_v9 = vmul.f32 2.0, %v12682_v25 }
0x2756   : > { %v6573_v59 = vmul.f32 %v12685_v11, %v12614_v22  ;;  %v10093_v33 = vpop.f32.mrb[142].mxu0  ;;  %v7065_v42 = vmul.f32 2.0, %v12685_v11 }
0x2757   : > { %v12692_v18 = vadd.f32 %v12619_v12, %v10093_v33  ;;  %v6554_v13 = vpop.f32.mrb[143].mxu0  ;;  %v6580_v39 = vadd.f32 %v6574_v0, %v12546_v43  ;;  %v6817_v0 = vstv %s12609_s7 }
0x2758   : > { %v6579_v47 = vadd.f32 %v6573_v59, %v12542_v48  ;;  %v12696_v60 = vadd.f32 %v12619_v12, %v6554_v13 }
0x2759   : > { %v6576_v27 = vmul.f32 %v12692_v18, %v12614_v22 }
0x275a   : > { %v6575_v31 = vmul.f32 %v12696_v60, %v12614_v22  ;;  %10101 = vmatprep.mubr.msk.f32.mxu1 %vm270_vm0, %v6579_v47  ;;  %v7072_v47 = vadd.f32 %v7066_v9, %v12622_v7  ;;  %v7067_v25 = vmul.f32 2.0, %v12696_v60 }
0x275b   : > { %10102 = vmatmul.mubr.msk.f32.vlgmr.msra.gmra.mrb[124].mxu1 %vm270_vm0, %v6580_v39  ;;  %v6582_v40 = vadd.f32 %v6576_v27, %v12562_v44  ;;  %v7068_v39 = vmul.f32 2.0, %v12692_v18 }
0x275c   : > { %v6581_v54 = vadd.f32 %v6575_v31, %v12557_v41  ;;  %10608 = vmatpush3.bf16.msra.mxu1 %v11160_v2 }
0x275d   : > { %v7074_v18 = vadd.f32 %v7068_v39, %v12632_v37 }
0x275e   : > { %10104 = vmatprep.mubr.msk.f32.mxu1 %vm270_vm0, %v6581_v54  ;;  %v7071_v54 = vadd.f32 %v7065_v42, %v12625_v14 }
0x275f   : > { %10105 = vmatmul.mubr.msk.f32.gmra.mrb[126].mxu1 %vm270_vm0, %v6582_v40 }
0x2824   : > { %v10096_v32 = vpop.f32.mrb[144].mxu0 }
0x2825   : > { %v12711_v57 = vadd.f32 %v12619_v12, %v10096_v32  ;;  %v6564_v10 = vpop.f32.mrb[145].mxu0 }
0x2826   : > { %v12714_v50 = vadd.f32 %v12619_v12, %v6564_v10 }
0x2827   : > { %v6578_v15 = vmul.f32 %v12711_v57, %v12614_v22 }
0x2828   : > { %v6577_v35 = vmul.f32 %v12714_v50, %v12614_v22 }
0x2829   : > { %v6584_v29 = vadd.f32 %v6578_v15, %v12584_v17 }
0x282a   : > { %v6583_v20 = vadd.f32 %v6577_v35, %v12581_v62 }
0x282c   : > { %10107 = vmatprep.mubr.msk.f32.mxu1 %vm270_vm0, %v6583_v20 }
0x282d   : > { %10108 = vmatmul.mubr.msk.f32.gmra.mrb[128].mxu1 %vm270_vm0, %v6584_v29 }
0x282e   : > { %v10103_v28 = vpop.f32.mrb[124].mxu1 }
0x282f   : > { %v6675_v26 = vadd.f32 %v12605_v16, %v10103_v28  ;;  %v6669_v38 = vpop.f32.mrb[125].mxu1 }
0x2830   : > { %v6670_v5 = vadd.f32 %v12605_v16, %v6669_v38 }
0x2832   : > { %10988 = vtanh.f32 %v6670_v5  ;;  %v10106_v58 = vpop.f32.mrb[126].mxu1 }
0x2833   : > { %10990 = vtanh.f32 %v6675_v26  ;;  %v6685_v21 = vadd.f32 %v12605_v16, %v10106_v58  ;;  %v6679_v22 = vpop.f32.mrb[127].mxu1  ;;  %v7073_v26 = vadd.f32 %v7067_v25, %v12636_v30  ;;  %v7070_v30 = vmul.f32 2.0, %v12711_v57 }
0x2834   : > { %v6680_v34 = vadd.f32 %v12605_v16, %v6679_v22  ;;  %v7108_v25 = vadd.s32 96, %v11429_v61 }
0x2836   : > { %10992 = vtanh.f32 %v6680_v34  ;;  %v7069_v34 = vmul.f32 2.0, %v12714_v50  ;;  %vm7110_vm6 = vcmp.eq.s32.totalorder %v11434_v1, %v7108_v25 }
0x2837   : > { %10994 = vtanh.f32 %v6685_v21 }
0x283c   : > { %v10989_v36 = vpop.eup %10988 }
0x283d   : > { %v10991_v49 = vpop.eup %10990  ;;  %10118 = vmatprep.mubr.msk.f32.mxu0 %vm345_vm1, %v10989_v36 }
0x283e   : > { %10119 = vmatmul.mubr.msk.f32.vlgmr.msra.gmra.mrb[146].mxu0 %vm345_vm1, %v10991_v49 }
0x283f   : > { %10612 = vmatpush3.bf16.msra.mxu0 %v11213_v52 }
0x2840   : > { %v10993_v3 = vpop.eup %10992  ;;  %10614 = vmatprep.subr.bf16.mxu0 %v11223_v56 }
0x2841   : > { %v10995_v6 = vpop.eup %10994  ;;  %10121 = vmatprep.mubr.msk.f32.mxu0 %vm345_vm1, %v10993_v3 }
0x2842   : > { %10122 = vmatmul.mubr.msk.f32.gmra.mrb[148].mxu0 %vm345_vm1, %v10995_v6 }
0x2843   : > { %10616 = vmatpush3.bf16.msra.mxu0 %v11223_v56 }
0x2844   : > { %10626 = vmatprep.subr.bf16.mxu0 %v11213_v52 }
0x2900   : > { %v10109_v4 = vpop.f32.mrb[128].mxu1 }
0x2901   : > { %v6695_v46 = vadd.f32 %v12605_v16, %v10109_v4  ;;  %v6689_v19 = vpop.f32.mrb[129].mxu1  ;;  %v7076_v4 = vadd.f32 %v7070_v30, %v12652_v53 }
0x2902   : > { %v6690_v51 = vadd.f32 %v12605_v16, %v6689_v19 }
0x2904   : > { %10996 = vtanh.f32 %v6690_v51  ;;  %v7075_v51 = vadd.f32 %v7069_v34, %v12655_v45 }
0x2905   : > { %10998 = vtanh.f32 %v6695_v46 }
0x290e   : > { %v10997_v55 = vpop.eup %10996 }
0x290f   : > { %v10999_v24 = vpop.eup %10998  ;;  %10124 = vmatprep.mubr.msk.f32.mxu0 %vm345_vm1, %v10997_v55 }
0x2910   : > { %10125 = vmatmul.mubr.msk.f32.gmra.mrb[150].mxu0 %vm345_vm1, %v10999_v24 }
0x2911   : > { %v10120_v23 = vpop.f32.mrb[146].mxu0 }
0x2912   : > { %v6794_v59 = vadd.f32 %v12619_v12, %v10120_v23  ;;  %v6788_v33 = vpop.f32.mrb[147].mxu0 }
0x2913   : > { %v6789_v13 = vadd.f32 %v12619_v12, %v6788_v33 }
0x2914   : > { %v6819_v27 = vmul.f32 %v6817_v0, %v6794_v59  ;;  %v7078_v31 = vmul.f32 2.0, %v6794_v59 }
0x2915   : > { %v6818_v40 = vmul.f32 %v6817_v0, %v6789_v13  ;;  %v7077_v32 = vmul.f32 2.0, %v6789_v13  ;;  %v10123_v11 = vpop.f32.mrb[148].mxu0 }
0x2916   : > { %v6804_v10 = vadd.f32 %v12619_v12, %v10123_v11  ;;  %v6798_v15 = vpop.f32.mrb[149].mxu0  ;;  %v12750_v35 = vadd.f32 %v7078_v31, %v7072_v47  ;;  %v6825_v14 = vadd.f32 %v6819_v27, %v12546_v43 }
0x2917   : > { %v6824_v20 = vadd.f32 %v6818_v40, %v12542_v48  ;;  %v6799_v7 = vadd.f32 %v12619_v12, %v6798_v15  ;;  %v12754_v29 = vadd.f32 %v7077_v32, %v7071_v54  ;;  %v7109_v40 = vadd.s32 96, %v11432_v63 }
0x2918   : > { %v6821_v28 = vmul.f32 %v6817_v0, %v6804_v10  ;;  %v7080_v60 = vmul.f32 2.0, %v6804_v10 }
0x2919   : > { %v6820_v38 = vmul.f32 %v6817_v0, %v6799_v7  ;;  %v7079_v5 = vmul.f32 2.0, %v6799_v7  ;;  %10131 = vmatprep.mubr.msk.f32.mxu1 %vm270_vm0, %v6824_v20  ;;  %vm7111_vm7 = vcmp.eq.s32.totalorder %v11434_v1, %v7109_v40 }
0x291a   : > { %10132 = vmatmul.mubr.msk.f32.vlgmr.msra.gmra.mrb[130].mxu1 %vm270_vm0, %v6825_v14  ;;  %v12761_v58 = vadd.f32 %v7080_v60, %v7074_v18  ;;  %v6827_v37 = vadd.f32 %v6821_v28, %v12562_v44  ;;  %vm10617_vm8 = vmpackc.low %vm7111_vm7, %vm7110_vm6  ;;  %v7095_v60 = vstv %s7064_s12 }
0x291b   : > { %v6826_v21 = vadd.f32 %v6820_v38, %v12557_v41  ;;  %v12764_v22 = vadd.f32 %v7079_v5, %v7073_v26  ;;  %10618 = vmatprep.subr.msk.bf16.mxu1 %vm10617_vm8, %v11096_v8 }
0x291c   : > { %10620 = vmatpush3.bf16.msk.msra.mxu1 %vm10617_vm8, %v11096_v8 }
0x291d   : > { %10134 = vmatprep.mubr.msk.f32.mxu1 %vm270_vm0, %v6826_v21  ;;  %10622 = vmatprep.subr.bf16.mxu1 %v11160_v2 }
0x291e   : > { %10135 = vmatmul.mubr.msk.f32.gmra.mrb[132].mxu1 %vm270_vm0, %v6827_v37 }
0x29e3   : > { %v10126_v36 = vpop.f32.mrb[150].mxu0 }
0x29e4   : > { %v6814_v49 = vadd.f32 %v12619_v12, %v10126_v36  ;;  %v6808_v3 = vpop.f32.mrb[151].mxu0 }
0x29e5   : > { %v6809_v6 = vadd.f32 %v12619_v12, %v6808_v3 }
0x29e6   : > { %v6823_v46 = vmul.f32 %v6817_v0, %v6814_v49  ;;  %v7082_v19 = vmul.f32 2.0, %v6814_v49 }
0x29e7   : > { %v6822_v55 = vmul.f32 %v6817_v0, %v6809_v6  ;;  %v7081_v24 = vmul.f32 2.0, %v6809_v6 }
0x29e8   : > { %v12775_v9 = vadd.f32 %v7082_v19, %v7076_v4  ;;  %v6829_v50 = vadd.f32 %v6823_v46, %v12584_v17 }
0x29e9   : > { %v6828_v57 = vadd.f32 %v6822_v55, %v12581_v62  ;;  %v12778_v42 = vadd.f32 %v7081_v24, %v7075_v51 }
0x29eb   : > { %10137 = vmatprep.mubr.msk.f32.mxu1 %vm270_vm0, %v6828_v57 }
0x29ec   : > { %10138 = vmatmul.mubr.msk.f32.gmra.mrb[134].mxu1 %vm270_vm0, %v6829_v50 }
0x29ed   : > { %v10133_v23 = vpop.f32.mrb[130].mxu1 }
0x29ee   : > { %v6920_v53 = vadd.f32 %v12605_v16, %v10133_v23  ;;  %v6914_v59 = vpop.f32.mrb[131].mxu1 }
0x29ef   : > { %v6915_v45 = vadd.f32 %v12605_v16, %v6914_v59 }
0x29f1   : > { %11000 = vtanh.f32 %v6915_v45  ;;  %v10136_v0 = vpop.f32.mrb[132].mxu1 }
0x29f2   : > { %11002 = vtanh.f32 %v6920_v53  ;;  %v6930_v33 = vadd.f32 %v12605_v16, %v10136_v0  ;;  %v6924_v13 = vpop.f32.mrb[133].mxu1 }
0x29f3   : > { %v6925_v47 = vadd.f32 %v12605_v16, %v6924_v13 }
0x29f5   : > { %11004 = vtanh.f32 %v6925_v47 }
0x29f6   : > { %11006 = vtanh.f32 %v6930_v33 }
0x29fb   : > { %v11001_v39 = vpop.eup %11000 }
0x29fc   : > { %v11003_v27 = vpop.eup %11002  ;;  %10148 = vmatprep.mubr.msk.f32.mxu0 %vm345_vm1, %v11001_v39 }
0x29fd   : > { %10149 = vmatmul.mubr.msk.f32.vlgmr.msra.gmra.mrb[152].mxu0 %vm345_vm1, %v11003_v27 }
0x29fe   : > { %10628 = vmatpush3.bf16.msra.mxu0 %v11213_v52 }
0x29ff   : > { %v11005_v31 = vpop.eup %11004  ;;  %10630 = vmatprep.subr.bf16.mxu0 %v11223_v56 }
0x2a00   : > { %v11007_v54 = vpop.eup %11006  ;;  %10151 = vmatprep.mubr.msk.f32.mxu0 %vm345_vm1, %v11005_v31 }
0x2a01   : > { %10152 = vmatmul.mubr.msk.f32.gmra.mrb[154].mxu0 %vm345_vm1, %v11007_v54 }
0x2a02   : > { %10632 = vmatpush3.bf16.msra.mxu0 %v11223_v56 }
0x2a03   : > { %10638 = vmatprep.subr.bf16.mxu0 %v11213_v52 }
0x2abf   : > { %v10139_v32 = vpop.f32.mrb[134].mxu1 }
0x2ac0   : > { %v6940_v11 = vadd.f32 %v12605_v16, %v10139_v32  ;;  %v6934_v10 = vpop.f32.mrb[135].mxu1 }
0x2ac1   : > { %v6935_v15 = vadd.f32 %v12605_v16, %v6934_v10 }
0x2ac3   : > { %11008 = vtanh.f32 %v6935_v15 }
0x2ac4   : > { %11010 = vtanh.f32 %v6940_v11  ;;  %v12880_v11 = vstv %s7438_s14 }
0x2acd   : > { %v11009_v20 = vpop.eup %11008 }
0x2ace   : > { %v11011_v7 = vpop.eup %11010  ;;  %10154 = vmatprep.mubr.msk.f32.mxu0 %vm345_vm1, %v11009_v20 }
0x2acf   : > { %10155 = vmatmul.mubr.msk.f32.gmra.mrb[156].mxu0 %vm345_vm1, %v11011_v7 }
0x2ad0   : > { %v10150_v18 = vpop.f32.mrb[152].mxu0 }
0x2ad1   : > { %v7039_v14 = vadd.f32 %v12619_v12, %v10150_v18  ;;  %v7033_v28 = vpop.f32.mrb[153].mxu0 }
0x2ad2   : > { %v7034_v26 = vadd.f32 %v12619_v12, %v7033_v28 }
0x2ad3   : > { %v7090_v38 = vadd.f32 %v12750_v35, %v7039_v14 }
0x2ad4   : > { %v7089_v5 = vadd.f32 %v12754_v29, %v7034_v26  ;;  %v10153_v21 = vpop.f32.mrb[154].mxu0 }
0x2ad5   : > { %v7097_v37 = vmul.f32 %v7095_v60, %v7090_v38  ;;  %v7049_v30 = vadd.f32 %v12619_v12, %v10153_v21  ;;  %v7043_v34 = vpop.f32.mrb[155].mxu0 }
0x2ad6   : > { %v7096_v36 = vmul.f32 %v7095_v60, %v7089_v5  ;;  %v7044_v49 = vadd.f32 %v12619_v12, %v7043_v34 }
0x2ad7   : > { %v7092_v3 = vadd.f32 %v12761_v58, %v7049_v30  ;;  %v12819_v46 = vadd.f32 %v7097_v37, %v12546_v43 }
0x2ad8   : > { %v12815_v6 = vadd.f32 %v7096_v36, %v12542_v48  ;;  %v7091_v4 = vadd.f32 %v12764_v22, %v7044_v49 }
0x2ad9   : > { %v7099_v35 = vmul.f32 %v7095_v60, %v7092_v3 }
0x2ada   : > { %v7098_v29 = vmul.f32 %v7095_v60, %v7091_v4  ;;  %10161 = vmatprep.mubr.msk.f32.mxu1 %vm270_vm0, %v12815_v6 }
0x2adb   : > { %10162 = vmatmul.mubr.msk.f32.vlgmr.msra.gmra.mrb[24].mxu1 %vm270_vm0, %v12819_v46  ;;  %v12830_v48 = vadd.f32 %v7099_v35, %v12562_v44 }
0x2adc   : > { %v12826_v19 = vadd.f32 %v7098_v29, %v12557_v41  ;;  %10624 = vmatpush3.bf16.msra.mxu1 %v11160_v2 }
0x2add   : > { %10634 = vmatprep.subr.bf16.mxu1 %v11160_v2 }
0x2ade   : > { %10164 = vmatprep.mubr.msk.f32.mxu1 %vm270_vm0, %v12826_v19 }
0x2adf   : > { %10165 = vmatmul.mubr.msk.f32.gmra.mrb[26].mxu1 %vm270_vm0, %v12830_v48 }
0x2ae0   : > { %10171 = vmatprep.mubr.msk.f32.mxu1 %vm270_vm0, %v12815_v6 }
0x2ae3   : > { %10172 = vmatmul.mubr.msk.f32.vlgmr.msra.gmra.mrb[136].mxu1 %vm270_vm0, %v12819_v46 }
0x2ae4   : > { %10174 = vmatprep.mubr.msk.f32.mxu1 %vm270_vm0, %v12826_v19  ;;  %10636 = vmatpush3.bf16.msra.mxu1 %v11160_v2 }
0x2ae5   : > { %10646 = vmatprep.subr.bf16.mxu1 %v11160_v2 }
0x2ae7   : > { %10175 = vmatmul.mubr.msk.f32.gmra.mrb[138].mxu1 %vm270_vm0, %v12830_v48 }
0x2ba2   : > { %v10156_v43 = vpop.f32.mrb[156].mxu0 }
0x2ba3   : > { %v7059_v41 = vadd.f32 %v12619_v12, %v10156_v43  ;;  %v7053_v44 = vpop.f32.mrb[157].mxu0 }
0x2ba4   : > { %v7054_v58 = vadd.f32 %v12619_v12, %v7053_v44 }
0x2ba5   : > { %v7094_v22 = vadd.f32 %v12775_v9, %v7059_v41 }
0x2ba6   : > { %v7093_v51 = vadd.f32 %v12778_v42, %v7054_v58 }
0x2ba7   : > { %v7101_v55 = vmul.f32 %v7095_v60, %v7094_v22 }
0x2ba8   : > { %v7100_v24 = vmul.f32 %v7095_v60, %v7093_v51 }
0x2ba9   : > { %v12855_v50 = vadd.f32 %v7101_v55, %v12584_v17 }
0x2baa   : > { %v12852_v57 = vadd.f32 %v7100_v24, %v12581_v62 }
0x2bac   : > { %10177 = vmatprep.mubr.msk.f32.mxu1 %vm270_vm0, %v12852_v57 }
0x2bad   : > { %10178 = vmatmul.mubr.msk.f32.gmra.mrb[140].mxu1 %vm270_vm0, %v12855_v50 }
0x2bb6   : > { %v10173_v23 = vpop.f32.mrb[136].mxu1 }
0x2bb7   : > { %v7296_v53 = vadd.f32 %v12605_v16, %v10173_v23  ;;  %v7290_v9 = vpop.f32.mrb[137].mxu1 }
0x2bb8   : > { %v7291_v42 = vadd.f32 %v12605_v16, %v7290_v9 }
0x2bba   : > { %11012 = vtanh.f32 %v7291_v42  ;;  %v10176_v59 = vpop.f32.mrb[138].mxu1 }
0x2bbb   : > { %11014 = vtanh.f32 %v7296_v53  ;;  %v7306_v62 = vadd.f32 %v12605_v16, %v10176_v59  ;;  %v7300_v45 = vpop.f32.mrb[139].mxu1 }
0x2bbc   : > { %v7301_v17 = vadd.f32 %v12605_v16, %v7300_v45 }
0x2bbe   : > { %11016 = vtanh.f32 %v7301_v17 }
0x2bbf   : > { %11018 = vtanh.f32 %v7306_v62 }
0x2bc4   : > { %v11013_v0 = vpop.eup %11012 }
0x2bc5   : > { %v11015_v33 = vpop.eup %11014  ;;  %10188 = vmatprep.mubr.msk.f32.mxu0 %vm345_vm1, %v11013_v0 }
0x2bc6   : > { %10189 = vmatmul.mubr.msk.f32.vlgmr.msra.gmra.mrb[158].mxu0 %vm345_vm1, %v11015_v33 }
0x2bc7   : > { %10640 = vmatpush3.bf16.msra.mxu0 %v11213_v52 }
0x2bc8   : > { %v11017_v13 = vpop.eup %11016  ;;  %10642 = vmatprep.subr.bf16.mxu0 %v11223_v56 }
0x2bc9   : > { %v11019_v47 = vpop.eup %11018  ;;  %10191 = vmatprep.mubr.msk.f32.mxu0 %vm345_vm1, %v11017_v13 }
0x2bca   : > { %10192 = vmatmul.mubr.msk.f32.gmra.mrb[160].mxu0 %vm345_vm1, %v11019_v47 }
0x2bcb   : > { %10644 = vmatpush3.bf16.msra.mxu0 %v11223_v56 }
0x2bcc   : > { %10650 = vmatprep.subr.bf16.mxu0 %v11213_v52 }
0x2c80   : > { %v10179_v39 = vpop.f32.mrb[140].mxu1 }
0x2c81   : > { %v7316_v27 = vadd.f32 %v12605_v16, %v10179_v39  ;;  %v7310_v31 = vpop.f32.mrb[141].mxu1 }
0x2c82   : > { %v7311_v54 = vadd.f32 %v12605_v16, %v7310_v31 }
0x2c84   : > { %11020 = vtanh.f32 %v7311_v54 }
0x2c85   : > { %11022 = vtanh.f32 %v7316_v27 }
0x2c8e   : > { %v11021_v25 = vpop.eup %11020 }
0x2c8f   : > { %v11023_v40 = vpop.eup %11022  ;;  %10194 = vmatprep.mubr.msk.f32.mxu0 %vm345_vm1, %v11021_v25 }
0x2c90   : > { %10195 = vmatmul.mubr.msk.f32.gmra.mrb[162].mxu0 %vm345_vm1, %v11023_v40 }
0x2c99   : > { %v10190_v32 = vpop.f32.mrb[158].mxu0 }
0x2c9a   : > { %v12883_v10 = vadd.f32 %v12619_v12, %v10190_v32  ;;  %v7409_v15 = vpop.f32.mrb[159].mxu0 }
0x2c9b   : > { %v12886_v20 = vadd.f32 %v12619_v12, %v7409_v15 }
0x2c9c   : > { %v7441_v7 = vmul.f32 %v12880_v11, %v12883_v10 }
0x2c9d   : > { %v7440_v18 = vmul.f32 %v12880_v11, %v12886_v20  ;;  %v10193_v14 = vpop.f32.mrb[160].mxu0 }
0x2c9e   : > { %v12893_v28 = vadd.f32 %v12619_v12, %v10193_v14  ;;  %v7419_v60 = vpop.f32.mrb[161].mxu0  ;;  %v7447_v5 = vadd.f32 %v7441_v7, %v12819_v46 }
0x2c9f   : > { %v7446_v26 = vadd.f32 %v7440_v18, %v12815_v6  ;;  %v12897_v38 = vadd.f32 %v12619_v12, %v7419_v60 }
0x2ca0   : > { %v7443_v21 = vmul.f32 %v12880_v11, %v12893_v28 }
0x2ca1   : > { %v7442_v37 = vmul.f32 %v12880_v11, %v12897_v38  ;;  %10201 = vmatprep.mubr.msk.f32.mxu1 %vm270_vm0, %v7446_v26 }
0x2ca2   : > { %10202 = vmatmul.mubr.msk.f32.vlgmr.msra.gmra.mrb[142].mxu1 %vm270_vm0, %v7447_v5  ;;  %v7449_v34 = vadd.f32 %v7443_v21, %v12830_v48 }
0x2ca3   : > { %v7448_v30 = vadd.f32 %v7442_v37, %v12826_v19  ;;  %10648 = vmatpush3.bf16.msra.mxu1 %v11160_v2 }
0x2ca4   : > { %10658 = vmatprep.subr.bf16.mxu1 %v11160_v2 }
0x2ca5   : > { %10204 = vmatprep.mubr.msk.f32.mxu1 %vm270_vm0, %v7448_v30 }
0x2ca6   : > { %10205 = vmatmul.mubr.msk.f32.gmra.mrb[144].mxu1 %vm270_vm0, %v7449_v34 }
0x2d63   : > { %v10196_v36 = vpop.f32.mrb[162].mxu0 }
0x2d64   : > { %v7435_v49 = vadd.f32 %v12619_v12, %v10196_v36  ;;  %v7429_v3 = vpop.f32.mrb[163].mxu0 }
0x2d65   : > { %v7430_v4 = vadd.f32 %v12619_v12, %v7429_v3 }
0x2d66   : > { %v7445_v35 = vmul.f32 %v12880_v11, %v7435_v49 }
0x2d67   : > { %v7444_v29 = vmul.f32 %v12880_v11, %v7430_v4 }
0x2d68   : > { %v7451_v41 = vadd.f32 %v7445_v35, %v12855_v50 }
0x2d69   : > { %v7450_v43 = vadd.f32 %v7444_v29, %v12852_v57 }
0x2d6b   : > { %10207 = vmatprep.mubr.msk.f32.mxu1 %vm270_vm0, %v7450_v43 }
0x2d6c   : > { %10208 = vmatmul.mubr.msk.f32.gmra.mrb[146].mxu1 %vm270_vm0, %v7451_v41 }
0x2d75   : > { %v10203_v44 = vpop.f32.mrb[142].mxu1 }
0x2d76   : > { %v7542_v58 = vadd.f32 %v12605_v16, %v10203_v44  ;;  %v7536_v22 = vpop.f32.mrb[143].mxu1 }
0x2d77   : > { %v7537_v51 = vadd.f32 %v12605_v16, %v7536_v22 }
0x2d79   : > { %11024 = vtanh.f32 %v7537_v51  ;;  %v10206_v55 = vpop.f32.mrb[144].mxu1 }
0x2d7a   : > { %11026 = vtanh.f32 %v7542_v58  ;;  %v7552_v24 = vadd.f32 %v12605_v16, %v10206_v55  ;;  %v7546_v23 = vpop.f32.mrb[145].mxu1 }
0x2d7b   : > { %v7547_v53 = vadd.f32 %v12605_v16, %v7546_v23 }
0x2d7d   : > { %11028 = vtanh.f32 %v7547_v53 }
0x2d7e   : > { %11030 = vtanh.f32 %v7552_v24 }
0x2d83   : > { %v11025_v9 = vpop.eup %11024 }
0x2d84   : > { %v11027_v42 = vpop.eup %11026  ;;  %10218 = vmatprep.mubr.msk.f32.mxu0 %vm345_vm1, %v11025_v9 }
0x2d85   : > { %10219 = vmatmul.mubr.msk.f32.vlgmr.msra.gmra.mrb[164].mxu0 %vm345_vm1, %v11027_v42 }
0x2d86   : > { %10652 = vmatpush3.bf16.msra.mxu0 %v11213_v52 }
0x2d87   : > { %v11029_v59 = vpop.eup %11028  ;;  %10654 = vmatprep.subr.bf16.mxu0 %v11223_v56 }
0x2d88   : > { %v11031_v62 = vpop.eup %11030  ;;  %10221 = vmatprep.mubr.msk.f32.mxu0 %vm345_vm1, %v11029_v59 }
0x2d89   : > { %10222 = vmatmul.mubr.msk.f32.gmra.mrb[166].mxu0 %vm345_vm1, %v11031_v62 }
0x2d8a   : > { %10656 = vmatpush3.bf16.msra.mxu0 %v11223_v56 }
0x2d8b   : > { %10662 = vmatprep.subr.bf16.mxu0 %v11213_v52 }
0x2e3f   : > { %v10209_v45 = vpop.f32.mrb[146].mxu1 }
0x2e40   : > { %v7562_v17 = vadd.f32 %v12605_v16, %v10209_v45  ;;  %v7556_v0 = vpop.f32.mrb[147].mxu1 }
0x2e41   : > { %v7557_v33 = vadd.f32 %v12605_v16, %v7556_v0 }
0x2e43   : > { %11032 = vtanh.f32 %v7557_v33 }
0x2e44   : > { %11034 = vtanh.f32 %v7562_v17 }
0x2e4d   : > { %v11033_v13 = vpop.eup %11032 }
0x2e4e   : > { %v11035_v47 = vpop.eup %11034  ;;  %10224 = vmatprep.mubr.msk.f32.mxu0 %vm345_vm1, %v11033_v13  ;;  %v7928_v13 = vstv %s12875_s13 }
0x2e4f   : > { %10225 = vmatmul.mubr.msk.f32.gmra.mrb[168].mxu0 %vm345_vm1, %v11035_v47 }
0x2e58   : > { %v10220_v39 = vpop.f32.mrb[164].mxu0 }
0x2e59   : > { %v12937_v27 = vadd.f32 %v12619_v12, %v10220_v39  ;;  %v7655_v31 = vpop.f32.mrb[165].mxu0 }
0x2e5a   : > { %v7656_v54 = vadd.f32 %v12619_v12, %v7655_v31 }
0x2e5b   : > { %v7685_v25 = vmul.f32 %v12937_v27, %v12880_v11  ;;  %v8175_v17 = vmul.f32 2.0, %v12937_v27 }
0x2e5c   : > { %v7684_v40 = vmul.f32 %v7656_v54, %v12880_v11  ;;  %v10223_v32 = vpop.f32.mrb[166].mxu0  ;;  %v8174_v0 = vmul.f32 2.0, %v7656_v54 }
0x2e5d   : > { %v12944_v15 = vadd.f32 %v12619_v12, %v10223_v32  ;;  %v7665_v7 = vpop.f32.mrb[167].mxu0  ;;  %v7691_v60 = vadd.f32 %v7685_v25, %v12819_v46  ;;  %v8179_v31 = vadd.f32 %v8175_v17, %v12883_v10  ;;  %v11066_v17 = vld [vmem:[%s13065_s3] ss:$0 sm:$0xff] }
0x2e5e   : > { %v7690_v18 = vadd.f32 %v7684_v40, %v12815_v6  ;;  %v12948_v14 = vadd.f32 %v12619_v12, %v7665_v7  ;;  %v8178_v7 = vadd.f32 %v8174_v0, %v12886_v20 }
0x2e5f   : > { %v7687_v26 = vmul.f32 %v12944_v15, %v12880_v11  ;;  %v8177_v25 = vmul.f32 2.0, %v12944_v15 }
0x2e60   : > { %v7686_v5 = vmul.f32 %v12948_v14, %v12880_v11  ;;  %10231 = vmatprep.mubr.msk.f32.mxu1 %vm270_vm0, %v7690_v18  ;;  %v8176_v18 = vmul.f32 2.0, %v12948_v14 }
0x2e61   : > { %10232 = vmatmul.mubr.msk.f32.vlgmr.msra.gmra.mrb[148].mxu1 %vm270_vm0, %v7691_v60  ;;  %v7693_v37 = vadd.f32 %v7687_v26, %v12830_v48  ;;  %v8181_v15 = vadd.f32 %v8177_v25, %v12893_v28 }
0x2e62   : > { %v7692_v21 = vadd.f32 %v7686_v5, %v12826_v19  ;;  %10660 = vmatpush3.bf16.msra.mxu1 %v11160_v2 }
0x2e64   : > { %10234 = vmatprep.mubr.msk.f32.mxu1 %vm270_vm0, %v7692_v21 }
0x2e65   : > { %10235 = vmatmul.mubr.msk.f32.gmra.mrb[150].mxu1 %vm270_vm0, %v7693_v37 }
0x2f22   : > { %v10226_v30 = vpop.f32.mrb[168].mxu0 }
0x2f23   : > { %v7681_v34 = vadd.f32 %v12619_v12, %v10226_v30  ;;  %v7675_v36 = vpop.f32.mrb[169].mxu0 }
0x2f24   : > { %v7676_v49 = vadd.f32 %v12619_v12, %v7675_v36  ;;  %v8180_v36 = vadd.f32 %v8176_v18, %v12897_v38 }
0x2f25   : > { %v7689_v3 = vmul.f32 %v7681_v34, %v12880_v11 }
0x2f26   : > { %v7688_v4 = vmul.f32 %v7676_v49, %v12880_v11 }
0x2f27   : > { %v7695_v2 = vadd.f32 %v7689_v3, %v12855_v50 }
0x2f28   : > { %v7694_v35 = vadd.f32 %v7688_v4, %v12852_v57 }
0x2f2a   : > { %10237 = vmatprep.mubr.msk.f32.mxu1 %vm270_vm0, %v7694_v35 }
0x2f2b   : > { %10238 = vmatmul.mubr.msk.f32.gmra.mrb[152].mxu1 %vm270_vm0, %v7695_v2 }
0x2f34   : > { %v10233_v29 = vpop.f32.mrb[148].mxu1 }
0x2f35   : > { %v7786_v43 = vadd.f32 %v12605_v16, %v10233_v29  ;;  %v7780_v41 = vpop.f32.mrb[149].mxu1 }
0x2f36   : > { %v7781_v44 = vadd.f32 %v12605_v16, %v7780_v41 }
0x2f38   : > { %11036 = vtanh.f32 %v7781_v44  ;;  %v10236_v58 = vpop.f32.mrb[150].mxu1 }
0x2f39   : > { %11038 = vtanh.f32 %v7786_v43  ;;  %v7796_v22 = vadd.f32 %v12605_v16, %v10236_v58  ;;  %v7790_v11 = vpop.f32.mrb[151].mxu1 }
0x2f3a   : > { %v7791_v51 = vadd.f32 %v12605_v16, %v7790_v11 }
0x2f3c   : > { %11040 = vtanh.f32 %v7791_v51 }
0x2f3d   : > { %11042 = vtanh.f32 %v7796_v22 }
0x2f42   : > { %v11037_v55 = vpop.eup %11036 }
0x2f43   : > { %v11039_v24 = vpop.eup %11038  ;;  %10248 = vmatprep.mubr.msk.f32.mxu0 %vm345_vm1, %v11037_v55 }
0x2f44   : > { %10249 = vmatmul.mubr.msk.f32.vlgmr.msra.gmra.mrb[170].mxu0 %vm345_vm1, %v11039_v24 }
0x2f45   : > { %10664 = vmatpush3.bf16.msra.mxu0 %v11213_v52 }
0x2f46   : > { %v11041_v23 = vpop.eup %11040  ;;  %10666 = vmatprep.subr.bf16.mxu0 %v11223_v56 }
0x2f47   : > { %v11043_v53 = vpop.eup %11042  ;;  %10251 = vmatprep.mubr.msk.f32.mxu0 %vm345_vm1, %v11041_v23 }
0x2f48   : > { %10252 = vmatmul.mubr.msk.f32.gmra.mrb[172].mxu0 %vm345_vm1, %v11043_v53 }
0x2f49   : > { %10668 = vmatpush3.bf16.msra.mxu0 %v11223_v56 }
0x2ffe   : > { %v10239_v9 = vpop.f32.mrb[152].mxu1 }
0x2fff   : > { %v7806_v42 = vadd.f32 %v12605_v16, %v10239_v9  ;;  %v7800_v59 = vpop.f32.mrb[153].mxu1 }
0x3000   : > { %v7801_v62 = vadd.f32 %v12605_v16, %v7800_v59 }
0x3002   : > { %11044 = vtanh.f32 %v7801_v62 }
0x3003   : > { %11046 = vtanh.f32 %v7806_v42 }
0x300c   : > { %v11045_v52 = vpop.eup %11044 }
0x300d   : > { %v11047_v45 = vpop.eup %11046  ;;  %10254 = vmatprep.mubr.msk.f32.mxu0 %vm345_vm1, %v11045_v52  ;;  %v8203_v52 = vadd.s32 112, %v11429_v61 }
0x300e   : > { %10255 = vmatmul.mubr.msk.f32.gmra.mrb[174].mxu0 %vm345_vm1, %v11047_v45  ;;  %v8204_v45 = vadd.s32 112, %v11432_v63 }
0x300f   : > { %vm8205_vm9 = vcmp.eq.s32.totalorder %v11434_v1, %v8203_v52 }
0x3010   : > { %vm8206_vm10 = vcmp.eq.s32.totalorder %v11434_v1, %v8204_v45 }
0x3011   : > { %vm10669_vm11 = vmpackc.low %vm8206_vm10, %vm8205_vm9 }
0x3012   : > { %10670 = vmatprep.subr.msk.bf16.mxu1 %vm10669_vm11, %v11096_v8 }
0x3017   : > { %v10250_v33 = vpop.f32.mrb[170].mxu0 }
0x3018   : > { %v7905_v56 = vadd.f32 %v12619_v12, %v10250_v33  ;;  %v7899_v47 = vpop.f32.mrb[171].mxu0 }
0x3019   : > { %v7900_v39 = vadd.f32 %v12619_v12, %v7899_v47 }
0x301a   : > { %v7930_v40 = vmul.f32 %v7928_v13, %v7905_v56  ;;  %v8183_v32 = vmul.f32 2.0, %v7905_v56 }
0x301b   : > { %v7929_v60 = vmul.f32 %v7928_v13, %v7900_v39  ;;  %v8182_v27 = vmul.f32 2.0, %v7900_v39  ;;  %v10253_v54 = vpop.f32.mrb[172].mxu0  ;;  %v8194_v39 = vstv %s8173_s17 }
0x301c   : > { %v7915_v26 = vadd.f32 %v12619_v12, %v10253_v54  ;;  %v7909_v5 = vpop.f32.mrb[173].mxu0  ;;  %v12994_v21 = vadd.f32 %v8183_v32, %v8179_v31  ;;  %v7936_v20 = vadd.f32 %v7930_v40, %v12819_v46 }
0x301d   : > { %v7935_v37 = vadd.f32 %v7929_v60, %v12815_v6  ;;  %v7910_v10 = vadd.f32 %v12619_v12, %v7909_v5  ;;  %v12998_v30 = vadd.f32 %v8182_v27, %v8178_v7 }
0x301e   : > { %v7932_v34 = vmul.f32 %v7928_v13, %v7915_v26  ;;  %v8185_v14 = vmul.f32 2.0, %v7915_v26 }
0x301f   : > { %v7931_v49 = vmul.f32 %v7928_v13, %v7910_v10  ;;  %v8184_v3 = vmul.f32 2.0, %v7910_v10  ;;  %10261 = vmatprep.mubr.msk.f32.mxu1 %vm270_vm0, %v7935_v37 }
0x3020   : > { %10262 = vmatmul.mubr.msk.f32.vlgmr.msra.gmra.mrb[154].mxu1 %vm270_vm0, %v7936_v20  ;;  %v13005_v4 = vadd.f32 %v8185_v14, %v8181_v15  ;;  %v7938_v28 = vadd.f32 %v7932_v34, %v12830_v48 }
0x3021   : > { %v7937_v35 = vadd.f32 %v7931_v49, %v12826_v19  ;;  %v13008_v2 = vadd.f32 %v8184_v3, %v8180_v36  ;;  %10672 = vmatpush3.bf16.msk.msra.mxu1 %vm10669_vm11, %v11096_v8  ;;  %v11067_v8 = vld [vmem:[%s13067_s5] ss:$0 sm:$0xff] }
0x3023   : > { %10264 = vmatprep.mubr.msk.f32.mxu1 %vm270_vm0, %v7937_v35 }
0x3024   : > { %10265 = vmatmul.mubr.msk.f32.gmra.mrb[156].mxu1 %vm270_vm0, %v7938_v28 }
0x30e1   : > { %v10256_v29 = vpop.f32.mrb[174].mxu0 }
0x30e2   : > { %v7925_v38 = vadd.f32 %v12619_v12, %v10256_v29  ;;  %v7919_v43 = vpop.f32.mrb[175].mxu0 }
0x30e3   : > { %v7920_v41 = vadd.f32 %v12619_v12, %v7919_v43 }
0x30e4   : > { %v7934_v44 = vmul.f32 %v7928_v13, %v7925_v38 }
0x30e5   : > { %v7933_v58 = vmul.f32 %v7928_v13, %v7920_v41 }
0x30e6   : > { %v7940_v11 = vadd.f32 %v7934_v44, %v12855_v50 }
0x30e7   : > { %v7939_v22 = vadd.f32 %v7933_v58, %v12852_v57 }
0x30e9   : > { %10267 = vmatprep.mubr.msk.f32.mxu1 %vm270_vm0, %v7939_v22 }
0x30ea   : > { %10268 = vmatmul.mubr.msk.f32.gmra.mrb[158].mxu1 %vm270_vm0, %v7940_v11 }
0x30f3   : > { %v10263_v51 = vpop.f32.mrb[154].mxu1 }
0x30f4   : > { %v8031_v55 = vadd.f32 %v12605_v16, %v10263_v51  ;;  %v8025_v24 = vpop.f32.mrb[155].mxu1 }
0x30f5   : > { %v8026_v23 = vadd.f32 %v12605_v16, %v8025_v24 }
0x30f7   : > { %11048 = vtanh.f32 %v8026_v23  ;;  %v10266_v53 = vpop.f32.mrb[156].mxu1 }
0x30f8   : > { %11050 = vtanh.f32 %v8031_v55  ;;  %v8041_v12 = vadd.f32 %v12605_v16, %v10266_v53  ;;  %v8035_v9 = vpop.f32.mrb[157].mxu1 }
0x30f9   : > { %v8036_v57 = vadd.f32 %v12605_v16, %v8035_v9 }
0x30fb   : > { %11052 = vtanh.f32 %v8036_v57 }
0x30fc   : > { %11054 = vtanh.f32 %v8041_v12 }
0x3101   : > { %v11049_v50 = vpop.eup %11048 }
0x3102   : > { %v11051_v42 = vpop.eup %11050  ;;  %10278 = vmatprep.mubr.msk.f32.mxu0 %vm345_vm1, %v11049_v50 }
0x3103   : > { %10279 = vmatmul.mubr.msk.f32.vlgmr.msra.gmra.mrb[176].mxu0 %vm345_vm1, %v11051_v42 }
0x3105   : > { %v11053_v59 = vpop.eup %11052 }
0x3106   : > { %v11055_v62 = vpop.eup %11054  ;;  %10281 = vmatprep.mubr.msk.f32.mxu0 %vm345_vm1, %v11053_v59 }
0x3107   : > { %10282 = vmatmul.mubr.msk.f32.gmra.mrb[178].mxu0 %vm345_vm1, %v11055_v62 }
0x31bd   : > { %v10269_v16 = vpop.f32.mrb[158].mxu1 }
0x31be   : > { %v8051_v0 = vadd.f32 %v11066_v17, %v10269_v16  ;;  %v8045_v33 = vpop.f32.mrb[159].mxu1 }
0x31bf   : > { %v8046_v61 = vadd.f32 %v11066_v17, %v8045_v33 }
0x31c1   : > { %11056 = vtanh.f32 %v8046_v61 }
0x31c2   : > { %11058 = vtanh.f32 %v8051_v0 }
0x31cb   : > { %v11057_v63 = vpop.eup %11056 }
0x31cc   : > { %v11059_v13 = vpop.eup %11058  ;;  %10284 = vmatprep.mubr.msk.f32.mxu0 %vm345_vm1, %v11057_v63 }
0x31cd   : > { %10285 = vmatmul.mubr.msk.f32.gmra.mrb[180].mxu0 %vm345_vm1, %v11059_v13 }
0x31d6   : > { %v10280_v1 = vpop.f32.mrb[176].mxu0 }
0x31d7   : > { %v8150_v56 = vadd.f32 %v11067_v8, %v10280_v1  ;;  %v8144_v47 = vpop.f32.mrb[177].mxu0 }
0x31d8   : > { %v8145_v31 = vadd.f32 %v11067_v8, %v8144_v47 }
0x31d9   : > { %v8191_v25 = vadd.f32 %v12994_v21, %v8150_v56 }
0x31da   : > { %v8190_v40 = vadd.f32 %v12998_v30, %v8145_v31  ;;  %v10283_v32 = vpop.f32.mrb[178].mxu0 }
0x31db   : > { %v8196_v7 = vmul.f32 %v8194_v39, %v8191_v25  ;;  %v8160_v18 = vadd.f32 %v11067_v8, %v10283_v32  ;;  %v8154_v60 = vpop.f32.mrb[179].mxu0 }
0x31dc   : > { %v8195_v27 = vmul.f32 %v8194_v39, %v8190_v40  ;;  %v8155_v54 = vadd.f32 %v11067_v8, %v8154_v60 }
0x31dd   : > { %v8193_v26 = vadd.f32 %v13005_v4, %v8160_v18  ;;  %v8200_v10 = vadd.f32 %v8196_v7, %v12819_v46 }
0x31de   : > { %v8199_v5 = vadd.f32 %v8195_v27, %v12815_v6  ;;  %v8192_v37 = vadd.f32 %v13008_v2, %v8155_v54 }
0x31df   : > { %v8198_v15 = vmul.f32 %v8194_v39, %v8193_v26 }
0x31e0   : > { %v8197_v20 = vmul.f32 %v8194_v39, %v8192_v37  ;;  %10291 = vmatprep.mubr.msk.f32.mxu1 %vm270_vm0, %v8199_v5 }
0x31e1   : > { %10292 = vmatmul.mubr.msk.f32.vlgmr.msra.gmra.mrb[24].mxu1 %vm270_vm0, %v8200_v10  ;;  %v8202_v30 = vadd.f32 %v8198_v15, %v12830_v48 }
0x31e2   : > { %v8201_v21 = vadd.f32 %v8197_v20, %v12826_v19 }
0x31e4   : > { %10294 = vmatprep.mubr.msk.f32.mxu1 %vm270_vm0, %v8201_v21 }
0x31e5   : > { %10295 = vmatmul.mubr.msk.f32.gmra.mrb[26].mxu1 %vm270_vm0, %v8202_v30 }
0x32a0   : > { %v10286_v34 = vpop.f32.mrb[180].mxu0 }
0x32a1   : > { %v8164_v6 = vpop.f32.mrb[181].mxu0 }
0x32b4   : > { %v10293_v46 = vpop.f32.mrb[24].mxu1 }
0x32b5   : > { %8313 = vst [vmem:[%s265_s24 + $0x8] sm:$0xff] %v10293_v46  ;;  %v8289_v14 = vpop.f32.mrb[25].mxu1 }
0x32b6   : > { %8312 = vst [vmem:[%s265_s24] sm:$0xff] %v8289_v14 }
0x32b8   : > { %v10296_v36 = vpop.f32.mrb[26].mxu1 }
0x32b9   : > { %8315 = vst [vmem:[%s265_s24 + $0x18] sm:$0xff] %v10296_v36  ;;  %v8299_v19 = vpop.f32.mrb[27].mxu1 }
0x32ba   : > { %8314 = vst [vmem:[%s265_s24 + $0x10] sm:$0xff] %v8299_v19 }
0x32bb PF: > { %s17_s21 = sadd.s32 1, %s11093_s21  }
0x32bc   : > { %p14_p1 = scmp.ge.s32.totalorder %s17_s21, 4  }
0x32be   :  { %16 = sbr.rel (!%p14_p1) target bundleno = 1 (0x1), region = 79 }
0x32c5   :  { %8337 = vsyncpa [#allocation3], 1 }
0x32c6   :  { %8339 = vsyncpa [#allocation3 + $0x1], 1 }

</bundles_post_ra>
